<compile_context>
chip_gen: v7x
topology: tpu7x:2x2x1
jax: 0.10.0
libtpu: 0.0.40
codegen_flags: <defaults>
</compile_context>

<pallas_src>
import functools

import jax
import jax.numpy as jnp
from jax.experimental import pallas as pl
from jax.experimental.pallas import tpu as pltpu


# -----------------------------------------------------------------------------
# Kernel 1: per-point MLP (k->64->128->1024) + max over points.
# grid = (B, N // TN); the point axis is the (arbitrary) reduction axis.
# -----------------------------------------------------------------------------
def _point_mlp_kernel(x_ref, w1, t1, w2, t2, w3, t3, f_ref, max_sc):
    n = pl.program_id(1)

    x = x_ref[0]                                          # (k, TN) bf16

    # conv1 (kernel_size=1): contract channel dim (0) of x with dim 0 of w1.
    h = jax.lax.dot_general(
        x, w1[...],
        dimension_numbers=(((0,), (0,)), ((), ())),
        preferred_element_type=jnp.float32)               # (TN, 64)
    h = jnp.maximum(h + t1[...], 0.0)

    h = jnp.dot(h.astype(jnp.bfloat16), w2[...],
                preferred_element_type=jnp.float32)       # (TN, 128)
    h = jnp.maximum(h + t2[...], 0.0)

    h = jnp.dot(h.astype(jnp.bfloat16), w3[...],
                preferred_element_type=jnp.float32)       # (TN, 1024)

    # 1024-wide bias + ReLU is hoisted past the max (applied in the last step):
    # max_i relu(h_i + t3) == relu(max_i h_i + t3) for per-channel t3.
    tile_max = jnp.max(h, axis=0, keepdims=True)          # (1, 1024) sublane max

    @pl.when(n == 0)
    def _():
        max_sc[...] = tile_max

    @pl.when(n > 0)
    def _():
        max_sc[...] = jnp.maximum(max_sc[...], tile_max)

    @pl.when(n == pl.num_programs(1) - 1)
    def _():
        f_ref[0] = jnp.maximum(max_sc[...] + t3[...], 0.0)


# -----------------------------------------------------------------------------
# Kernel 2: FC head (1024->512->256->k*k) + identity add, batched over B.
# -----------------------------------------------------------------------------
def _fc_head_kernel(k, f_ref, fw1, ft1, fw2, ft2, fw3, fb3, o_ref):
    f = f_ref[...].astype(jnp.bfloat16)                   # (B, 1024)
    g = jnp.dot(f, fw1[...], preferred_element_type=jnp.float32)
    g = jnp.maximum(g + ft1[...], 0.0)                    # (B, 512)
    g = jnp.dot(g.astype(jnp.bfloat16), fw2[...],
                preferred_element_type=jnp.float32)
    g = jnp.maximum(g + ft2[...], 0.0)                    # (B, 256)
    y = jnp.dot(g.astype(jnp.bfloat16), fw3[...],
                preferred_element_type=jnp.float32) + fb3[...]   # (B, kk_pad)

    # flattened identity: eye(k).flatten()[j] == 1 iff j % (k+1) == 0, j < k*k
    j = jax.lax.broadcasted_iota(jnp.int32, y.shape, 1)
    iden = jnp.where(jnp.logical_and(j < k * k, j % (k + 1) == 0), 1.0, 0.0)
    o_ref[...] = (y + iden).astype(o_ref.dtype)


# -----------------------------------------------------------------------------
# Parameter construction (deterministic, synthetic), with BN scale folded into
# the weight columns and the shift kept as a per-channel bias.
# -----------------------------------------------------------------------------
def init_params(key, k):
    eps = 1e-5
    keys = jax.random.split(key, 24)

    def rnd(kk, shape, s=0.05):
        return jax.random.normal(kk, shape, jnp.float32) * s

    def fold(w, conv_b, gamma, beta):
        # Inference-mode BatchNorm with fresh running stats (mean=0, var=1):
        # y = gamma * (w@x + b) / sqrt(1 + eps) + beta
        scale = gamma / ((1.0 + eps) ** 0.5)
        return w * scale[None, :], ((conv_b * scale) + beta)[None, :]

    p = {}
    p["w1"], p["t1"] = fold(rnd(keys[0], (k, 64)), rnd(keys[1], (64,)),
                            1.0 + rnd(keys[2], (64,)), rnd(keys[3], (64,)))
    p["w2"], p["t2"] = fold(rnd(keys[4], (64, 128)), rnd(keys[5], (128,)),
                            1.0 + rnd(keys[6], (128,)), rnd(keys[7], (128,)))
    p["w3"], p["t3"] = fold(rnd(keys[8], (128, 1024)), rnd(keys[9], (1024,)),
                            1.0 + rnd(keys[10], (1024,)), rnd(keys[11], (1024,)))
    p["fw1"], p["ft1"] = fold(rnd(keys[12], (1024, 512)), rnd(keys[13], (512,)),
                              1.0 + rnd(keys[14], (512,)), rnd(keys[15], (512,)))
    p["fw2"], p["ft2"] = fold(rnd(keys[16], (512, 256)), rnd(keys[17], (256,)),
                              1.0 + rnd(keys[18], (256,)), rnd(keys[19], (256,)))
    p["fw3"] = rnd(keys[20], (256, k * k))
    p["fb3"] = rnd(keys[21], (k * k,))[None, :]
    return p


# -----------------------------------------------------------------------------
# Wrapper
# -----------------------------------------------------------------------------
def stnkd_forward(x_bkn, params, k, max_tn=2048):
    """x_bkn: (B, k, N) float32  ->  (B, k, k) float32"""
    B, k_in, N = x_bkn.shape
    assert k_in == k
    # TODO(synk): pad path for ragged N (N not a multiple of 128).
    assert N % 128 == 0, "N must be a multiple of 128"
    # Largest 128-multiple divisor of N, capped so the (TN,1024) f32
    # intermediate stays well inside the scoped VMEM limit on all generations
    # (TN=2048 -> ~8 MiB intermediate + ~1.5 MiB of smaller buffers/weights).
    tn = max(d for d in range(128, min(N, max_tn) + 1, 128) if N % d == 0)

    bf = lambda a: a.astype(jnp.bfloat16)
    const = lambda shape: pl.BlockSpec(shape, lambda b, n: (0, 0))

    # ---- Kernel 1: per-point MLP + global max over points -------------------
    pooled = pl.pallas_call(
        _point_mlp_kernel,
        out_shape=jax.ShapeDtypeStruct((B, 1, 1024), jnp.float32),
        grid_spec=pltpu.PrefetchScalarGridSpec(
            num_scalar_prefetch=0,
            grid=(B, N // tn),
            in_specs=[
                pl.BlockSpec((1, k, tn), lambda b, n: (b, 0, n)),
                const((k, 64)), const((1, 64)),
                const((64, 128)), const((1, 128)),
                const((128, 1024)), const((1, 1024)),
            ],
            out_specs=pl.BlockSpec((1, 1, 1024), lambda b, n: (b, 0, 0)),
            scratch_shapes=[pltpu.VMEM((1, 1024), jnp.float32)],
        ),
        compiler_params=pltpu.CompilerParams(
            dimension_semantics=("parallel", "arbitrary"),
            vmem_limit_bytes=32 * 1024 * 1024,   # ~12 MiB used at tn=2048; safe on v7x
        ),
    )(bf(x_bkn),
      bf(params["w1"]), params["t1"],
      bf(params["w2"]), params["t2"],
      bf(params["w3"]), params["t3"])

    pooled = pooled.reshape(B, 1024)

    # ---- Kernel 2: FC head + identity, batched over B ------------------------
    kk = k * k
    kk_pad = ((kk + 127) // 128) * 128                    # lane-dense output slab
    fw3, fb3 = params["fw3"], params["fb3"]
    if kk_pad != kk:
        fw3 = jnp.pad(fw3, ((0, 0), (0, kk_pad - kk)))
        fb3 = jnp.pad(fb3, ((0, 0), (0, kk_pad - kk)))

    full = lambda shape: pl.BlockSpec(shape, lambda i: (0, 0))
    out = pl.pallas_call(
        functools.partial(_fc_head_kernel, k),
        out_shape=jax.ShapeDtypeStruct((B, kk_pad), jnp.float32),
        grid_spec=pltpu.PrefetchScalarGridSpec(
            num_scalar_prefetch=0,
            grid=(1,),
            in_specs=[
                full((B, 1024)),
                full((1024, 512)), full((1, 512)),
                full((512, 256)), full((1, 256)),
                full((256, kk_pad)), full((1, kk_pad)),
            ],
            out_specs=full((B, kk_pad)),
        ),
        compiler_params=pltpu.CompilerParams(
            dimension_semantics=("arbitrary",)),
    )(pooled,
      bf(params["fw1"]), params["ft1"],
      bf(params["fw2"]), params["ft2"],
      bf(fw3), fb3)

    return out[:, :kk].reshape(B, k, k)


# -----------------------------------------------------------------------------
# Pure-JAX reference (same bf16-operand / f32-accumulate math) for correctness.
# -----------------------------------------------------------------------------
def stnkd_reference(x_bkn, p, k):
    def mm(a, b):
        return jnp.dot(a.astype(jnp.bfloat16), b.astype(jnp.bfloat16),
                       preferred_element_type=jnp.float32)

    B = x_bkn.shape[0]
    x = jnp.transpose(x_bkn, (0, 2, 1))                   # (B, N, k)
    h = jnp.maximum(mm(x, p["w1"]) + p["t1"], 0.0)
    h = jnp.maximum(mm(h, p["w2"]) + p["t2"], 0.0)
    h = jnp.maximum(mm(h, p["w3"]) + p["t3"], 0.0)
    f = jnp.max(h, axis=1)                                # (B, 1024)
    f = jnp.maximum(mm(f, p["fw1"]) + p["ft1"], 0.0)
    f = jnp.maximum(mm(f, p["fw2"]) + p["ft2"], 0.0)
    y = mm(f, p["fw3"]) + p["fb3"]
    y = y + jnp.eye(k, dtype=jnp.float32).reshape(1, k * k)
    return y.reshape(B, k, k)


if __name__ == "__main__":
    B, K, N = 2, 16, 512                                  # PyTorch layout (B, k, N)
    key = jax.random.PRNGKey(0)
    kx, kp = jax.random.split(key)

    x = jax.random.normal(kx, (B, K, N), jnp.float32)
    params = init_params(kp, K)

    out = stnkd_forward(x, params, K)
    out = jax.block_until_ready(out)

    ref = stnkd_reference(x, params, K)
    assert out.shape == (B, K, K)
    assert jnp.allclose(out, ref, atol=2e-3, rtol=2e-3), "mismatch vs reference"

    print("KERNEL_OK")
</pallas_src>

<mosaic_0001>
module attributes {stable_mosaic.version = 11 : i64} {
  func.func @_point_mlp_kernel(%arg0: i32, %arg1: i32, %arg2: memref<1x16x512xbf16, #tpu.memory_space<vmem>>, %arg3: memref<16x64xbf16, #tpu.memory_space<vmem>>, %arg4: memref<1x64xf32, #tpu.memory_space<vmem>>, %arg5: memref<64x128xbf16, #tpu.memory_space<vmem>>, %arg6: memref<1x128xf32, #tpu.memory_space<vmem>>, %arg7: memref<128x1024xbf16, #tpu.memory_space<vmem>>, %arg8: memref<1x1024xf32, #tpu.memory_space<vmem>>, %arg9: memref<1x1x1024xf32, #tpu.memory_space<vmem>>, %arg10: memref<1x1024xf32, #tpu.memory_space<vmem>>) attributes {dimension_semantics = [#tpu.dimension_semantics<parallel>, #tpu.dimension_semantics<arbitrary>], iteration_bounds = array<i64: 2, 1>, scalar_prefetch = 0 : i64, scratch_operands = 1 : i64, tpu.core_type = #tpu.core_type<tc>, window_params = [{transform_indices = @transform_0, window_bounds = array<i64: 1, 16, 512>}, {pipeline_mode = #tpu.pipeline_mode<synchronous>, transform_indices = @transform_1, window_bounds = array<i64: 16, 64>}, {pipeline_mode = #tpu.pipeline_mode<synchronous>, transform_indices = @transform_2, window_bounds = array<i64: 1, 64>}, {pipeline_mode = #tpu.pipeline_mode<synchronous>, transform_indices = @transform_3, window_bounds = array<i64: 64, 128>}, {pipeline_mode = #tpu.pipeline_mode<synchronous>, transform_indices = @transform_4, window_bounds = array<i64: 1, 128>}, {pipeline_mode = #tpu.pipeline_mode<synchronous>, transform_indices = @transform_5, window_bounds = array<i64: 128, 1024>}, {pipeline_mode = #tpu.pipeline_mode<synchronous>, transform_indices = @transform_6, window_bounds = array<i64: 1, 1024>}, {transform_indices = @transform_7, window_bounds = array<i64: 1, 1, 1024>}]} {
    %c0 = arith.constant 0 : index
    %c0_0 = arith.constant 0 : index
    %c0_1 = arith.constant 0 : index
    %0 = vector.load %arg2[%c0, %c0_0, %c0_1] : memref<1x16x512xbf16, #tpu.memory_space<vmem>>, vector<1x16x512xbf16>
    %1 = vector.shape_cast %0 : vector<1x16x512xbf16> to vector<16x512xbf16>
    %c0_2 = arith.constant 0 : index
    %c0_3 = arith.constant 0 : index
    %2 = vector.load %arg3[%c0_2, %c0_3] : memref<16x64xbf16, #tpu.memory_space<vmem>>, vector<16x64xbf16>
    %cst = arith.constant dense<0.000000e+00> : vector<512x64xf32>
    %3 = tpu.matmul %1, %2, %cst {dimension_numbers = #tpu.dot_dimension_numbers<[0], [0], [1], [1], [0, 1, 1, 1], [], []>} : vector<16x512xbf16>, vector<16x64xbf16>, vector<512x64xf32> -> vector<512x64xf32>
    %c0_4 = arith.constant 0 : index
    %c0_5 = arith.constant 0 : index
    %4 = vector.load %arg4[%c0_4, %c0_5] : memref<1x64xf32, #tpu.memory_space<vmem>>, vector<1x64xf32>
    %5 = vector.broadcast %4 : vector<1x64xf32> to vector<512x64xf32>
    %6 = arith.addf %3, %5 : vector<512x64xf32>
    %cst_6 = arith.constant 0.000000e+00 : f32
    %7 = vector.broadcast %cst_6 : f32 to vector<512x64xf32>
    %8 = arith.maximumf %6, %7 : vector<512x64xf32>
    %9 = arith.truncf %8 : vector<512x64xf32> to vector<512x64xbf16>
    %c0_7 = arith.constant 0 : index
    %c0_8 = arith.constant 0 : index
    %10 = vector.load %arg5[%c0_7, %c0_8] : memref<64x128xbf16, #tpu.memory_space<vmem>>, vector<64x128xbf16>
    %cst_9 = arith.constant dense<0.000000e+00> : vector<512x128xf32>
    %11 = tpu.matmul %9, %10, %cst_9 {dimension_numbers = #tpu.dot_dimension_numbers<[1], [0], [0], [1], [0, 0, 1, 1], [], []>} : vector<512x64xbf16>, vector<64x128xbf16>, vector<512x128xf32> -> vector<512x128xf32>
    %c0_10 = arith.constant 0 : index
    %c0_11 = arith.constant 0 : index
    %12 = vector.load %arg6[%c0_10, %c0_11] : memref<1x128xf32, #tpu.memory_space<vmem>>, vector<1x128xf32>
    %13 = vector.broadcast %12 : vector<1x128xf32> to vector<512x128xf32>
    %14 = arith.addf %11, %13 : vector<512x128xf32>
    %cst_12 = arith.constant 0.000000e+00 : f32
    %15 = vector.broadcast %cst_12 : f32 to vector<512x128xf32>
    %16 = arith.maximumf %14, %15 : vector<512x128xf32>
    %17 = arith.truncf %16 : vector<512x128xf32> to vector<512x128xbf16>
    %c0_13 = arith.constant 0 : index
    %c0_14 = arith.constant 0 : index
    %18 = vector.load %arg7[%c0_13, %c0_14] : memref<128x1024xbf16, #tpu.memory_space<vmem>>, vector<128x1024xbf16>
    %cst_15 = arith.constant dense<0.000000e+00> : vector<512x1024xf32>
    %19 = tpu.matmul %17, %18, %cst_15 {dimension_numbers = #tpu.dot_dimension_numbers<[1], [0], [0], [1], [0, 0, 1, 1], [], []>} : vector<512x128xbf16>, vector<128x1024xbf16>, vector<512x1024xf32> -> vector<512x1024xf32>
    %cst_16 = arith.constant dense<0xFF800000> : vector<1024xf32>
    %20 = vector.multi_reduction <maximumf>, %19, %cst_16 [0] : vector<512x1024xf32> to vector<1024xf32>
    %21 = vector.shape_cast %20 : vector<1024xf32> to vector<1x1024xf32>
    %c0_i32 = arith.constant 0 : i32
    %22 = arith.cmpi eq, %arg1, %c0_i32 : i32
    %23 = arith.extui %22 : i1 to i32
    %c0_i32_17 = arith.constant 0 : i32
    %24 = arith.cmpi ne, %23, %c0_i32_17 : i32
    scf.if %24 {
      %c0_22 = arith.constant 0 : index
      %c0_23 = arith.constant 0 : index
      %31 = vector.load %arg10[%c0_22, %c0_23] : memref<1x1024xf32, #tpu.memory_space<vmem>>, vector<1x1024xf32>
      tpu.vector_store %arg10[%c0_22, %c0_23], %21 {strides = array<i32>} : memref<1x1024xf32, #tpu.memory_space<vmem>>, vector<1x1024xf32>,
    } else {
    }
    %c0_i32_18 = arith.constant 0 : i32
    %25 = arith.cmpi sgt, %arg1, %c0_i32_18 : i32
    %26 = arith.extui %25 : i1 to i32
    %c0_i32_19 = arith.constant 0 : i32
    %27 = arith.cmpi ne, %26, %c0_i32_19 : i32
    scf.if %27 {
      %c0_22 = arith.constant 0 : index
      %c0_23 = arith.constant 0 : index
      %31 = vector.load %arg10[%c0_22, %c0_23] : memref<1x1024xf32, #tpu.memory_space<vmem>>, vector<1x1024xf32>
      %32 = arith.maximumf %31, %21 : vector<1x1024xf32>
      %c0_24 = arith.constant 0 : index
      %c0_25 = arith.constant 0 : index
      %33 = vector.load %arg10[%c0_24, %c0_25] : memref<1x1024xf32, #tpu.memory_space<vmem>>, vector<1x1024xf32>
      tpu.vector_store %arg10[%c0_24, %c0_25], %32 {strides = array<i32>} : memref<1x1024xf32, #tpu.memory_space<vmem>>, vector<1x1024xf32>,
    } else {
    }
    %c0_i32_20 = arith.constant 0 : i32
    %28 = arith.cmpi eq, %arg1, %c0_i32_20 : i32
    %29 = arith.extui %28 : i1 to i32
    %c0_i32_21 = arith.constant 0 : i32
    %30 = arith.cmpi ne, %29, %c0_i32_21 : i32
    scf.if %30 {
      %c0_22 = arith.constant 0 : index
      %c0_23 = arith.constant 0 : index
      %31 = vector.load %arg10[%c0_22, %c0_23] : memref<1x1024xf32, #tpu.memory_space<vmem>>, vector<1x1024xf32>
      %c0_24 = arith.constant 0 : index
      %c0_25 = arith.constant 0 : index
      %32 = vector.load %arg8[%c0_24, %c0_25] : memref<1x1024xf32, #tpu.memory_space<vmem>>, vector<1x1024xf32>
      %33 = arith.addf %31, %32 : vector<1x1024xf32>
      %cst_26 = arith.constant 0.000000e+00 : f32
      %34 = vector.broadcast %cst_26 : f32 to vector<1x1024xf32>
      %35 = arith.maximumf %33, %34 : vector<1x1024xf32>
      %c0_27 = arith.constant 0 : index
      %c0_28 = arith.constant 0 : index
      %c0_29 = arith.constant 0 : index
      %36 = vector.load %arg9[%c0_27, %c0_28, %c0_29] : memref<1x1x1024xf32, #tpu.memory_space<vmem>>, vector<1x1x1024xf32>
      %37 = vector.shape_cast %36 : vector<1x1x1024xf32> to vector<1x1024xf32>
      %38 = vector.shape_cast %35 : vector<1x1024xf32> to vector<1x1x1024xf32>
      tpu.vector_store %arg9[%c0_27, %c0_28, %c0_29], %38 {strides = array<i32>} : memref<1x1x1024xf32, #tpu.memory_space<vmem>>, vector<1x1x1024xf32>,
    } else {
    }
    return
  }
  func.func @transform_0(%arg0: i32, %arg1: i32) -> (i32, i32, i32) {
    %c0_i32 = arith.constant 0 : i32
    %c0_i32_0 = arith.constant 0 : i32
    return %arg0, %c0_i32, %arg1 : i32, i32, i32
  }
  func.func @transform_1(%arg0: i32, %arg1: i32) -> (i32, i32) {
    %c0_i32 = arith.constant 0 : i32
    %c0_i32_0 = arith.constant 0 : i32
    %c0_i32_1 = arith.constant 0 : i32
    return %c0_i32, %c0_i32_0 : i32, i32
  }
  func.func @transform_2(%arg0: i32, %arg1: i32) -> (i32, i32) {
    %c0_i32 = arith.constant 0 : i32
    %c0_i32_0 = arith.constant 0 : i32
    %c0_i32_1 = arith.constant 0 : i32
    return %c0_i32, %c0_i32_0 : i32, i32
  }
  func.func @transform_3(%arg0: i32, %arg1: i32) -> (i32, i32) {
    %c0_i32 = arith.constant 0 : i32
    %c0_i32_0 = arith.constant 0 : i32
    %c0_i32_1 = arith.constant 0 : i32
    return %c0_i32, %c0_i32_0 : i32, i32
  }
  func.func @transform_4(%arg0: i32, %arg1: i32) -> (i32, i32) {
    %c0_i32 = arith.constant 0 : i32
    %c0_i32_0 = arith.constant 0 : i32
    %c0_i32_1 = arith.constant 0 : i32
    return %c0_i32, %c0_i32_0 : i32, i32
  }
  func.func @transform_5(%arg0: i32, %arg1: i32) -> (i32, i32) {
    %c0_i32 = arith.constant 0 : i32
    %c0_i32_0 = arith.constant 0 : i32
    %c0_i32_1 = arith.constant 0 : i32
    return %c0_i32, %c0_i32_0 : i32, i32
  }
  func.func @transform_6(%arg0: i32, %arg1: i32) -> (i32, i32) {
    %c0_i32 = arith.constant 0 : i32
    %c0_i32_0 = arith.constant 0 : i32
    %c0_i32_1 = arith.constant 0 : i32
    return %c0_i32, %c0_i32_0 : i32, i32
  }
  func.func @transform_7(%arg0: i32, %arg1: i32) -> (i32, i32, i32) {
    %c0_i32 = arith.constant 0 : i32
    %c0_i32_0 = arith.constant 0 : i32
    %c0_i32_1 = arith.constant 0 : i32
    return %arg0, %c0_i32, %c0_i32_0 : i32, i32, i32
  }
}

</mosaic_0001>

<bundles_post_ra>
// kernel: tpu_custom_call.1
= control target key start
LH: loop header
LB: loop body
LE: loop exit
PB: predicated region body
PF: predicated region fallthrough
CT: control target
= control target key end

     0   :  { %s5668_s0 = inlined_call_operand.hbm [shape: bf16[2,16,512], index: 0, kind: input, shape index: {}]   ;;  %s5669_s1 = inlined_call_operand.hbm [shape: bf16[16,64], index: 1, kind: input, shape index: {}]   ;;  %s5670_s2 = inlined_call_operand.vmem [shape: f32[1,64], index: 2, kind: input, shape index: {}]   ;;  %s5671_s3 = inlined_call_operand.hbm [shape: bf16[64,128], index: 3, kind: input, shape index: {}]   ;;  %s5672_s4 = inlined_call_operand.vmem [shape: f32[1,128], index: 4, kind: input, shape index: {}]   ;;  %s5673_s5 = inlined_call_operand.hbm [shape: bf16[128,1024], index: 5, kind: input, shape index: {}]   ;;  %s5674_s6 = inlined_call_operand.vmem [shape: f32[1,1024], index: 6, kind: input, shape index: {}]   ;;  %s5675_s7 = inlined_call_operand.hbm [shape: f32[2,1,1024], index: 7, kind: output, shape index: {}]  }
   0x1   :  { %5683 = sst [smem:[#allocation18_spill]] %s5674_s6 }
   0x2   :  { %5684 = sst [smem:[#allocation19_spill]] %s5675_s7 }
   0x3   :  { %12 = vsyncpa [#allocation4], 0 }
   0x4   :  { %14 = vsyncpa [#allocation4 + $0x1], 0 }
   0x5   :  { %15 = vsyncpa [#allocation7], 0 }
   0x6   :  { %16 = vsyncpa [#allocation10], 0 }
   0x7   :  { %17 = vsyncpa [#allocation5], 0 }
   0x8   :  { %19 = vsyncpa [#allocation5 + $0x1], 0  ;;  %s4814_s24 = smov 0   ;;  %s4816_s25 = smov 0  }
   0x9   :  { %s4818_s26 = smov 0   ;;  %s4820_s27 = smov 0  }
   0xa   :  { %s4822_s28 = smov 0   ;;  %s4824_s29 = smov 0  }
   0xb LB: > { %5685 = sst [smem:[#allocation16_spill]] %s4739_s24  ;;  %s4074_s30 = sadd.s32 4294967295, %s4759_s29   ;;  %s4759_s29 = sphi %s4824_s29, %s25_s29   ;;  %s4755_s28 = sphi %s4822_s28, %s5710_s28   ;;  %s4751_s27 = sphi %s4820_s27, %s5709_s27   ;;  %s4747_s26 = sphi %s4818_s26, %s5708_s26   ;;  %s4743_s25 = sphi %s4816_s25, %s5707_s25   ;;  %s4739_s24 = sphi %s4814_s24, %s5706_s24  }
   0xc   : > { %s4075_s8 = sadd.s32 4294967294, %s4759_s29   ;;  %p59_p0 = scmp.ne.s32.totalorder %s4743_s25, %s4739_s24 }
   0xd   : > { %p4848_p1 = scmp.eq.s32.totalorder %s4074_s30, 0  ;;  %p4852_p2 = scmp.eq.s32.totalorder %s4074_s30, 1 }
   0xe   : > { %p215_p3 = scmp.eq.s32.totalorder %s4075_s8, 1  ;;  %p4076_p5 = scmp.ge.s32.totalorder %s4759_s29, 1 }
   0xf   : > { %s5686_s9 = scalar_select %p4848_p1, 1, 0 }
  0x10   : > { %s5687_s10 = scalar_select %p4852_p2, 1, 0 }
  0x11   : > { %p4858_p4 = por %p4848_p1, %p59_p0  ;;  %p4863_p6 = por %p215_p3, %p59_p0 }
  0x12   : > { %p222_p7 = scmp.lt.s32.totalorder %s4759_s29, 3  ;;  %s4761_s14 = smov [#allocation6]  }
  0x13   : > { %s5688_s11 = scalar_select %p4858_p4, 1, 0 }
  0x14   : > { %s5689_s12 = scalar_select %p4863_p6, 1, 0 }
  0x15   : > { %p4868_p8 = pnand %p4076_p5, %p222_p7  ;;  %s234_s15 = sshll.u32 %s4761_s14, 4  ;;  %s4872_s15 = int_to_ptr.vmem [resolvable:$true] %s234_s15 }
  0x16   : > { %5690 = sst [smem:[#allocation17_spill]] %s5689_s12  ;;  %s4762_s17 = smov [#allocation8]  }
  0x17   : > { %s5691_s13 = scalar_select %p4868_p8, 1, 0 }
  0x18   : > { %p4459_p9 = pneg %p4868_p8  ;;  %s250_s18 = sshll.u32 %s4762_s17, 4  ;;  %s4883_s18 = int_to_ptr.vmem [resolvable:$true] %s250_s18 }
  0x19   : > { %s4763_s19 = smov [#allocation9]   ;;  %s4555_s23 = scalar_lea.hbm %s5669_s1, 128 }
  0x1a   : > { %p4879_p11 = pnand %p4459_p9, %p4848_p1  ;;  %s4885_s20 = sshll.u32 %s4763_s19, 4  ;;  %s267_s20 = int_to_ptr.vmem [resolvable:$true] %s4885_s20 }
  0x1b   : > { %p4556_p12 = scmp.ne.s32.totalorder %s5669_s1, %s4555_s23  ;;  %p4562_p5 = scmp.lt.u32.totalorder %s4555_s23, %s5669_s1 }
  0x1c   : > { %p4895_p13 = pneg %p4879_p11 }
  0x1e   : > { %p4558_p0 = pnand %p4895_p13, %p4556_p12 }
  0x20   : > { %p4559_p3 = pneg %p4558_p0 }
  0x22   : > { %p4564_p7 = pnand %p4562_p5, %p4559_p3 }
  0x24   : > { %4567 = shalt.err (!%p4564_p7)
}
  0x25   : > { %s4568_s21 = scalar_lea.vmem %s4872_s15, 128  ;;  %p4576_p1 = scmp.lt.s32.totalorder %s4872_s15, %s4872_s15 }
  0x26   : > { %p4569_p9 = scmp.ne.s32.totalorder %s4872_s15, %s4568_s21  ;;  %p4577_p4 = scmp.lt.s32.totalorder %s4568_s21, %s4568_s21 }
  0x28   : > { %p4571_p10 = pnand %p4569_p9, %p4895_p13  ;;  %p4578_p12 = por %p4577_p4, %p4576_p1 }
  0x2a   : > { %p4572_p6 = pneg %p4571_p10 }
  0x2c   : > { %p4579_p0 = pnand %p4578_p12, %p4572_p6 }
  0x2e   : > { %4582 = shalt.err (!%p4579_p0)
}
  0x2f   : > { %s4764_s22 = smov 64   ;;  %s4765_s23 = smov 4  }
  0x30   : > { %4462 = dma.hbm_to_vmem [thread:$0]  (!%p4879_p11), %s5669_s1, 128, %s4872_s15, [#allocation7], %s4764_s22, %s4764_s22, %s4765_s23  }
  0x31   : > { %s4583_s12 = scalar_lea.hbm %s5671_s3, 512 }
  0x32   : > { %p4584_p1 = scmp.ne.s32.totalorder %s5671_s3, %s4583_s12  ;;  %p4590_p10 = scmp.lt.u32.totalorder %s4583_s12, %s5671_s3 }
  0x34   : > { %p4586_p4 = pnand %p4584_p1, %p4895_p13 }
  0x36   : > { %p4587_p6 = pneg %p4586_p4 }
  0x38   : > { %p4592_p3 = pnand %p4590_p10, %p4587_p6 }
  0x3a   : > { %4595 = shalt.err (!%p4592_p3)
}
  0x3b   : > { %s4596_s15 = scalar_lea.vmem %s4883_s18, 512  ;;  %p4604_p12 = scmp.lt.s32.totalorder %s4883_s18, %s4883_s18 }
  0x3c   : > { %p4597_p5 = scmp.ne.s32.totalorder %s4883_s18, %s4596_s15  ;;  %p4605_p0 = scmp.lt.s32.totalorder %s4596_s15, %s4596_s15 }
  0x3e   : > { %p4599_p7 = pnand %p4597_p5, %p4895_p13  ;;  %p4606_p1 = por %p4605_p0, %p4604_p12 }
  0x40   : > { %p4600_p9 = pneg %p4599_p7 }
  0x42   : > { %p4607_p4 = pnand %p4606_p1, %p4600_p9 }
  0x44   : > { %4610 = shalt.err (!%p4607_p4)
}
  0x45   : > { %4465 = dma.hbm_to_vmem [thread:$0]  (!%p4879_p11), %s5671_s3, 512, %s4883_s18, [#allocation7], %s4764_s22, %s4764_s22, %s4765_s23  }
  0x46   : > { %s4611_s30 = scalar_lea.hbm %s5673_s5, 8192 }
  0x47   : > { %p4612_p6 = scmp.ne.s32.totalorder %s5673_s5, %s4611_s30  ;;  %p4618_p5 = scmp.lt.u32.totalorder %s4611_s30, %s5673_s5 }
  0x49   : > { %p4614_p10 = pnand %p4612_p6, %p4895_p13 }
  0x4b   : > { %p4615_p3 = pneg %p4614_p10 }
  0x4d   : > { %p4620_p7 = pnand %p4618_p5, %p4615_p3 }
  0x4f   : > { %4623 = shalt.err (!%p4620_p7)
}
  0x50   : > { %s4624_s15 = scalar_lea.vmem %s267_s20, 8192  ;;  %p4632_p1 = scmp.lt.s32.totalorder %s267_s20, %s267_s20 }
  0x51   : > { %p4625_p9 = scmp.ne.s32.totalorder %s267_s20, %s4624_s15  ;;  %p4633_p4 = scmp.lt.s32.totalorder %s4624_s15, %s4624_s15 }
  0x53   : > { %p4627_p12 = pnand %p4625_p9, %p4895_p13  ;;  %p4634_p8 = por %p4633_p4, %p4632_p1 }
  0x55   : > { %p4628_p0 = pneg %p4627_p12 }
  0x57   : > { %p4635_p2 = pnand %p4634_p8, %p4628_p0 }
  0x59   : > { %4638 = shalt.err (!%p4635_p2)
}
  0x5a   : > { %s4766_s18 = smov 512   ;;  %s4767_s14 = smov 32  }
  0x5b   : > { %4468 = dma.hbm_to_vmem [thread:$0]  (!%p4879_p11), %s5673_s5, 8192, %s267_s20, [#allocation10], %s4766_s18, %s4766_s18, %s4767_s14  }
  0x5c   : > { %s46_s6 = sadd.s32 1, %s4747_s26  ;;  %s37_s7 = sadd.s32 1, %s4755_s28 }
  0x5d   : > { %p53_p2 = scmp.ne.s32.totalorder %s4747_s26, %s4743_s25  ;;  %p39_p8 = scmp.ge.s32.totalorder %s37_s7, 2 }
  0x5e   : > { %p54_p13 = scmp.eq.s32.totalorder %s4759_s29, 0  ;;  %p5694_p6 = scmp.ne.s32.totalorder %s5687_s10, 0 }
  0x5f   : > { %p4480_p3 = scmp.lt.s32.totalorder %s4759_s29, 2  ;;  %s5712_s7 = smov (%p39_p8, %s37_s7), 0 }
  0x60   : > { %p4965_p10 = por %p5694_p6, %p53_p2  ;;  %p55_p5 = por %p54_p13, %p53_p2 }
  0x61   : > { %s283_s16 = sand.u32 1, %s4747_s26   ;;  %s41_s12 = ssub.s32 %s4755_s28, %s5712_s7 }
  0x62   : > { %p44_p7 = scmp.eq.s32.totalorder %s41_s12, 0  ;;  %s4081_s20 = sshll.u32 %s283_s16, 5 }
  0x63   : > { %s4234_s30 = sshll.u32 %s4755_s28, 9  ;;  %s287_s21 = scalar_lea.vmem [#allocation3], %s4081_s20 }
  0x64   : > { %s4977_s8 = scalar_select %p44_p7, %s4747_s26, %s46_s6  }
  0x65   : > { %s4982_s10 = scalar_lea.hbm %s5668_s0, %s4234_s30  ;;  %s296_s15 = sshll.u32 %s287_s21, 4  ;;  %s4984_s15 = int_to_ptr.vmem [resolvable:$true] %s296_s15 }
  0x66   : > { %p4988_p11 = pnand %p4480_p3, %p55_p5  ;;  %s4992_s14 = scalar_lea.sflag [#allocation4], %s283_s16 }
  0x67   : > { %s4639_s22 = scalar_lea.hbm %s4982_s10, 512  ;;  %s4644_s12 = scalar_lea.hbm %s5668_s0, 1024 }
  0x68   : > { %p4640_p9 = scmp.ne.s32.totalorder %s4982_s10, %s4639_s22  ;;  %p4641_p12 = pneg %p4988_p11 }
  0x69   : > { %p4645_p4 = scmp.lt.u32.totalorder %s4982_s10, %s5668_s0  ;;  %p4646_p2 = scmp.lt.u32.totalorder %s4644_s12, %s4639_s22 }
  0x6a   : > { %p4642_p0 = pnand %p4641_p12, %p4640_p9  ;;  %p4648_p13 = scmp.lt.u32.totalorder %s4639_s22, %s4982_s10 }
  0x6b   : > { %p4647_p8 = por %p4646_p2, %p4645_p4 }
  0x6c   : > { %p4643_p1 = pneg %p4642_p0 }
  0x6d   : > { %p4649_p6 = por %p4648_p13, %p4647_p8 }
  0x6f   : > { %p4650_p3 = pnand %p4649_p6, %p4643_p1 }
  0x71   : > { %4653 = shalt.err (!%p4650_p3)
}
  0x72   : > { %s4654_s16 = scalar_lea.vmem %s4984_s15, 512  ;;  %s4768_s17 = smov [#allocation3]  }
  0x73   : > { %p4655_p5 = scmp.ne.s32.totalorder %s4984_s15, %s4654_s16  ;;  %s4659_s19 = sshll.u32 %s4768_s17, 4  ;;  %s4660_s19 = int_to_ptr.vmem [resolvable:$false] %s4659_s19 }
  0x74   : > { %s4661_s21 = scalar_lea.vmem %s4660_s19, 1024  ;;  %p4662_p0 = scmp.lt.s32.totalorder %s4984_s15, %s4660_s19 }
  0x75   : > { %p4657_p7 = pnand %p4655_p5, %p4641_p12  ;;  %p4663_p4 = scmp.lt.s32.totalorder %s4661_s21, %s4654_s16 }
  0x77   : > { %p4658_p9 = pneg %p4657_p7  ;;  %p4664_p2 = por %p4663_p4, %p4662_p0 }
  0x79   : > { %p4665_p8 = pnand %p4664_p2, %p4658_p9 }
  0x7b   : > { %4668 = shalt.err (!%p4665_p8)
}
  0x7c   : > { %s4769_s22 = smov 256   ;;  %s4770_s23 = smov 16  }
  0x7d   : > { %4472 = dma.hbm_to_vmem [thread:$0]  (!%p4988_p11), %s4982_s10, 512, %s4984_s15, %s4992_s14, %s4769_s22, %s4769_s22, %s4770_s23  }
  0x7e   : > { %p5697_p12 = scmp.ne.s32.totalorder %s5691_s13, 0 }
  0x7f   : > { %s5023_s6 = sand.u32 (!%p5697_p12), 1, %s4743_s25   ;;  %p5698_p1 = scmp.ne.s32.totalorder (!%p5697_p12), %s5688_s11, 0 }
  0x80   : > { %308 = sbr.rel (%p5697_p12) target bundleno = 1453 (0x5ad), region = 48  ;;  %s4085_s12 = sshll.u32 (!%p5697_p12), %s5023_s6, 5 }
  0x81   : > { %s311_s20 = scalar_lea.sflag (!%p5697_p12), [#allocation4], %s5023_s6  ;;  %s314_s30 = scalar_lea.vmem (!%p5697_p12), [#allocation3], %s4085_s12 }
  0x87   : > { %4722 = dma.done.wait (%p5698_p1), %s311_s20, 512  }
  0x88   : > { %4724 = vsyncadd (%p5698_p1), %s311_s20, 4294966784  ;;  %p5699_p13 = scmp.ne.s32.totalorder %s5686_s9, 0 }
  0x8a   : > { %4726 = dma.done.wait (%p5699_p13), [#allocation7], 640  }
  0x8b   : > { %4728 = vsyncadd (%p5699_p13), [#allocation7], 4294966656 }
  0x8c   : > { %4730 = dma.done.wait (%p5699_p13), [#allocation10], 8192  }
  0x8d   : > { %4732 = vsyncadd (%p5699_p13), [#allocation10], 4294959104  ;;  %v4544_v0 = vld [vmem:[%s314_s30] ss:$16 sps:$4 sm:$0xff]   ;;  %v4548_v2 = vld [vmem:[%s314_s30 + $0x8] ss:$16 sps:$4 sm:$0xff]  }
  0x8e   : > { %392 = vxpose.xlu0.c.b16.start.end [1/1] (short) %v4544_v0, 128  ;;  %v4547_v1 = vld [vmem:[#allocation6] sm:$0xff]   ;;  %424 = vxpose.xlu1.c.b16.start.end [1/1] (short) %v4548_v2, 128  ;;  %v4550_v4 = vld [vmem:[%s314_s30 + $0xc] ss:$16 sps:$4 sm:$0xff]   ;;  %v4552_v6 = vld [vmem:[#allocation8 + $0x8] sm:$0xff]   ;;  %vm462_vm0 = vcmask 130048   ;;  %vm983_vm1 = vcmask 523264  }
  0x8f   : > { %4305 = vmatprep.subr.bf16.mxu0 %v4547_v1  ;;  %v4546_v3 = vld [vmem:[%s314_s30 + $0x4] ss:$16 sps:$4 sm:$0xff]   ;;  %v4551_v5 = vld [vmem:[#allocation8] sm:$0xff]   ;;  %v4553_v33 = vld [vmem:[#allocation8 + $0x10] sm:$0xff]   ;;  %s4089_s15 = sshll.u32 %s5023_s6, 3  ;;  %s5700_s16 = sld [smem:[#allocation18_spill]] }
  0x90   : > { %4306 = vmatpush3.bf16.msra.mxu0 %v4547_v1  ;;  %4371 = vmatprep.subr.bf16.mxu1 %v4551_v5  ;;  %v4554_v35 = vld [vmem:[#allocation8 + $0x18] sm:$0xff]   ;;  %v1465_v41 = vld [vmem:[#allocation9] sm:$0xff]  ;;  %v5071_v43 = vld [vmem:[#allocation9 + $0x8] sm:$0xff]  ;;  %s4235_s17 = sshll.u32 %s4751_s27, 7  ;;  %s356_s19 = scalar_lea.vmem [#allocation11], %s4089_s15 }
  0x91   : > { %4372 = vmatpush3.bf16.msra.mxu1 %v4551_v5  ;;  %v1469_v42 = vld [vmem:[#allocation9 + $0x20] sm:$0xff]  ;;  %v5073_v46 = vld [vmem:[#allocation9 + $0x28] sm:$0xff]  ;;  %s3964_s21 = sshll.u32 %s356_s19, 4  ;;  %s5701_s12 = sld [smem:[#allocation19_spill]]  ;;  %s5621_s21 = int_to_ptr.vmem [resolvable:$true] %s3964_s21 }
  0x92   : > { %4373 = vmatprep.subr.bf16.mxu1 %v4552_v6  ;;  %v4165_v44 = vcombine.low %v1465_v41, %v1469_v42  ;;  %v4166_v45 = vcombine.high %v1465_v41, %v1469_v42  ;;  %v4167_v47 = vcombine.low %v5071_v43, %v5073_v46  ;;  %v4168_v48 = vcombine.high %v5071_v43, %v5073_v46  ;;  %v1473_v49 = vld [vmem:[#allocation9 + $0x40] sm:$0xff]  ;;  %s3950_s30 = scalar_lea.sflag [#allocation5], %s5023_s6  ;;  %s4669_s9 = scalar_lea.vmem %s5621_s21, 128 }
  0x93   : > { %v1477_v50 = vld [vmem:[#allocation9 + $0x60] sm:$0xff]  ;;  %p4670_p11 = scmp.ne.s32.totalorder %s5621_s21, %s4669_s9  ;;  %s4773_s27 = smov [#allocation11]  }
  0x94   : > { %1849 = vmatprep.subr.bf16.mxu0 %v4166_v45  ;;  %v4173_v51 = vcombine.low %v1473_v49, %v1477_v50  ;;  %v4174_v52 = vcombine.high %v1473_v49, %v1477_v50  ;;  %v1481_v53 = vld [vmem:[#allocation9 + $0x80] sm:$0xff]  ;;  %v1490_v50 = vld [vmem:[#allocation9 + $0xc8] sm:$0xff]  ;;  %s4673_s11 = sshll.u32 %s4773_s27, 4  ;;  %s4674_s11 = int_to_ptr.vmem [resolvable:$false] %s4673_s11 }
  0x95   : > { %4374 = vmatpush3.bf16.msra.mxu1 %v4552_v6  ;;  %v1485_v54 = vld [vmem:[#allocation9 + $0xa0] sm:$0xff]  ;;  %p4671_p6 = pnand %p4670_p11, %p4965_p10  ;;  %s4675_s13 = scalar_lea.vmem %s4674_s11, 256 }
  0x96   : > { %4375 = vmatprep.subr.bf16.mxu1 %v4553_v33  ;;  %v4181_v55 = vcombine.low %v1481_v53, %v1485_v54  ;;  %v4182_v56 = vcombine.high %v1481_v53, %v1485_v54  ;;  %v1489_v57 = vld [vmem:[#allocation9 + $0xc0] sm:$0xff]  ;;  %p4676_p5 = scmp.lt.s32.totalorder %s5621_s21, %s4674_s11  ;;  %p4677_p7 = scmp.lt.s32.totalorder %s4675_s13, %s4669_s9 }
  0x97   : > { %v1493_v58 = vld [vmem:[#allocation9 + $0xe0] sm:$0xff]  ;;  %s5619_s20 = scalar_lea.hbm %s5701_s12, %s4235_s17  ;;  %p4672_p3 = pneg %p4671_p6 }
  0x98   : > { %v4189_v59 = vcombine.low %v1489_v57, %v1493_v58  ;;  %v4190_v60 = vcombine.high %v1489_v57, %v1493_v58  ;;  %v1497_v61 = vld [vmem:[#allocation9 + $0x100] sm:$0xff]  ;;  %p4678_p9 = por %p4677_p7, %p4676_p5 }
  0x99   : > { %4376 = vmatpush3.bf16.msra.mxu1 %v4553_v33  ;;  %v1501_v62 = vld [vmem:[#allocation9 + $0x120] sm:$0xff] }
  0x9a   : > { %4377 = vmatprep.subr.bf16.mxu1 %v4554_v35  ;;  %v4197_v63 = vcombine.low %v1497_v61, %v1501_v62  ;;  %v4198_v0 = vcombine.high %v1497_v61, %v1501_v62  ;;  %v1505_v1 = vld [vmem:[#allocation9 + $0x140] sm:$0xff]  ;;  %p4679_p0 = pnand %p4678_p9, %p4672_p3 }
  0x9b   : > { %v1509_v2 = vld [vmem:[#allocation9 + $0x160] sm:$0xff] }
  0x9c   : > { %v1513_v5 = vld [vmem:[#allocation9 + $0x180] sm:$0xff] }
  0x9d   : > { %4378 = vmatpush3.bf16.msra.mxu1 %v4554_v35  ;;  %v1517_v6 = vld [vmem:[#allocation9 + $0x1a0] sm:$0xff] }
  0x9e   : > { %2202 = vmatprep.subr.bf16.mxu1 %v4168_v48 }
  0xab   : > { %408 = vxpose.xlu0.c.b16.start.end [1/1] (short) %v4546_v3, 128  ;;  %440 = vxpose.xlu1.c.b16.start.end [1/1] (short) %v4550_v4, 128  ;;  %v4205_v3 = vcombine.low %v1505_v1, %v1509_v2  ;;  %v4206_v4 = vcombine.high %v1505_v1, %v1509_v2 }
  0xf4   : > { %v400_v7 = vpop.trf.xlu0  ;;  %v432_v18 = vpop.trf.xlu1 }
  0xf5   : > { %4307 = vmatprep.mubr.msk.bf16.mxu0 %vm462_vm0, %v400_v7  ;;  %v4213_v7 = vcombine.low %v1513_v5, %v1517_v6 }
  0xf8   : > { %v401_v8 = vpop.trf.xlu0  ;;  %v433_v20 = vpop.trf.xlu1 }
  0xf9   : > { %4308 = vmatmul.mubr.msk.bf16.vlgmr.msra.gmra.mrb[0].mxu0 %vm462_vm0, %v401_v8  ;;  %v4214_v8 = vcombine.high %v1513_v5, %v1517_v6  ;;  %v1506_v5 = vld [vmem:[#allocation9 + $0x148] sm:$0xff] }
  0xfa   : > { %1850 = vmatpush1.bf16.msra.mxu0 %v4165_v44  ;;  %v1510_v6 = vld [vmem:[#allocation9 + $0x168] sm:$0xff] }
  0xfb   : > { %1851 = vmatprep.subr.bf16.mxu0 %v4174_v52 }
  0xfc   : > { %v402_v9 = vpop.trf.xlu0  ;;  %v434_v22 = vpop.trf.xlu1 }
  0xfd   : > { %4311 = vmatprep.mubr.msk.bf16.mxu0 %vm462_vm0, %v402_v9  ;;  %v5082_v9 = vld [vmem:[%s5670_s2] ss:$0 sm:$0xff] }
  0xfe   : > { %1852 = vmatpush1.bf16.msra.mxu0 %v4173_v51  ;;  %v1494_v51 = vld [vmem:[#allocation9 + $0xe8] sm:$0xff] }
  0xff   : > { %1853 = vmatprep.subr.bf16.mxu0 %v4182_v56  ;;  %v4192_v58 = vcombine.high %v1490_v50, %v1494_v51  ;;  %v4191_v1 = vcombine.low %v1490_v50, %v1494_v51 }
 0x100   : > { %v403_v10 = vpop.trf.xlu0  ;;  %v435_v25 = vpop.trf.xlu1 }
 0x101   : > { %4312 = vmatmul.mubr.msk.bf16.gmra.mrb[4].mxu0 %vm462_vm0, %v403_v10 }
 0x102   : > { %1854 = vmatpush1.bf16.msra.mxu0 %v4181_v55 }
 0x103   : > { %1855 = vmatprep.subr.bf16.mxu0 %v4190_v60 }
 0x104   : > { %v404_v11 = vpop.trf.xlu0  ;;  %v436_v27 = vpop.trf.xlu1 }
 0x105   : > { %4315 = vmatprep.mubr.msk.bf16.mxu0 %vm462_vm0, %v404_v11  ;;  %v1521_v11 = vld [vmem:[#allocation9 + $0x1c0] sm:$0xff] }
 0x106   : > { %1856 = vmatpush1.bf16.msra.mxu0 %v4189_v59  ;;  %v1502_v59 = vld [vmem:[#allocation9 + $0x128] sm:$0xff] }
 0x107   : > { %1857 = vmatprep.subr.bf16.mxu0 %v4198_v0 }
 0x108   : > { %v405_v12 = vpop.trf.xlu0  ;;  %v437_v28 = vpop.trf.xlu1 }
 0x109   : > { %4316 = vmatmul.mubr.msk.bf16.gmra.mrb[8].mxu0 %vm462_vm0, %v405_v12  ;;  %v1525_v12 = vld [vmem:[#allocation9 + $0x1e0] sm:$0xff] }
 0x10a   : > { %1858 = vmatpush1.bf16.msra.mxu0 %v4197_v63 }
 0x10b   : > { %1859 = vmatprep.subr.bf16.mxu0 %v4206_v4 }
 0x10c   : > { %v406_v13 = vpop.trf.xlu0  ;;  %v438_v29 = vpop.trf.xlu1 }
 0x10d   : > { %4319 = vmatprep.mubr.msk.bf16.mxu0 %vm462_vm0, %v406_v13 }
 0x10e   : > { %1860 = vmatpush1.bf16.msra.mxu0 %v4205_v3 }
 0x10f   : > { %1861 = vmatprep.subr.bf16.mxu0 %v4214_v8 }
 0x110   : > { %v407_v14 = vpop.trf.xlu0  ;;  %v439_v30 = vpop.trf.xlu1 }
 0x111   : > { %4320 = vmatmul.mubr.msk.bf16.gmra.mrb[12].mxu0 %vm462_vm0, %v407_v14 }
 0x112   : > { %1862 = vmatpush1.bf16.msra.mxu0 %v4213_v7 }
 0x114   : > { %v416_v15 = vpop.trf.xlu0  ;;  %v448_v31 = vpop.trf.xlu1 }
 0x115   : > { %4323 = vmatprep.mubr.msk.bf16.mxu0 %vm462_vm0, %v416_v15  ;;  %v4221_v15 = vcombine.low %v1521_v11, %v1525_v12 }
 0x118   : > { %v417_v16 = vpop.trf.xlu0  ;;  %v449_v32 = vpop.trf.xlu1 }
 0x119   : > { %4324 = vmatmul.mubr.msk.bf16.gmra.mrb[16].mxu0 %vm462_vm0, %v417_v16  ;;  %v4222_v16 = vcombine.high %v1521_v11, %v1525_v12 }
 0x11b   : > { %1863 = vmatprep.subr.bf16.mxu0 %v4222_v16 }
 0x11c   : > { %v418_v17 = vpop.trf.xlu0  ;;  %v450_v34 = vpop.trf.xlu1  ;;  %1864 = vmatpush1.bf16.msra.mxu0 %v4221_v15 }
 0x11d   : > { %4327 = vmatprep.mubr.msk.bf16.mxu0 %vm462_vm0, %v418_v17 }
 0x120   : > { %v419_v19 = vpop.trf.xlu0  ;;  %v451_v36 = vpop.trf.xlu1 }
 0x121   : > { %4328 = vmatmul.mubr.msk.bf16.gmra.mrb[20].mxu0 %vm462_vm0, %v419_v19 }
 0x124   : > { %v420_v21 = vpop.trf.xlu0  ;;  %v452_v37 = vpop.trf.xlu1 }
 0x125   : > { %4331 = vmatprep.mubr.msk.bf16.mxu0 %vm462_vm0, %v420_v21 }
 0x128   : > { %v421_v23 = vpop.trf.xlu0  ;;  %v453_v38 = vpop.trf.xlu1 }
 0x129   : > { %4332 = vmatmul.mubr.msk.bf16.gmra.mrb[24].mxu0 %vm462_vm0, %v421_v23 }
 0x12c   : > { %v422_v24 = vpop.trf.xlu0  ;;  %v454_v39 = vpop.trf.xlu1 }
 0x12d   : > { %4335 = vmatprep.mubr.msk.bf16.mxu0 %vm462_vm0, %v422_v24 }
 0x130   : > { %v423_v26 = vpop.trf.xlu0  ;;  %v455_v40 = vpop.trf.xlu1 }
 0x131   : > { %4336 = vmatmul.mubr.msk.bf16.gmra.mrb[28].mxu0 %vm462_vm0, %v423_v26  ;;  %v1474_v26 = vld [vmem:[#allocation9 + $0x48] sm:$0xff] }
 0x132   : > { %4339 = vmatprep.mubr.msk.bf16.mxu0 %vm462_vm0, %v432_v18 }
 0x139   : > { %4340 = vmatmul.mubr.msk.bf16.gmra.mrb[32].mxu0 %vm462_vm0, %v433_v20 }
 0x13a   : > { %4343 = vmatprep.mubr.msk.bf16.mxu0 %vm462_vm0, %v434_v22 }
 0x141   : > { %4344 = vmatmul.mubr.msk.bf16.gmra.mrb[36].mxu0 %vm462_vm0, %v435_v25 }
 0x142   : > { %4347 = vmatprep.mubr.msk.bf16.mxu0 %vm462_vm0, %v436_v27  ;;  %v1478_v27 = vld [vmem:[#allocation9 + $0x68] sm:$0xff] }
 0x143   : > { %v4176_v33 = vcombine.high %v1474_v26, %v1478_v27  ;;  %v4175_v44 = vcombine.low %v1474_v26, %v1478_v27 }
 0x149   : > { %4348 = vmatmul.mubr.msk.bf16.gmra.mrb[40].mxu0 %vm462_vm0, %v437_v28 }
 0x14a   : > { %4351 = vmatprep.mubr.msk.bf16.mxu0 %vm462_vm0, %v438_v29 }
 0x151   : > { %4352 = vmatmul.mubr.msk.bf16.gmra.mrb[44].mxu0 %vm462_vm0, %v439_v30 }
 0x152   : > { %4355 = vmatprep.mubr.msk.bf16.mxu0 %vm462_vm0, %v448_v31 }
 0x159   : > { %4356 = vmatmul.mubr.msk.bf16.gmra.mrb[48].mxu0 %vm462_vm0, %v449_v32 }
 0x15a   : > { %4359 = vmatprep.mubr.msk.bf16.mxu0 %vm462_vm0, %v450_v34 }
 0x161   : > { %4360 = vmatmul.mubr.msk.bf16.gmra.mrb[52].mxu0 %vm462_vm0, %v451_v36  ;;  %v1482_v36 = vld [vmem:[#allocation9 + $0x88] sm:$0xff] }
 0x162   : > { %4363 = vmatprep.mubr.msk.bf16.mxu0 %vm462_vm0, %v452_v37  ;;  %v1486_v37 = vld [vmem:[#allocation9 + $0xa8] sm:$0xff] }
 0x163   : > { %v4184_v48 = vcombine.high %v1482_v36, %v1486_v37  ;;  %v4183_v55 = vcombine.low %v1482_v36, %v1486_v37 }
 0x169   : > { %4364 = vmatmul.mubr.msk.bf16.gmra.mrb[56].mxu0 %vm462_vm0, %v453_v38 }
 0x16a   : > { %4367 = vmatprep.mubr.msk.bf16.mxu0 %vm462_vm0, %v454_v39 }
 0x171   : > { %4368 = vmatmul.mubr.msk.bf16.gmra.mrb[60].mxu0 %vm462_vm0, %v455_v40 }
 0x1cc   : > { %v4309_v10 = vpop.f32.mrb[0].mxu0 }
 0x1cd   : > { %v602_v13 = vadd.f32 %v4309_v10, %v5082_v9  ;;  %v593_v14 = vpop.f32.mrb[1].mxu0 }
 0x1ce   : > { %v594_v17 = vadd.f32 %v5082_v9, %v593_v14  ;;  %v4310_v18 = vpop.f32.mrb[2].mxu0  ;;  %v4208_v14 = vcombine.high %v1506_v5, %v1510_v6 }
 0x1cf   : > { %v605_v19 = vadd.f32 %v4310_v18, %v5082_v9  ;;  %v596_v20 = vpop.f32.mrb[3].mxu0  ;;  %v850_v22 = vmax.f32 %v602_v13, 0.0  ;;  %v1518_v18 = vld [vmem:[#allocation9 + $0x1a8] sm:$0xff] }
 0x1d0   : > { %v597_v21 = vadd.f32 %v5082_v9, %v596_v20  ;;  %v848_v24 = vmax.f32 %v594_v17, 0.0  ;;  %v1514_v17 = vld [vmem:[#allocation9 + $0x188] sm:$0xff] }
 0x1d1   : > { %v851_v23 = vmax.f32 %v605_v19, 0.0  ;;  %v4216_v26 = vcombine.high %v1514_v17, %v1518_v18 }
 0x1d2   : > { %v849_v25 = vmax.f32 %v597_v21, 0.0 }
 0x1d3   : > { %v913_v28 = vpack.c.bf16 %v851_v23, %v850_v22 }
 0x1d4   : > { %v4313_v29 = vpop.f32.mrb[4].mxu0  ;;  %v912_v30 = vpack.c.bf16 %v849_v25, %v848_v24  ;;  %v4207_v24 = vcombine.low %v1506_v5, %v1510_v6 }
 0x1d5   : > { %v618_v31 = vadd.f32 %v4313_v29, %v5082_v9  ;;  %v609_v32 = vpop.f32.mrb[5].mxu0  ;;  %v1526_v29 = vld [vmem:[#allocation9 + $0x1e8] sm:$0xff] }
 0x1d6   : > { %v610_v34 = vadd.f32 %v5082_v9, %v609_v32  ;;  %4379 = vmatprep.mubr.msk.bf16.mxu1 %vm983_vm1, %v912_v30  ;;  %v4314_v35 = vpop.f32.mrb[6].mxu0 }
 0x1d7   : > { %v854_v38 = vmax.f32 %v618_v31, 0.0  ;;  %v621_v39 = vadd.f32 %v4314_v35, %v5082_v9  ;;  %4380 = vmatmul.mubr.msk.bf16.vlgmr.msra.gmra.mrb[0].mxu1 %vm983_vm1, %v913_v28  ;;  %v612_v40 = vpop.f32.mrb[7].mxu0  ;;  %v1522_v28 = vld [vmem:[#allocation9 + $0x1c8] sm:$0xff] }
 0x1d8   : > { %v852_v41 = vmax.f32 %v610_v34, 0.0  ;;  %v613_v42 = vadd.f32 %v5082_v9, %v612_v40  ;;  %2203 = vmatpush1.bf16.msra.mxu1 %v4167_v47  ;;  %v1498_v47 = vld [vmem:[#allocation9 + $0x108] sm:$0xff]  ;;  %v4224_v36 = vcombine.high %v1522_v28, %v1526_v29 }
 0x1d9   : > { %v855_v45 = vmax.f32 %v621_v39, 0.0  ;;  %2204 = vmatprep.subr.bf16.mxu1 %v4176_v33  ;;  %v4200_v3 = vcombine.high %v1498_v47, %v1502_v59  ;;  %v4199_v11 = vcombine.low %v1498_v47, %v1502_v59  ;;  %v4215_v33 = vcombine.low %v1514_v17, %v1518_v18 }
 0x1da   : > { %v853_v49 = vmax.f32 %v613_v42, 0.0 }
 0x1db   : > { %v915_v52 = vpack.c.bf16 %v855_v45, %v854_v38  ;;  %v4223_v45 = vcombine.low %v1522_v28, %v1526_v29 }
 0x1dc   : > { %v914_v53 = vpack.c.bf16 %v853_v49, %v852_v41  ;;  %v4317_v54 = vpop.f32.mrb[8].mxu0  ;;  %2205 = vmatpush1.bf16.msra.mxu1 %v4175_v44 }
 0x1dd   : > { %v634_v56 = vadd.f32 %v4317_v54, %v5082_v9  ;;  %v625_v57 = vpop.f32.mrb[9].mxu0  ;;  %2206 = vmatprep.subr.bf16.mxu1 %v4184_v48 }
 0x1de   : > { %4383 = vmatprep.mubr.msk.bf16.mxu1 %vm983_vm1, %v914_v53  ;;  %v626_v43 = vadd.f32 %v5082_v9, %v625_v57  ;;  %v4318_v46 = vpop.f32.mrb[10].mxu0 }
 0x1df   : > { %4384 = vmatmul.mubr.msk.bf16.gmra.mrb[4].mxu1 %vm983_vm1, %v915_v52  ;;  %v858_v60 = vmax.f32 %v634_v56, 0.0  ;;  %v637_v61 = vadd.f32 %v4318_v46, %v5082_v9  ;;  %v628_v62 = vpop.f32.mrb[11].mxu0 }
 0x1e0   : > { %v856_v63 = vmax.f32 %v626_v43, 0.0  ;;  %v629_v0 = vadd.f32 %v5082_v9, %v628_v62  ;;  %2207 = vmatpush1.bf16.msra.mxu1 %v4183_v55 }
 0x1e1   : > { %v859_v2 = vmax.f32 %v637_v61, 0.0  ;;  %2208 = vmatprep.subr.bf16.mxu1 %v4192_v58 }
 0x1e2   : > { %v857_v4 = vmax.f32 %v629_v0, 0.0 }
 0x1e3   : > { %v917_v7 = vpack.c.bf16 %v859_v2, %v858_v60 }
 0x1e4   : > { %v916_v8 = vpack.c.bf16 %v857_v4, %v856_v63  ;;  %v4321_v10 = vpop.f32.mrb[12].mxu0  ;;  %2209 = vmatpush1.bf16.msra.mxu1 %v4191_v1 }
 0x1e5   : > { %v650_v12 = vadd.f32 %v4321_v10, %v5082_v9  ;;  %v641_v13 = vpop.f32.mrb[13].mxu0  ;;  %2210 = vmatprep.subr.bf16.mxu1 %v4200_v3 }
 0x1e6   : > { %4387 = vmatprep.mubr.msk.bf16.mxu1 %vm983_vm1, %v916_v8  ;;  %v642_v15 = vadd.f32 %v5082_v9, %v641_v13  ;;  %v4322_v16 = vpop.f32.mrb[14].mxu0 }
 0x1e7   : > { %4388 = vmatmul.mubr.msk.bf16.gmra.mrb[8].mxu1 %vm983_vm1, %v917_v7  ;;  %v862_v19 = vmax.f32 %v650_v12, 0.0  ;;  %v653_v20 = vadd.f32 %v4322_v16, %v5082_v9  ;;  %v644_v21 = vpop.f32.mrb[15].mxu0 }
 0x1e8   : > { %v860_v22 = vmax.f32 %v642_v15, 0.0  ;;  %v645_v23 = vadd.f32 %v5082_v9, %v644_v21  ;;  %2211 = vmatpush1.bf16.msra.mxu1 %v4199_v11 }
 0x1e9   : > { %v863_v25 = vmax.f32 %v653_v20, 0.0  ;;  %2212 = vmatprep.subr.bf16.mxu1 %v4208_v14 }
 0x1ea   : > { %v861_v27 = vmax.f32 %v645_v23, 0.0 }
 0x1eb   : > { %v919_v30 = vpack.c.bf16 %v863_v25, %v862_v19 }
 0x1ec   : > { %v918_v31 = vpack.c.bf16 %v861_v27, %v860_v22  ;;  %v4325_v32 = vpop.f32.mrb[16].mxu0  ;;  %2213 = vmatpush1.bf16.msra.mxu1 %v4207_v24 }
 0x1ed   : > { %v666_v34 = vadd.f32 %v4325_v32, %v5082_v9  ;;  %v657_v35 = vpop.f32.mrb[17].mxu0  ;;  %2214 = vmatprep.subr.bf16.mxu1 %v4216_v26 }
 0x1ee   : > { %4391 = vmatprep.mubr.msk.bf16.mxu1 %vm983_vm1, %v918_v31  ;;  %v658_v37 = vadd.f32 %v5082_v9, %v657_v35  ;;  %v4326_v38 = vpop.f32.mrb[18].mxu0 }
 0x1ef   : > { %4392 = vmatmul.mubr.msk.bf16.gmra.mrb[12].mxu1 %vm983_vm1, %v919_v30  ;;  %v866_v39 = vmax.f32 %v666_v34, 0.0  ;;  %v669_v40 = vadd.f32 %v4326_v38, %v5082_v9  ;;  %v660_v41 = vpop.f32.mrb[19].mxu0 }
 0x1f0   : > { %v864_v42 = vmax.f32 %v658_v37, 0.0  ;;  %v661_v44 = vadd.f32 %v5082_v9, %v660_v41  ;;  %2215 = vmatpush1.bf16.msra.mxu1 %v4215_v33 }
 0x1f1   : > { %v867_v48 = vmax.f32 %v669_v40, 0.0  ;;  %2216 = vmatprep.subr.bf16.mxu1 %v4224_v36 }
 0x1f2   : > { %v865_v49 = vmax.f32 %v661_v44, 0.0 }
 0x1f3   : > { %v921_v50 = vpack.c.bf16 %v867_v48, %v866_v39 }
 0x1f4   : > { %v920_v51 = vpack.c.bf16 %v865_v49, %v864_v42  ;;  %v4329_v52 = vpop.f32.mrb[20].mxu0  ;;  %2217 = vmatpush1.bf16.msra.mxu1 %v4223_v45 }
 0x1f5   : > { %v682_v53 = vadd.f32 %v4329_v52, %v5082_v9  ;;  %v673_v54 = vpop.f32.mrb[21].mxu0 }
 0x1f6   : > { %4395 = vmatprep.mubr.msk.bf16.mxu1 %vm983_vm1, %v920_v51  ;;  %v674_v55 = vadd.f32 %v5082_v9, %v673_v54  ;;  %v4330_v56 = vpop.f32.mrb[22].mxu0 }
 0x1f7   : > { %4396 = vmatmul.mubr.msk.bf16.gmra.mrb[16].mxu1 %vm983_vm1, %v921_v50  ;;  %v870_v57 = vmax.f32 %v682_v53, 0.0  ;;  %v685_v58 = vadd.f32 %v4330_v56, %v5082_v9  ;;  %v676_v43 = vpop.f32.mrb[23].mxu0 }
 0x1f8   : > { %v868_v46 = vmax.f32 %v674_v55, 0.0  ;;  %v677_v47 = vadd.f32 %v5082_v9, %v676_v43 }
 0x1f9   : > { %v871_v59 = vmax.f32 %v685_v58, 0.0 }
 0x1fa   : > { %v869_v60 = vmax.f32 %v677_v47, 0.0 }
 0x1fb   : > { %v923_v61 = vpack.c.bf16 %v871_v59, %v870_v57 }
 0x1fc   : > { %v922_v62 = vpack.c.bf16 %v869_v60, %v868_v46  ;;  %v4333_v63 = vpop.f32.mrb[24].mxu0 }
 0x1fd   : > { %v698_v0 = vadd.f32 %v4333_v63, %v5082_v9  ;;  %v689_v1 = vpop.f32.mrb[25].mxu0 }
 0x1fe   : > { %4399 = vmatprep.mubr.msk.bf16.mxu1 %vm983_vm1, %v922_v62  ;;  %v690_v2 = vadd.f32 %v5082_v9, %v689_v1  ;;  %v4334_v3 = vpop.f32.mrb[26].mxu0 }
 0x1ff   : > { %4400 = vmatmul.mubr.msk.bf16.gmra.mrb[20].mxu1 %vm983_vm1, %v923_v61  ;;  %v874_v4 = vmax.f32 %v698_v0, 0.0  ;;  %v701_v5 = vadd.f32 %v4334_v3, %v5082_v9  ;;  %v692_v6 = vpop.f32.mrb[27].mxu0 }
 0x200   : > { %v872_v7 = vmax.f32 %v690_v2, 0.0  ;;  %v693_v8 = vadd.f32 %v5082_v9, %v692_v6 }
 0x201   : > { %v875_v10 = vmax.f32 %v701_v5, 0.0 }
 0x202   : > { %v873_v11 = vmax.f32 %v693_v8, 0.0 }
 0x203   : > { %v925_v12 = vpack.c.bf16 %v875_v10, %v874_v4 }
 0x204   : > { %v924_v13 = vpack.c.bf16 %v873_v11, %v872_v7  ;;  %v4337_v14 = vpop.f32.mrb[28].mxu0 }
 0x205   : > { %v714_v15 = vadd.f32 %v4337_v14, %v5082_v9  ;;  %v705_v16 = vpop.f32.mrb[29].mxu0 }
 0x206   : > { %4403 = vmatprep.mubr.msk.bf16.mxu1 %vm983_vm1, %v924_v13  ;;  %v706_v17 = vadd.f32 %v5082_v9, %v705_v16  ;;  %v4338_v18 = vpop.f32.mrb[30].mxu0 }
 0x207   : > { %4404 = vmatmul.mubr.msk.bf16.gmra.mrb[24].mxu1 %vm983_vm1, %v925_v12  ;;  %v878_v19 = vmax.f32 %v714_v15, 0.0  ;;  %v717_v20 = vadd.f32 %v4338_v18, %v5082_v9  ;;  %v708_v21 = vpop.f32.mrb[31].mxu0 }
 0x208   : > { %v876_v22 = vmax.f32 %v706_v17, 0.0  ;;  %v709_v23 = vadd.f32 %v5082_v9, %v708_v21 }
 0x209   : > { %v879_v24 = vmax.f32 %v717_v20, 0.0 }
 0x20a   : > { %v877_v25 = vmax.f32 %v709_v23, 0.0 }
 0x20b   : > { %v927_v26 = vpack.c.bf16 %v879_v24, %v878_v19 }
 0x20c   : > { %v926_v27 = vpack.c.bf16 %v877_v25, %v876_v22  ;;  %v4341_v28 = vpop.f32.mrb[32].mxu0 }
 0x20d   : > { %v730_v29 = vadd.f32 %v4341_v28, %v5082_v9  ;;  %v721_v30 = vpop.f32.mrb[33].mxu0 }
 0x20e   : > { %4407 = vmatprep.mubr.msk.bf16.mxu1 %vm983_vm1, %v926_v27  ;;  %v722_v31 = vadd.f32 %v5082_v9, %v721_v30  ;;  %v4342_v32 = vpop.f32.mrb[34].mxu0 }
 0x20f   : > { %4408 = vmatmul.mubr.msk.bf16.gmra.mrb[28].mxu1 %vm983_vm1, %v927_v26  ;;  %v882_v33 = vmax.f32 %v730_v29, 0.0  ;;  %v733_v34 = vadd.f32 %v4342_v32, %v5082_v9  ;;  %v724_v35 = vpop.f32.mrb[35].mxu0 }
 0x210   : > { %v880_v36 = vmax.f32 %v722_v31, 0.0  ;;  %v725_v37 = vadd.f32 %v5082_v9, %v724_v35 }
 0x211   : > { %v883_v38 = vmax.f32 %v733_v34, 0.0  ;;  %v4771_v34 = vmov 0  }
 0x212   : > { %v881_v39 = vmax.f32 %v725_v37, 0.0  ;;  %1881 = vmatprep.mubr.bf16.mxu0 %v4771_v34 }
 0x213   : > { %v929_v40 = vpack.c.bf16 %v883_v38, %v882_v33 }
 0x214   : > { %v928_v41 = vpack.c.bf16 %v881_v39, %v880_v36  ;;  %v4345_v42 = vpop.f32.mrb[36].mxu0  ;;  %v5165_v39 = vld [vmem:[#allocation9 + $0x10] sm:$0xff] }
 0x215   : > { %v746_v44 = vadd.f32 %v4345_v42, %v5082_v9  ;;  %v737_v45 = vpop.f32.mrb[37].mxu0 }
 0x216   : > { %4411 = vmatprep.mubr.msk.bf16.mxu1 %vm983_vm1, %v928_v41  ;;  %v738_v48 = vadd.f32 %v5082_v9, %v737_v45  ;;  %v4346_v49 = vpop.f32.mrb[38].mxu0  ;;  %v5169_v41 = vld [vmem:[#allocation9 + $0x18] sm:$0xff] }
 0x217   : > { %4412 = vmatmul.mubr.msk.bf16.gmra.mrb[32].mxu1 %vm983_vm1, %v929_v40  ;;  %v886_v50 = vmax.f32 %v746_v44, 0.0  ;;  %v749_v51 = vadd.f32 %v4346_v49, %v5082_v9  ;;  %v740_v52 = vpop.f32.mrb[39].mxu0  ;;  %v5167_v40 = vld [vmem:[#allocation9 + $0x30] sm:$0xff]  ;;  %v5177_v49 = vld [vmem:[#allocation9 + $0x38] sm:$0xff] }
 0x218   : > { %v884_v53 = vmax.f32 %v738_v48, 0.0  ;;  %v741_v54 = vadd.f32 %v5082_v9, %v740_v52  ;;  %v4169_v45 = vcombine.low %v5165_v39, %v5167_v40  ;;  %v4170_v48 = vcombine.high %v5165_v39, %v5167_v40  ;;  %v1491_v40 = vld [vmem:[#allocation9 + $0xd0] sm:$0xff] }
 0x219   : > { %v887_v55 = vmax.f32 %v749_v51, 0.0 }
 0x21a   : > { %v885_v56 = vmax.f32 %v741_v54, 0.0  ;;  %v4172_v54 = vcombine.high %v5169_v41, %v5177_v49  ;;  %2555 = vmatprep.subr.bf16.mxu0 %v4170_v48 }
 0x21b   : > { %v931_v57 = vpack.c.bf16 %v887_v55, %v886_v50 }
 0x21c   : > { %v930_v58 = vpack.c.bf16 %v885_v56, %v884_v53  ;;  %v4349_v43 = vpop.f32.mrb[40].mxu0  ;;  %v4171_v53 = vcombine.low %v5169_v41, %v5177_v49  ;;  %2908 = vmatprep.subr.bf16.mxu1 %v4172_v54  ;;  %v1492_v49 = vld [vmem:[#allocation9 + $0xd8] sm:$0xff] }
 0x21d   : > { %v762_v46 = vadd.f32 %v4349_v43, %v5082_v9  ;;  %v753_v47 = vpop.f32.mrb[41].mxu0 }
 0x21e   : > { %4415 = vmatprep.mubr.msk.bf16.mxu1 %vm983_vm1, %v930_v58  ;;  %v754_v59 = vadd.f32 %v5082_v9, %v753_v47  ;;  %v4350_v60 = vpop.f32.mrb[42].mxu0 }
 0x21f   : > { %4416 = vmatmul.mubr.msk.bf16.gmra.mrb[36].mxu1 %vm983_vm1, %v931_v57  ;;  %v890_v61 = vmax.f32 %v762_v46, 0.0  ;;  %v765_v62 = vadd.f32 %v4350_v60, %v5082_v9  ;;  %v756_v63 = vpop.f32.mrb[43].mxu0 }
 0x220   : > { %v888_v0 = vmax.f32 %v754_v59, 0.0  ;;  %v757_v1 = vadd.f32 %v5082_v9, %v756_v63 }
 0x221   : > { %v891_v2 = vmax.f32 %v765_v62, 0.0 }
 0x222   : > { %v889_v3 = vmax.f32 %v757_v1, 0.0 }
 0x223   : > { %v933_v4 = vpack.c.bf16 %v891_v2, %v890_v61 }
 0x224   : > { %v932_v5 = vpack.c.bf16 %v889_v3, %v888_v0  ;;  %v4353_v6 = vpop.f32.mrb[44].mxu0 }
 0x225   : > { %v778_v7 = vadd.f32 %v4353_v6, %v5082_v9  ;;  %v769_v8 = vpop.f32.mrb[45].mxu0 }
 0x226   : > { %4419 = vmatprep.mubr.msk.bf16.mxu1 %vm983_vm1, %v932_v5  ;;  %v770_v10 = vadd.f32 %v5082_v9, %v769_v8  ;;  %v4354_v11 = vpop.f32.mrb[46].mxu0 }
 0x227   : > { %4420 = vmatmul.mubr.msk.bf16.gmra.mrb[40].mxu1 %vm983_vm1, %v933_v4  ;;  %v894_v12 = vmax.f32 %v778_v7, 0.0  ;;  %v781_v13 = vadd.f32 %v4354_v11, %v5082_v9  ;;  %v772_v14 = vpop.f32.mrb[47].mxu0 }
 0x228   : > { %v892_v15 = vmax.f32 %v770_v10, 0.0  ;;  %v773_v16 = vadd.f32 %v5082_v9, %v772_v14 }
 0x229   : > { %v895_v17 = vmax.f32 %v781_v13, 0.0 }
 0x22a   : > { %v893_v18 = vmax.f32 %v773_v16, 0.0 }
 0x22b   : > { %v935_v19 = vpack.c.bf16 %v895_v17, %v894_v12 }
 0x22c   : > { %v934_v20 = vpack.c.bf16 %v893_v18, %v892_v15  ;;  %v4357_v21 = vpop.f32.mrb[48].mxu0 }
 0x22d   : > { %v794_v22 = vadd.f32 %v4357_v21, %v5082_v9  ;;  %v785_v23 = vpop.f32.mrb[49].mxu0 }
 0x22e   : > { %4423 = vmatprep.mubr.msk.bf16.mxu1 %vm983_vm1, %v934_v20  ;;  %v786_v24 = vadd.f32 %v5082_v9, %v785_v23  ;;  %v4358_v25 = vpop.f32.mrb[50].mxu0  ;;  %v5204_v23 = vld [vmem:[%s5672_s4] ss:$0 sm:$0xff] }
 0x22f   : > { %4424 = vmatmul.mubr.msk.bf16.gmra.mrb[44].mxu1 %vm983_vm1, %v935_v19  ;;  %v898_v26 = vmax.f32 %v794_v22, 0.0  ;;  %v797_v27 = vadd.f32 %v4358_v25, %v5082_v9  ;;  %v788_v28 = vpop.f32.mrb[51].mxu0 }
 0x230   : > { %v896_v29 = vmax.f32 %v786_v24, 0.0  ;;  %v789_v30 = vadd.f32 %v5082_v9, %v788_v28 }
 0x231   : > { %v899_v31 = vmax.f32 %v797_v27, 0.0 }
 0x232   : > { %v897_v32 = vmax.f32 %v789_v30, 0.0 }
 0x233   : > { %v937_v33 = vpack.c.bf16 %v899_v31, %v898_v26 }
 0x234   : > { %v936_v35 = vpack.c.bf16 %v897_v32, %v896_v29  ;;  %v4361_v36 = vpop.f32.mrb[52].mxu0 }
 0x235   : > { %v810_v37 = vadd.f32 %v4361_v36, %v5082_v9  ;;  %v801_v38 = vpop.f32.mrb[53].mxu0 }
 0x236   : > { %v802_v42 = vadd.f32 %v5082_v9, %v801_v38  ;;  %v4362_v44 = vpop.f32.mrb[54].mxu0  ;;  %4427 = vmatprep.mubr.msk.bf16.mxu1 %vm983_vm1, %v936_v35  ;;  %v1476_v38 = vld [vmem:[#allocation9 + $0x58] sm:$0xff] }
 0x237   : > { %v902_v50 = vmax.f32 %v810_v37, 0.0  ;;  %v813_v51 = vadd.f32 %v4362_v44, %v5082_v9  ;;  %v804_v52 = vpop.f32.mrb[55].mxu0  ;;  %4428 = vmatmul.mubr.msk.bf16.gmra.mrb[48].mxu1 %vm983_vm1, %v937_v33  ;;  %v1475_v33 = vld [vmem:[#allocation9 + $0x50] sm:$0xff] }
 0x238   : > { %v900_v55 = vmax.f32 %v802_v42, 0.0  ;;  %v805_v56 = vadd.f32 %v5082_v9, %v804_v52  ;;  %v1479_v37 = vld [vmem:[#allocation9 + $0x70] sm:$0xff]  ;;  %v1480_v42 = vld [vmem:[#allocation9 + $0x78] sm:$0xff] }
 0x239   : > { %v903_v57 = vmax.f32 %v813_v51, 0.0  ;;  %v1483_v51 = vld [vmem:[#allocation9 + $0x90] sm:$0xff] }
 0x23a   : > { %v901_v58 = vmax.f32 %v805_v56, 0.0  ;;  %v4180_v56 = vcombine.high %v1476_v38, %v1480_v42 }
 0x23b   : > { %v939_v43 = vpack.c.bf16 %v903_v57, %v902_v50  ;;  %v1487_v57 = vld [vmem:[#allocation9 + $0xb0] sm:$0xff] }
 0x23c   : > { %v938_v46 = vpack.c.bf16 %v901_v58, %v900_v55  ;;  %v4365_v47 = vpop.f32.mrb[56].mxu0  ;;  %v4178_v55 = vcombine.high %v1475_v33, %v1479_v37  ;;  %v1484_v58 = vld [vmem:[#allocation9 + $0x98] sm:$0xff] }
 0x23d   : > { %v826_v59 = vadd.f32 %v4365_v47, %v5082_v9  ;;  %v817_v60 = vpop.f32.mrb[57].mxu0 }
 0x23e   : > { %v818_v61 = vadd.f32 %v5082_v9, %v817_v60  ;;  %v4366_v62 = vpop.f32.mrb[58].mxu0  ;;  %4431 = vmatprep.mubr.msk.bf16.mxu1 %vm983_vm1, %v938_v46 }
 0x23f   : > { %v906_v63 = vmax.f32 %v826_v59, 0.0  ;;  %v829_v0 = vadd.f32 %v4366_v62, %v5082_v9  ;;  %v820_v1 = vpop.f32.mrb[59].mxu0  ;;  %4432 = vmatmul.mubr.msk.bf16.gmra.mrb[52].mxu1 %vm983_vm1, %v939_v43  ;;  %v1488_v43 = vld [vmem:[#allocation9 + $0xb8] sm:$0xff]  ;;  %v4177_v62 = vcombine.low %v1475_v33, %v1479_v37 }
 0x240   : > { %v904_v2 = vmax.f32 %v818_v61, 0.0  ;;  %v821_v3 = vadd.f32 %v5082_v9, %v820_v1 }
 0x241   : > { %v907_v4 = vmax.f32 %v829_v0, 0.0 }
 0x242   : > { %v905_v5 = vmax.f32 %v821_v3, 0.0  ;;  %v4188_v3 = vcombine.high %v1484_v58, %v1488_v43 }
 0x243   : > { %v941_v6 = vpack.c.bf16 %v907_v4, %v906_v63  ;;  %v4179_v63 = vcombine.low %v1476_v38, %v1480_v42 }
 0x244   : > { %v940_v7 = vpack.c.bf16 %v905_v5, %v904_v2  ;;  %v4369_v8 = vpop.f32.mrb[60].mxu0  ;;  %v4186_v2 = vcombine.high %v1483_v51, %v1487_v57 }
 0x245   : > { %v842_v10 = vadd.f32 %v4369_v8, %v5082_v9  ;;  %v833_v11 = vpop.f32.mrb[61].mxu0  ;;  %v4187_v8 = vcombine.low %v1484_v58, %v1488_v43 }
 0x246   : > { %v834_v12 = vadd.f32 %v5082_v9, %v833_v11  ;;  %v4370_v13 = vpop.f32.mrb[62].mxu0  ;;  %4435 = vmatprep.mubr.msk.bf16.mxu1 %vm983_vm1, %v940_v7  ;;  %v4185_v7 = vcombine.low %v1483_v51, %v1487_v57 }
 0x247   : > { %v910_v14 = vmax.f32 %v842_v10, 0.0  ;;  %v845_v15 = vadd.f32 %v4370_v13, %v5082_v9  ;;  %v836_v16 = vpop.f32.mrb[63].mxu0  ;;  %4436 = vmatmul.mubr.msk.bf16.gmra.mrb[56].mxu1 %vm983_vm1, %v941_v6 }
 0x248   : > { %v908_v17 = vmax.f32 %v834_v12, 0.0  ;;  %v837_v18 = vadd.f32 %v5082_v9, %v836_v16 }
 0x249   : > { %v911_v19 = vmax.f32 %v845_v15, 0.0 }
 0x24a   : > { %v909_v20 = vmax.f32 %v837_v18, 0.0  ;;  %v1500_v18 = vld [vmem:[#allocation9 + $0x118] sm:$0xff] }
 0x24b   : > { %v943_v21 = vpack.c.bf16 %v911_v19, %v910_v14  ;;  %v1499_v14 = vld [vmem:[#allocation9 + $0x110] sm:$0xff]  ;;  %v1504_v19 = vld [vmem:[#allocation9 + $0x138] sm:$0xff] }
 0x24c   : > { %v942_v22 = vpack.c.bf16 %v909_v20, %v908_v17  ;;  %v1503_v17 = vld [vmem:[#allocation9 + $0x130] sm:$0xff] }
 0x24e   : > { %4439 = vmatprep.mubr.msk.bf16.mxu1 %vm983_vm1, %v942_v22 }
 0x24f   : > { %4440 = vmatmul.mubr.msk.bf16.gmra.mrb[60].mxu1 %vm983_vm1, %v943_v21 }
 0x250   : > { %2234 = vmatprep.mubr.bf16.mxu1 %v4771_v34 }
 0x2aa   : > { %v4381_v24 = vpop.f32.mrb[0].mxu1 }
 0x2ab   : > { %v1123_v25 = vadd.f32 %v4381_v24, %v5204_v23  ;;  %v1114_v26 = vpop.f32.mrb[1].mxu1 }
 0x2ac   : > { %v1115_v9 = vadd.f32 %v5204_v23, %v1114_v26  ;;  %v4382_v27 = vpop.f32.mrb[2].mxu1 }
 0x2ad   : > { %v1126_v28 = vadd.f32 %v4382_v27, %v5204_v23  ;;  %v1117_v29 = vpop.f32.mrb[3].mxu1  ;;  %v1371_v31 = vmax.f32 %v1123_v25, 0.0 }
 0x2ae   : > { %v1118_v30 = vadd.f32 %v5204_v23, %v1117_v29  ;;  %v1369_v35 = vmax.f32 %v1115_v9, 0.0  ;;  %v4204_v29 = vcombine.high %v1500_v18, %v1504_v19 }
 0x2af   : > { %v1372_v32 = vmax.f32 %v1126_v28, 0.0  ;;  %v4202_v28 = vcombine.high %v1499_v14, %v1503_v17 }
 0x2b0   : > { %v1370_v36 = vmax.f32 %v1118_v30, 0.0 }
 0x2b1   : > { %v5210_v44 = vpack.c.bf16 %v1372_v32, %v1371_v31 }
 0x2b2   : > { %v5212_v48 = vpack.c.bf16 %v1370_v36, %v1369_v35  ;;  %v4385_v50 = vpop.f32.mrb[4].mxu1  ;;  %v4201_v35 = vcombine.low %v1499_v14, %v1503_v17  ;;  %v4203_v36 = vcombine.low %v1500_v18, %v1504_v19 }
 0x2b3   : > { %v1139_v52 = vadd.f32 %v4385_v50, %v5204_v23  ;;  %v1130_v54 = vpop.f32.mrb[5].mxu1 }
 0x2b4   : > { %v1131_v46 = vadd.f32 %v5204_v23, %v1130_v54  ;;  %1882 = vmatmul.mubr.bf16.vlgmr.msra.gmra.mrb[64].mxu0 %v5212_v48  ;;  %2235 = vmatmul.mubr.bf16.vlgmr.msra.gmra.mrb[64].mxu1 %v5212_v48  ;;  %v4386_v47 = vpop.f32.mrb[6].mxu1 }
 0x2b5   : > { %v1375_v59 = vmax.f32 %v1139_v52, 0.0  ;;  %2556 = vmatpush1.bf16.msra.mxu0 %v4169_v45  ;;  %2909 = vmatpush1.bf16.msra.mxu1 %v4171_v53  ;;  %v1142_v60 = vadd.f32 %v4386_v47, %v5204_v23  ;;  %v1133_v61 = vpop.f32.mrb[7].mxu1  ;;  %v1495_v45 = vld [vmem:[#allocation9 + $0xf0] sm:$0xff]  ;;  %v1496_v53 = vld [vmem:[#allocation9 + $0xf8] sm:$0xff] }
 0x2b6   : > { %v1373_v0 = vmax.f32 %v1131_v46, 0.0  ;;  %v1134_v1 = vadd.f32 %v5204_v23, %v1133_v61  ;;  %1891 = vmatprep.mubr.bf16.mxu0 %v4771_v34  ;;  %2244 = vmatprep.mubr.bf16.mxu1 %v4771_v34  ;;  %v4194_v12 = vcombine.high %v1491_v40, %v1495_v45  ;;  %v4196_v13 = vcombine.high %v1492_v49, %v1496_v53 }
 0x2b7   : > { %v1376_v39 = vmax.f32 %v1142_v60, 0.0  ;;  %2557 = vmatprep.subr.bf16.mxu0 %v4178_v55  ;;  %2910 = vmatprep.subr.bf16.mxu1 %v4180_v56  ;;  %v4193_v26 = vcombine.low %v1491_v40, %v1495_v45  ;;  %v4195_v9 = vcombine.low %v1492_v49, %v1496_v53  ;;  %v1512_v53 = vld [vmem:[#allocation9 + $0x178] sm:$0xff] }
 0x2b8   : > { %v1374_v41 = vmax.f32 %v1134_v1, 0.0 }
 0x2b9   : > { %v5228_v4 = vpack.c.bf16 %v1376_v39, %v1375_v59  ;;  %2558 = vmatpush1.bf16.msra.mxu0 %v4177_v62  ;;  %2911 = vmatpush1.bf16.msra.mxu1 %v4179_v63  ;;  %v1508_v39 = vld [vmem:[#allocation9 + $0x158] sm:$0xff] }
 0x2ba   : > { %v5230_v5 = vpack.c.bf16 %v1374_v41, %v1373_v0  ;;  %v4389_v6 = vpop.f32.mrb[8].mxu1  ;;  %2559 = vmatprep.subr.bf16.mxu0 %v4186_v2  ;;  %2912 = vmatprep.subr.bf16.mxu1 %v4188_v3  ;;  %v1507_v2 = vld [vmem:[#allocation9 + $0x150] sm:$0xff] }
 0x2bb   : > { %v1155_v10 = vadd.f32 %v4389_v6, %v5204_v23  ;;  %v1146_v11 = vpop.f32.mrb[9].mxu1  ;;  %v1511_v3 = vld [vmem:[#allocation9 + $0x170] sm:$0xff] }
 0x2bc   : > { %1892 = vmatmul.mubr.bf16.gmra.mrb[68].mxu0 %v5210_v44  ;;  %2245 = vmatmul.mubr.bf16.gmra.mrb[68].mxu1 %v5210_v44  ;;  %v1147_v15 = vadd.f32 %v5204_v23, %v1146_v11  ;;  %v4390_v16 = vpop.f32.mrb[10].mxu1  ;;  %v4209_v45 = vcombine.low %v1507_v2, %v1511_v3  ;;  %v4210_v49 = vcombine.high %v1507_v2, %v1511_v3 }
 0x2bd   : > { %v1379_v20 = vmax.f32 %v1155_v10, 0.0  ;;  %1901 = vmatprep.mubr.bf16.mxu0 %v4771_v34  ;;  %2254 = vmatprep.mubr.bf16.mxu1 %v4771_v34  ;;  %v1158_v21 = vadd.f32 %v4390_v16, %v5204_v23  ;;  %v1149_v22 = vpop.f32.mrb[11].mxu1 }
 0x2be   : > { %v1377_v24 = vmax.f32 %v1147_v15, 0.0  ;;  %v1150_v25 = vadd.f32 %v5204_v23, %v1149_v22  ;;  %2560 = vmatpush1.bf16.msra.mxu0 %v4185_v7  ;;  %2913 = vmatpush1.bf16.msra.mxu1 %v4187_v8  ;;  %v4211_v7 = vcombine.low %v1508_v39, %v1512_v53  ;;  %v4212_v8 = vcombine.high %v1508_v39, %v1512_v53 }
 0x2bf   : > { %v1380_v27 = vmax.f32 %v1158_v21, 0.0  ;;  %2561 = vmatprep.subr.bf16.mxu0 %v4194_v12  ;;  %2914 = vmatprep.subr.bf16.mxu1 %v4196_v13 }
 0x2c0   : > { %v1378_v30 = vmax.f32 %v1150_v25, 0.0 }
 0x2c1   : > { %v5240_v31 = vpack.c.bf16 %v1380_v27, %v1379_v20 }
 0x2c2   : > { %v5242_v32 = vpack.c.bf16 %v1378_v30, %v1377_v24  ;;  %v4393_v33 = vpop.f32.mrb[12].mxu1  ;;  %2562 = vmatpush1.bf16.msra.mxu0 %v4193_v26  ;;  %2915 = vmatpush1.bf16.msra.mxu1 %v4195_v9 }
 0x2c3   : > { %v1171_v37 = vadd.f32 %v4393_v33, %v5204_v23  ;;  %v1162_v38 = vpop.f32.mrb[13].mxu1  ;;  %2563 = vmatprep.subr.bf16.mxu0 %v4202_v28  ;;  %2916 = vmatprep.subr.bf16.mxu1 %v4204_v29 }
 0x2c4   : > { %1902 = vmatmul.mubr.bf16.gmra.mrb[72].mxu0 %v5230_v5  ;;  %2255 = vmatmul.mubr.bf16.gmra.mrb[72].mxu1 %v5230_v5  ;;  %v1163_v42 = vadd.f32 %v5204_v23, %v1162_v38  ;;  %v4394_v50 = vpop.f32.mrb[14].mxu1 }
 0x2c5   : > { %1911 = vmatprep.mubr.bf16.mxu0 %v4771_v34  ;;  %2264 = vmatprep.mubr.bf16.mxu1 %v4771_v34  ;;  %v1383_v51 = vmax.f32 %v1171_v37, 0.0  ;;  %v1174_v52 = vadd.f32 %v4394_v50, %v5204_v23  ;;  %v1165_v54 = vpop.f32.mrb[15].mxu1 }
 0x2c6   : > { %v1381_v55 = vmax.f32 %v1163_v42, 0.0  ;;  %v1166_v56 = vadd.f32 %v5204_v23, %v1165_v54  ;;  %2564 = vmatpush1.bf16.msra.mxu0 %v4201_v35  ;;  %2917 = vmatpush1.bf16.msra.mxu1 %v4203_v36 }
 0x2c7   : > { %v1384_v57 = vmax.f32 %v1174_v52, 0.0  ;;  %2565 = vmatprep.subr.bf16.mxu0 %v4210_v49  ;;  %2918 = vmatprep.subr.bf16.mxu1 %v4212_v8  ;;  %v1515_v8 = vld [vmem:[#allocation9 + $0x190] sm:$0xff] }
 0x2c8   : > { %v1382_v58 = vmax.f32 %v1166_v56, 0.0 }
 0x2c9   : > { %v5252_v43 = vpack.c.bf16 %v1384_v57, %v1383_v51 }
 0x2ca   : > { %v5254_v46 = vpack.c.bf16 %v1382_v58, %v1381_v55  ;;  %v4397_v47 = vpop.f32.mrb[16].mxu1  ;;  %2566 = vmatpush1.bf16.msra.mxu0 %v4209_v45  ;;  %2919 = vmatpush1.bf16.msra.mxu1 %v4211_v7 }
 0x2cb   : > { %v1187_v59 = vadd.f32 %v4397_v47, %v5204_v23  ;;  %v1178_v60 = vpop.f32.mrb[17].mxu1 }
 0x2cc   : > { %1912 = vmatmul.mubr.bf16.gmra.mrb[76].mxu0 %v5228_v4  ;;  %2265 = vmatmul.mubr.bf16.gmra.mrb[76].mxu1 %v5228_v4  ;;  %v1179_v61 = vadd.f32 %v5204_v23, %v1178_v60  ;;  %v4398_v62 = vpop.f32.mrb[18].mxu1 }
 0x2cd   : > { %1921 = vmatprep.mubr.bf16.mxu0 %v4771_v34  ;;  %2274 = vmatprep.mubr.bf16.mxu1 %v4771_v34  ;;  %v1387_v63 = vmax.f32 %v1187_v59, 0.0  ;;  %v1190_v0 = vadd.f32 %v4398_v62, %v5204_v23  ;;  %v1181_v1 = vpop.f32.mrb[19].mxu1 }
 0x2ce   : > { %v1385_v40 = vmax.f32 %v1179_v61, 0.0  ;;  %v1182_v41 = vadd.f32 %v5204_v23, %v1181_v1 }
 0x2cf   : > { %v1388_v6 = vmax.f32 %v1190_v0, 0.0 }
 0x2d0   : > { %v1386_v10 = vmax.f32 %v1182_v41, 0.0 }
 0x2d1   : > { %v5264_v11 = vpack.c.bf16 %v1388_v6, %v1387_v63 }
 0x2d2   : > { %v5266_v12 = vpack.c.bf16 %v1386_v10, %v1385_v40  ;;  %v4401_v13 = vpop.f32.mrb[20].mxu1  ;;  %v1519_v10 = vld [vmem:[#allocation9 + $0x1b0] sm:$0xff] }
 0x2d3   : > { %v1203_v14 = vadd.f32 %v4401_v13, %v5204_v23  ;;  %v1194_v15 = vpop.f32.mrb[21].mxu1  ;;  %v1516_v13 = vld [vmem:[#allocation9 + $0x198] sm:$0xff] }
 0x2d4   : > { %1922 = vmatmul.mubr.bf16.gmra.mrb[80].mxu0 %v5242_v32  ;;  %2275 = vmatmul.mubr.bf16.gmra.mrb[80].mxu1 %v5242_v32  ;;  %v1195_v16 = vadd.f32 %v5204_v23, %v1194_v15  ;;  %v4402_v17 = vpop.f32.mrb[22].mxu1 }
 0x2d5   : > { %1931 = vmatprep.mubr.bf16.mxu0 %v4771_v34  ;;  %2284 = vmatprep.mubr.bf16.mxu1 %v4771_v34  ;;  %v1391_v18 = vmax.f32 %v1203_v14, 0.0  ;;  %v1206_v19 = vadd.f32 %v4402_v17, %v5204_v23  ;;  %v1197_v20 = vpop.f32.mrb[23].mxu1  ;;  %v4218_v17 = vcombine.high %v1515_v8, %v1519_v10 }
 0x2d6   : > { %v1389_v21 = vmax.f32 %v1195_v16, 0.0  ;;  %v1198_v22 = vadd.f32 %v5204_v23, %v1197_v20  ;;  %v4217_v16 = vcombine.low %v1515_v8, %v1519_v10 }
 0x2d7   : > { %v1392_v24 = vmax.f32 %v1206_v19, 0.0  ;;  %2567 = vmatprep.subr.bf16.mxu0 %v4218_v17 }
 0x2d8   : > { %v1390_v25 = vmax.f32 %v1198_v22, 0.0  ;;  %2568 = vmatpush1.bf16.msra.mxu0 %v4217_v16 }
 0x2d9   : > { %v5276_v26 = vpack.c.bf16 %v1392_v24, %v1391_v18  ;;  %v1520_v18 = vld [vmem:[#allocation9 + $0x1b8] sm:$0xff] }
 0x2da   : > { %v5278_v9 = vpack.c.bf16 %v1390_v25, %v1389_v21  ;;  %v4405_v27 = vpop.f32.mrb[24].mxu1  ;;  %v4219_v20 = vcombine.low %v1516_v13, %v1520_v18  ;;  %v4220_v21 = vcombine.high %v1516_v13, %v1520_v18 }
 0x2db   : > { %v1219_v28 = vadd.f32 %v4405_v27, %v5204_v23  ;;  %v1210_v29 = vpop.f32.mrb[25].mxu1 }
 0x2dc   : > { %1932 = vmatmul.mubr.bf16.gmra.mrb[84].mxu0 %v5240_v31  ;;  %2285 = vmatmul.mubr.bf16.gmra.mrb[84].mxu1 %v5240_v31  ;;  %v1211_v30 = vadd.f32 %v5204_v23, %v1210_v29  ;;  %v4406_v33 = vpop.f32.mrb[26].mxu1 }
 0x2dd   : > { %1941 = vmatprep.mubr.bf16.mxu0 %v4771_v34  ;;  %2294 = vmatprep.mubr.bf16.mxu1 %v4771_v34  ;;  %v1395_v35 = vmax.f32 %v1219_v28, 0.0  ;;  %v1222_v36 = vadd.f32 %v4406_v33, %v5204_v23  ;;  %v1213_v37 = vpop.f32.mrb[27].mxu1 }
 0x2de   : > { %v1393_v38 = vmax.f32 %v1211_v30, 0.0  ;;  %v1214_v42 = vadd.f32 %v5204_v23, %v1213_v37  ;;  %2920 = vmatprep.subr.bf16.mxu1 %v4220_v21 }
 0x2df   : > { %v1396_v50 = vmax.f32 %v1222_v36, 0.0  ;;  %2921 = vmatpush1.bf16.msra.mxu1 %v4219_v20 }
 0x2e0   : > { %v1394_v51 = vmax.f32 %v1214_v42, 0.0 }
 0x2e1   : > { %v5288_v52 = vpack.c.bf16 %v1396_v50, %v1395_v35 }
 0x2e2   : > { %v5290_v54 = vpack.c.bf16 %v1394_v51, %v1393_v38  ;;  %v4409_v55 = vpop.f32.mrb[28].mxu1 }
 0x2e3   : > { %v1235_v56 = vadd.f32 %v4409_v55, %v5204_v23  ;;  %v1226_v57 = vpop.f32.mrb[29].mxu1 }
 0x2e4   : > { %1942 = vmatmul.mubr.bf16.gmra.mrb[88].mxu0 %v5254_v46  ;;  %2295 = vmatmul.mubr.bf16.gmra.mrb[88].mxu1 %v5254_v46  ;;  %v1227_v58 = vadd.f32 %v5204_v23, %v1226_v57  ;;  %v4410_v47 = vpop.f32.mrb[30].mxu1 }
 0x2e5   : > { %1951 = vmatprep.mubr.bf16.mxu0 %v4771_v34  ;;  %2304 = vmatprep.mubr.bf16.mxu1 %v4771_v34  ;;  %v1399_v59 = vmax.f32 %v1235_v56, 0.0  ;;  %v1238_v60 = vadd.f32 %v4410_v47, %v5204_v23  ;;  %v1229_v61 = vpop.f32.mrb[31].mxu1 }
 0x2e6   : > { %v1397_v62 = vmax.f32 %v1227_v58, 0.0  ;;  %v1230_v63 = vadd.f32 %v5204_v23, %v1229_v61 }
 0x2e7   : > { %v1400_v0 = vmax.f32 %v1238_v60, 0.0 }
 0x2e8   : > { %v1398_v1 = vmax.f32 %v1230_v63, 0.0 }
 0x2e9   : > { %v5300_v2 = vpack.c.bf16 %v1400_v0, %v1399_v59 }
 0x2ea   : > { %v5302_v3 = vpack.c.bf16 %v1398_v1, %v1397_v62  ;;  %v4413_v39 = vpop.f32.mrb[32].mxu1 }
 0x2eb   : > { %v1251_v40 = vadd.f32 %v4413_v39, %v5204_v23  ;;  %v1242_v41 = vpop.f32.mrb[33].mxu1 }
 0x2ec   : > { %1952 = vmatmul.mubr.bf16.gmra.mrb[92].mxu0 %v5252_v43  ;;  %2305 = vmatmul.mubr.bf16.gmra.mrb[92].mxu1 %v5252_v43  ;;  %v1243_v45 = vadd.f32 %v5204_v23, %v1242_v41  ;;  %v4414_v49 = vpop.f32.mrb[34].mxu1 }
 0x2ed   : > { %1961 = vmatprep.mubr.bf16.mxu0 %v4771_v34  ;;  %2314 = vmatprep.mubr.bf16.mxu1 %v4771_v34  ;;  %v1403_v53 = vmax.f32 %v1251_v40, 0.0  ;;  %v1254_v6 = vadd.f32 %v4414_v49, %v5204_v23  ;;  %v1245_v7 = vpop.f32.mrb[35].mxu1 }
 0x2ee   : > { %v1401_v14 = vmax.f32 %v1243_v45, 0.0  ;;  %v1246_v15 = vadd.f32 %v5204_v23, %v1245_v7 }
 0x2ef   : > { %v1404_v19 = vmax.f32 %v1254_v6, 0.0 }
 0x2f0   : > { %v1402_v22 = vmax.f32 %v1246_v15, 0.0 }
 0x2f1   : > { %v5312_v24 = vpack.c.bf16 %v1404_v19, %v1403_v53 }
 0x2f2   : > { %v5314_v25 = vpack.c.bf16 %v1402_v22, %v1401_v14  ;;  %v4417_v27 = vpop.f32.mrb[36].mxu1 }
 0x2f3   : > { %v1267_v28 = vadd.f32 %v4417_v27, %v5204_v23  ;;  %v1258_v29 = vpop.f32.mrb[37].mxu1 }
 0x2f4   : > { %1962 = vmatmul.mubr.bf16.gmra.mrb[96].mxu0 %v5266_v12  ;;  %2315 = vmatmul.mubr.bf16.gmra.mrb[96].mxu1 %v5266_v12  ;;  %v1259_v30 = vadd.f32 %v5204_v23, %v1258_v29  ;;  %v4418_v33 = vpop.f32.mrb[38].mxu1 }
 0x2f5   : > { %1971 = vmatprep.mubr.bf16.mxu0 %v4771_v34  ;;  %2324 = vmatprep.mubr.bf16.mxu1 %v4771_v34  ;;  %v1407_v35 = vmax.f32 %v1267_v28, 0.0  ;;  %v1270_v36 = vadd.f32 %v4418_v33, %v5204_v23  ;;  %v1261_v37 = vpop.f32.mrb[39].mxu1 }
 0x2f6   : > { %v1405_v38 = vmax.f32 %v1259_v30, 0.0  ;;  %v1262_v42 = vadd.f32 %v5204_v23, %v1261_v37 }
 0x2f7   : > { %v1408_v50 = vmax.f32 %v1270_v36, 0.0 }
 0x2f8   : > { %v1406_v51 = vmax.f32 %v1262_v42, 0.0 }
 0x2f9   : > { %v5324_v55 = vpack.c.bf16 %v1408_v50, %v1407_v35 }
 0x2fa   : > { %v5326_v56 = vpack.c.bf16 %v1406_v51, %v1405_v38  ;;  %v4421_v57 = vpop.f32.mrb[40].mxu1 }
 0x2fb   : > { %v1283_v58 = vadd.f32 %v4421_v57, %v5204_v23  ;;  %v1274_v47 = vpop.f32.mrb[41].mxu1 }
 0x2fc   : > { %1972 = vmatmul.mubr.bf16.gmra.mrb[100].mxu0 %v5264_v11  ;;  %2325 = vmatmul.mubr.bf16.gmra.mrb[100].mxu1 %v5264_v11  ;;  %v1275_v59 = vadd.f32 %v5204_v23, %v1274_v47  ;;  %v4422_v60 = vpop.f32.mrb[42].mxu1 }
 0x2fd   : > { %1981 = vmatprep.mubr.bf16.mxu0 %v4771_v34  ;;  %2334 = vmatprep.mubr.bf16.mxu1 %v4771_v34  ;;  %v1411_v61 = vmax.f32 %v1283_v58, 0.0  ;;  %v1286_v62 = vadd.f32 %v4422_v60, %v5204_v23  ;;  %v1277_v63 = vpop.f32.mrb[43].mxu1  ;;  %v1527_v60 = vld [vmem:[#allocation9 + $0x1f0] sm:$0xff] }
 0x2fe   : > { %v1409_v0 = vmax.f32 %v1275_v59, 0.0  ;;  %v1278_v1 = vadd.f32 %v5204_v23, %v1277_v63  ;;  %v1523_v59 = vld [vmem:[#allocation9 + $0x1d0] sm:$0xff] }
 0x2ff   : > { %v1412_v39 = vmax.f32 %v1286_v62, 0.0 }
 0x300   : > { %v1410_v40 = vmax.f32 %v1278_v1, 0.0  ;;  %v4226_v1 = vcombine.high %v1523_v59, %v1527_v60 }
 0x301   : > { %v5336_v41 = vpack.c.bf16 %v1412_v39, %v1411_v61  ;;  %v1524_v61 = vld [vmem:[#allocation9 + $0x1d8] sm:$0xff] }
 0x302   : > { %v5338_v45 = vpack.c.bf16 %v1410_v40, %v1409_v0  ;;  %v4425_v49 = vpop.f32.mrb[44].mxu1  ;;  %v4225_v0 = vcombine.low %v1523_v59, %v1527_v60  ;;  %v1528_v39 = vld [vmem:[#allocation9 + $0x1f8] sm:$0xff]  ;;  %2569 = vmatprep.subr.bf16.mxu0 %v4226_v1 }
 0x303   : > { %v1299_v53 = vadd.f32 %v4425_v49, %v5204_v23  ;;  %v1290_v6 = vpop.f32.mrb[45].mxu1 }
 0x304   : > { %1982 = vmatmul.mubr.bf16.gmra.mrb[104].mxu0 %v5278_v9  ;;  %2335 = vmatmul.mubr.bf16.gmra.mrb[104].mxu1 %v5278_v9  ;;  %v1291_v7 = vadd.f32 %v5204_v23, %v1290_v6  ;;  %v4426_v8 = vpop.f32.mrb[46].mxu1  ;;  %v4227_v6 = vcombine.low %v1524_v61, %v1528_v39 }
 0x305   : > { %1991 = vmatprep.mubr.bf16.mxu0 %v4771_v34  ;;  %2344 = vmatprep.mubr.bf16.mxu1 %v4771_v34  ;;  %v1415_v10 = vmax.f32 %v1299_v53, 0.0  ;;  %v1302_v13 = vadd.f32 %v4426_v8, %v5204_v23  ;;  %v1293_v14 = vpop.f32.mrb[47].mxu1 }
 0x306   : > { %v1413_v15 = vmax.f32 %v1291_v7, 0.0  ;;  %v1294_v16 = vadd.f32 %v5204_v23, %v1293_v14  ;;  %v4228_v7 = vcombine.high %v1524_v61, %v1528_v39  ;;  %2570 = vmatpush1.bf16.msra.mxu0 %v4225_v0 }
 0x307   : > { %v1416_v17 = vmax.f32 %v1302_v13, 0.0 }
 0x308   : > { %v1414_v18 = vmax.f32 %v1294_v16, 0.0  ;;  %2922 = vmatprep.subr.bf16.mxu1 %v4228_v7 }
 0x309   : > { %v5348_v19 = vpack.c.bf16 %v1416_v17, %v1415_v10  ;;  %2923 = vmatpush1.bf16.msra.mxu1 %v4227_v6 }
 0x30a   : > { %v5350_v20 = vpack.c.bf16 %v1414_v18, %v1413_v15  ;;  %v4429_v21 = vpop.f32.mrb[48].mxu1 }
 0x30b   : > { %v1315_v22 = vadd.f32 %v4429_v21, %v5204_v23  ;;  %v1306_v27 = vpop.f32.mrb[49].mxu1 }
 0x30c   : > { %1992 = vmatmul.mubr.bf16.gmra.mrb[108].mxu0 %v5276_v26  ;;  %2345 = vmatmul.mubr.bf16.gmra.mrb[108].mxu1 %v5276_v26  ;;  %v1307_v28 = vadd.f32 %v5204_v23, %v1306_v27  ;;  %v4430_v29 = vpop.f32.mrb[50].mxu1 }
 0x30d   : > { %2001 = vmatprep.mubr.bf16.mxu0 %v4771_v34  ;;  %2354 = vmatprep.mubr.bf16.mxu1 %v4771_v34  ;;  %v1419_v30 = vmax.f32 %v1315_v22, 0.0  ;;  %v1318_v33 = vadd.f32 %v4430_v29, %v5204_v23  ;;  %v1309_v35 = vpop.f32.mrb[51].mxu1 }
 0x30e   : > { %v1417_v36 = vmax.f32 %v1307_v28, 0.0  ;;  %v1310_v37 = vadd.f32 %v5204_v23, %v1309_v35 }
 0x30f   : > { %v1420_v38 = vmax.f32 %v1318_v33, 0.0 }
 0x310   : > { %v1418_v42 = vmax.f32 %v1310_v37, 0.0 }
 0x311   : > { %v5360_v50 = vpack.c.bf16 %v1420_v38, %v1419_v30 }
 0x312   : > { %v5362_v51 = vpack.c.bf16 %v1418_v42, %v1417_v36  ;;  %v4433_v57 = vpop.f32.mrb[52].mxu1 }
 0x313   : > { %v1331_v58 = vadd.f32 %v4433_v57, %v5204_v23  ;;  %v1322_v47 = vpop.f32.mrb[53].mxu1 }
 0x314   : > { %2002 = vmatmul.mubr.bf16.gmra.mrb[112].mxu0 %v5290_v54  ;;  %2355 = vmatmul.mubr.bf16.gmra.mrb[112].mxu1 %v5290_v54  ;;  %v1323_v62 = vadd.f32 %v5204_v23, %v1322_v47  ;;  %v4434_v63 = vpop.f32.mrb[54].mxu1 }
 0x315   : > { %2011 = vmatprep.mubr.bf16.mxu0 %v4771_v34  ;;  %2364 = vmatprep.mubr.bf16.mxu1 %v4771_v34  ;;  %v1423_v40 = vmax.f32 %v1331_v58, 0.0  ;;  %v1334_v49 = vadd.f32 %v4434_v63, %v5204_v23  ;;  %v1325_v53 = vpop.f32.mrb[55].mxu1 }
 0x316   : > { %v1421_v8 = vmax.f32 %v1323_v62, 0.0  ;;  %v1326_v10 = vadd.f32 %v5204_v23, %v1325_v53 }
 0x317   : > { %v1424_v13 = vmax.f32 %v1334_v49, 0.0 }
 0x318   : > { %v1422_v14 = vmax.f32 %v1326_v10, 0.0 }
 0x319   : > { %v5372_v15 = vpack.c.bf16 %v1424_v13, %v1423_v40 }
 0x31a   : > { %v5374_v16 = vpack.c.bf16 %v1422_v14, %v1421_v8  ;;  %v4437_v17 = vpop.f32.mrb[56].mxu1 }
 0x31b   : > { %v1347_v18 = vadd.f32 %v4437_v17, %v5204_v23  ;;  %v1338_v21 = vpop.f32.mrb[57].mxu1 }
 0x31c   : > { %2012 = vmatmul.mubr.bf16.gmra.mrb[116].mxu0 %v5288_v52  ;;  %2365 = vmatmul.mubr.bf16.gmra.mrb[116].mxu1 %v5288_v52  ;;  %v1339_v22 = vadd.f32 %v5204_v23, %v1338_v21  ;;  %v4438_v27 = vpop.f32.mrb[58].mxu1 }
 0x31d   : > { %2021 = vmatprep.mubr.bf16.mxu0 %v4771_v34  ;;  %2374 = vmatprep.mubr.bf16.mxu1 %v4771_v34  ;;  %v1427_v28 = vmax.f32 %v1347_v18, 0.0  ;;  %v1350_v29 = vadd.f32 %v4438_v27, %v5204_v23  ;;  %v1341_v30 = vpop.f32.mrb[59].mxu1 }
 0x31e   : > { %v1425_v33 = vmax.f32 %v1339_v22, 0.0  ;;  %v1342_v35 = vadd.f32 %v5204_v23, %v1341_v30 }
 0x31f   : > { %v1428_v36 = vmax.f32 %v1350_v29, 0.0 }
 0x320   : > { %v1426_v37 = vmax.f32 %v1342_v35, 0.0 }
 0x321   : > { %v5384_v38 = vpack.c.bf16 %v1428_v36, %v1427_v28 }
 0x322   : > { %v5386_v42 = vpack.c.bf16 %v1426_v37, %v1425_v33  ;;  %v4441_v57 = vpop.f32.mrb[60].mxu1 }
 0x323   : > { %v1363_v58 = vadd.f32 %v4441_v57, %v5204_v23  ;;  %v1354_v47 = vpop.f32.mrb[61].mxu1 }
 0x324   : > { %2022 = vmatmul.mubr.bf16.gmra.mrb[120].mxu0 %v5302_v3  ;;  %2375 = vmatmul.mubr.bf16.gmra.mrb[120].mxu1 %v5302_v3  ;;  %v1355_v59 = vadd.f32 %v5204_v23, %v1354_v47  ;;  %v4442_v60 = vpop.f32.mrb[62].mxu1 }
 0x325   : > { %2031 = vmatprep.mubr.bf16.mxu0 %v4771_v34  ;;  %2384 = vmatprep.mubr.bf16.mxu1 %v4771_v34  ;;  %v1431_v61 = vmax.f32 %v1363_v58, 0.0  ;;  %v1366_v62 = vadd.f32 %v4442_v60, %v5204_v23  ;;  %v1357_v63 = vpop.f32.mrb[63].mxu1 }
 0x326   : > { %v1429_v0 = vmax.f32 %v1355_v59, 0.0  ;;  %v1358_v1 = vadd.f32 %v5204_v23, %v1357_v63 }
 0x327   : > { %v1432_v39 = vmax.f32 %v1366_v62, 0.0 }
 0x328   : > { %v1430_v40 = vmax.f32 %v1358_v1, 0.0 }
 0x329   : > { %v5396_v49 = vpack.c.bf16 %v1432_v39, %v1431_v61 }
 0x32a   : > { %v5398_v53 = vpack.c.bf16 %v1430_v40, %v1429_v0 }
 0x32c   : > { %2032 = vmatmul.mubr.bf16.gmra.mrb[124].mxu0 %v5300_v2  ;;  %2385 = vmatmul.mubr.bf16.gmra.mrb[124].mxu1 %v5300_v2 }
 0x32d   : > { %2041 = vmatprep.mubr.bf16.mxu0 %v4771_v34  ;;  %2394 = vmatprep.mubr.bf16.mxu1 %v4771_v34 }
 0x334   : > { %2042 = vmatmul.mubr.bf16.gmra.mrb[128].mxu0 %v5314_v25  ;;  %2395 = vmatmul.mubr.bf16.gmra.mrb[128].mxu1 %v5314_v25 }
 0x335   : > { %2051 = vmatprep.mubr.bf16.mxu0 %v4771_v34  ;;  %2404 = vmatprep.mubr.bf16.mxu1 %v4771_v34 }
 0x33c   : > { %2052 = vmatmul.mubr.bf16.gmra.mrb[132].mxu0 %v5312_v24  ;;  %2405 = vmatmul.mubr.bf16.gmra.mrb[132].mxu1 %v5312_v24 }
 0x33d   : > { %2061 = vmatprep.mubr.bf16.mxu0 %v4771_v34  ;;  %2414 = vmatprep.mubr.bf16.mxu1 %v4771_v34 }
 0x344   : > { %2062 = vmatmul.mubr.bf16.gmra.mrb[136].mxu0 %v5326_v56  ;;  %2415 = vmatmul.mubr.bf16.gmra.mrb[136].mxu1 %v5326_v56 }
 0x345   : > { %2071 = vmatprep.mubr.bf16.mxu0 %v4771_v34  ;;  %2424 = vmatprep.mubr.bf16.mxu1 %v4771_v34 }
 0x34c   : > { %2072 = vmatmul.mubr.bf16.gmra.mrb[140].mxu0 %v5324_v55  ;;  %2425 = vmatmul.mubr.bf16.gmra.mrb[140].mxu1 %v5324_v55 }
 0x34d   : > { %2081 = vmatprep.mubr.bf16.mxu0 %v4771_v34  ;;  %2434 = vmatprep.mubr.bf16.mxu1 %v4771_v34 }
 0x354   : > { %2082 = vmatmul.mubr.bf16.gmra.mrb[144].mxu0 %v5338_v45  ;;  %2435 = vmatmul.mubr.bf16.gmra.mrb[144].mxu1 %v5338_v45 }
 0x355   : > { %2091 = vmatprep.mubr.bf16.mxu0 %v4771_v34  ;;  %2444 = vmatprep.mubr.bf16.mxu1 %v4771_v34 }
 0x35c   : > { %2092 = vmatmul.mubr.bf16.gmra.mrb[148].mxu0 %v5336_v41  ;;  %2445 = vmatmul.mubr.bf16.gmra.mrb[148].mxu1 %v5336_v41 }
 0x35d   : > { %2101 = vmatprep.mubr.bf16.mxu0 %v4771_v34  ;;  %2454 = vmatprep.mubr.bf16.mxu1 %v4771_v34 }
 0x364   : > { %2102 = vmatmul.mubr.bf16.gmra.mrb[152].mxu0 %v5350_v20  ;;  %2455 = vmatmul.mubr.bf16.gmra.mrb[152].mxu1 %v5350_v20 }
 0x365   : > { %2111 = vmatprep.mubr.bf16.mxu0 %v4771_v34  ;;  %2464 = vmatprep.mubr.bf16.mxu1 %v4771_v34 }
 0x36c   : > { %2112 = vmatmul.mubr.bf16.gmra.mrb[156].mxu0 %v5348_v19  ;;  %2465 = vmatmul.mubr.bf16.gmra.mrb[156].mxu1 %v5348_v19 }
 0x36d   : > { %2121 = vmatprep.mubr.bf16.mxu0 %v4771_v34  ;;  %2474 = vmatprep.mubr.bf16.mxu1 %v4771_v34 }
 0x374   : > { %2122 = vmatmul.mubr.bf16.gmra.mrb[160].mxu0 %v5362_v51  ;;  %2475 = vmatmul.mubr.bf16.gmra.mrb[160].mxu1 %v5362_v51 }
 0x375   : > { %2131 = vmatprep.mubr.bf16.mxu0 %v4771_v34  ;;  %2484 = vmatprep.mubr.bf16.mxu1 %v4771_v34 }
 0x37c   : > { %2132 = vmatmul.mubr.bf16.gmra.mrb[164].mxu0 %v5360_v50  ;;  %2485 = vmatmul.mubr.bf16.gmra.mrb[164].mxu1 %v5360_v50 }
 0x37d   : > { %2141 = vmatprep.mubr.bf16.mxu0 %v4771_v34  ;;  %2494 = vmatprep.mubr.bf16.mxu1 %v4771_v34 }
 0x384   : > { %2142 = vmatmul.mubr.bf16.gmra.mrb[168].mxu0 %v5374_v16  ;;  %2495 = vmatmul.mubr.bf16.gmra.mrb[168].mxu1 %v5374_v16 }
 0x385   : > { %2151 = vmatprep.mubr.bf16.mxu0 %v4771_v34  ;;  %2504 = vmatprep.mubr.bf16.mxu1 %v4771_v34 }
 0x387   : > { %v1883_v23 = vpop.f32.mrb[64].mxu0  ;;  %v2236_v6 = vpop.f32.mrb[64].mxu1 }
 0x388   : > { %v1885_v7 = vpop.f32.mrb[65].mxu0  ;;  %v2238_v8 = vpop.f32.mrb[65].mxu1 }
 0x389   : > { %v1887_v10 = vpop.f32.mrb[66].mxu0  ;;  %v2240_v13 = vpop.f32.mrb[66].mxu1 }
 0x38a   : > { %v3261_v14 = vmax.f32 %v1883_v23, %v1887_v10  ;;  %v3399_v17 = vmax.f32 %v2236_v6, %v2240_v13  ;;  %v1889_v18 = vpop.f32.mrb[67].mxu0  ;;  %v2242_v21 = vpop.f32.mrb[67].mxu1 }
 0x38b   : > { %v3330_v22 = vmax.f32 %v1885_v7, %v1889_v18  ;;  %v3468_v27 = vmax.f32 %v2238_v8, %v2242_v21 }
 0x38c   : > { %2152 = vmatmul.mubr.bf16.gmra.mrb[172].mxu0 %v5372_v15  ;;  %2505 = vmatmul.mubr.bf16.gmra.mrb[172].mxu1 %v5372_v15 }
 0x38d   : > { %2161 = vmatprep.mubr.bf16.mxu0 %v4771_v34  ;;  %2514 = vmatprep.mubr.bf16.mxu1 %v4771_v34 }
 0x38f   : > { %v1893_v28 = vpop.f32.mrb[68].mxu0  ;;  %v2246_v29 = vpop.f32.mrb[68].mxu1 }
 0x390   : > { %v3262_v30 = vmax.f32 %v3261_v14, %v1893_v28  ;;  %v3400_v33 = vmax.f32 %v3399_v17, %v2246_v29  ;;  %v1895_v35 = vpop.f32.mrb[69].mxu0  ;;  %v2248_v36 = vpop.f32.mrb[69].mxu1 }
 0x391   : > { %v3331_v37 = vmax.f32 %v3330_v22, %v1895_v35  ;;  %v3469_v57 = vmax.f32 %v3468_v27, %v2248_v36  ;;  %v1897_v58 = vpop.f32.mrb[70].mxu0  ;;  %v2250_v47 = vpop.f32.mrb[70].mxu1 }
 0x392   : > { %v3263_v59 = vmax.f32 %v3262_v30, %v1897_v58  ;;  %v3401_v60 = vmax.f32 %v3400_v33, %v2250_v47  ;;  %v1899_v61 = vpop.f32.mrb[71].mxu0  ;;  %v2252_v62 = vpop.f32.mrb[71].mxu1 }
 0x393   : > { %v3332_v63 = vmax.f32 %v3331_v37, %v1899_v61  ;;  %v3470_v0 = vmax.f32 %v3469_v57, %v2252_v62 }
 0x394   : > { %2162 = vmatmul.mubr.bf16.gmra.mrb[176].mxu0 %v5386_v42  ;;  %2515 = vmatmul.mubr.bf16.gmra.mrb[176].mxu1 %v5386_v42 }
 0x395   : > { %2171 = vmatprep.mubr.bf16.mxu0 %v4771_v34  ;;  %2524 = vmatprep.mubr.bf16.mxu1 %v4771_v34 }
 0x397   : > { %v1903_v1 = vpop.f32.mrb[72].mxu0  ;;  %v2256_v39 = vpop.f32.mrb[72].mxu1 }
 0x398   : > { %v3264_v40 = vmax.f32 %v3263_v59, %v1903_v1  ;;  %v3402_v23 = vmax.f32 %v3401_v60, %v2256_v39  ;;  %v1905_v6 = vpop.f32.mrb[73].mxu0  ;;  %v2258_v7 = vpop.f32.mrb[73].mxu1 }
 0x399   : > { %v3333_v8 = vmax.f32 %v3332_v63, %v1905_v6  ;;  %v3471_v10 = vmax.f32 %v3470_v0, %v2258_v7  ;;  %v1907_v13 = vpop.f32.mrb[74].mxu0  ;;  %v2260_v14 = vpop.f32.mrb[74].mxu1 }
 0x39a   : > { %v3265_v17 = vmax.f32 %v3264_v40, %v1907_v13  ;;  %v3403_v18 = vmax.f32 %v3402_v23, %v2260_v14  ;;  %v1909_v21 = vpop.f32.mrb[75].mxu0  ;;  %v2262_v22 = vpop.f32.mrb[75].mxu1 }
 0x39b   : > { %v3334_v27 = vmax.f32 %v3333_v8, %v1909_v21  ;;  %v3472_v28 = vmax.f32 %v3471_v10, %v2262_v22 }
 0x39c   : > { %2172 = vmatmul.mubr.bf16.gmra.mrb[180].mxu0 %v5384_v38  ;;  %2525 = vmatmul.mubr.bf16.gmra.mrb[180].mxu1 %v5384_v38 }
 0x39d   : > { %2181 = vmatprep.mubr.bf16.mxu0 %v4771_v34  ;;  %2534 = vmatprep.mubr.bf16.mxu1 %v4771_v34 }
 0x39f   : > { %v1913_v29 = vpop.f32.mrb[76].mxu0  ;;  %v2266_v30 = vpop.f32.mrb[76].mxu1 }
 0x3a0   : > { %v3266_v33 = vmax.f32 %v3265_v17, %v1913_v29  ;;  %v3404_v35 = vmax.f32 %v3403_v18, %v2266_v30  ;;  %v1915_v36 = vpop.f32.mrb[77].mxu0  ;;  %v2268_v37 = vpop.f32.mrb[77].mxu1 }
 0x3a1   : > { %v3335_v57 = vmax.f32 %v3334_v27, %v1915_v36  ;;  %v3473_v58 = vmax.f32 %v3472_v28, %v2268_v37  ;;  %v1917_v47 = vpop.f32.mrb[78].mxu0  ;;  %v2270_v59 = vpop.f32.mrb[78].mxu1 }
 0x3a2   : > { %v3267_v60 = vmax.f32 %v3266_v33, %v1917_v47  ;;  %v3405_v61 = vmax.f32 %v3404_v35, %v2270_v59  ;;  %v1919_v62 = vpop.f32.mrb[79].mxu0  ;;  %v2272_v63 = vpop.f32.mrb[79].mxu1 }
 0x3a3   : > { %v3336_v0 = vmax.f32 %v3335_v57, %v1919_v62  ;;  %v3474_v1 = vmax.f32 %v3473_v58, %v2272_v63 }
 0x3a4   : > { %2182 = vmatmul.mubr.bf16.gmra.mrb[184].mxu0 %v5398_v53  ;;  %2535 = vmatmul.mubr.bf16.gmra.mrb[184].mxu1 %v5398_v53 }
 0x3a5   : > { %2191 = vmatprep.mubr.bf16.mxu0 %v4771_v34  ;;  %2544 = vmatprep.mubr.bf16.mxu1 %v4771_v34 }
 0x3a7   : > { %v1923_v39 = vpop.f32.mrb[80].mxu0  ;;  %v2276_v40 = vpop.f32.mrb[80].mxu1 }
 0x3a8   : > { %v3268_v23 = vmax.f32 %v3267_v60, %v1923_v39  ;;  %v3406_v6 = vmax.f32 %v3405_v61, %v2276_v40  ;;  %v1925_v7 = vpop.f32.mrb[81].mxu0  ;;  %v2278_v8 = vpop.f32.mrb[81].mxu1 }
 0x3a9   : > { %v3337_v10 = vmax.f32 %v3336_v0, %v1925_v7  ;;  %v3475_v13 = vmax.f32 %v3474_v1, %v2278_v8  ;;  %v1927_v14 = vpop.f32.mrb[82].mxu0  ;;  %v2280_v17 = vpop.f32.mrb[82].mxu1 }
 0x3aa   : > { %v3269_v18 = vmax.f32 %v3268_v23, %v1927_v14  ;;  %v3407_v21 = vmax.f32 %v3406_v6, %v2280_v17  ;;  %v1929_v22 = vpop.f32.mrb[83].mxu0  ;;  %v2282_v27 = vpop.f32.mrb[83].mxu1 }
 0x3ab   : > { %v3338_v28 = vmax.f32 %v3337_v10, %v1929_v22  ;;  %v3476_v29 = vmax.f32 %v3475_v13, %v2282_v27 }
 0x3ac   : > { %2192 = vmatmul.mubr.bf16.gmra.mrb[188].mxu0 %v5396_v49  ;;  %2545 = vmatmul.mubr.bf16.gmra.mrb[188].mxu1 %v5396_v49 }
 0x3ad   : > { %2587 = vmatprep.mubr.bf16.mxu0 %v4771_v34  ;;  %2940 = vmatprep.mubr.bf16.mxu1 %v4771_v34 }
 0x3af   : > { %v1933_v30 = vpop.f32.mrb[84].mxu0  ;;  %v2286_v33 = vpop.f32.mrb[84].mxu1 }
 0x3b0   : > { %v3270_v35 = vmax.f32 %v3269_v18, %v1933_v30  ;;  %v3408_v36 = vmax.f32 %v3407_v21, %v2286_v33  ;;  %v1935_v37 = vpop.f32.mrb[85].mxu0  ;;  %v2288_v57 = vpop.f32.mrb[85].mxu1 }
 0x3b1   : > { %v3339_v58 = vmax.f32 %v3338_v28, %v1935_v37  ;;  %v3477_v47 = vmax.f32 %v3476_v29, %v2288_v57  ;;  %v1937_v59 = vpop.f32.mrb[86].mxu0  ;;  %v2290_v60 = vpop.f32.mrb[86].mxu1 }
 0x3b2   : > { %v3271_v61 = vmax.f32 %v3270_v35, %v1937_v59  ;;  %v3409_v62 = vmax.f32 %v3408_v36, %v2290_v60  ;;  %v1939_v63 = vpop.f32.mrb[87].mxu0  ;;  %v2292_v0 = vpop.f32.mrb[87].mxu1 }
 0x3b3   : > { %v3340_v1 = vmax.f32 %v3339_v58, %v1939_v63  ;;  %v3478_v39 = vmax.f32 %v3477_v47, %v2292_v0 }
 0x3b4   : > { %2588 = vmatmul.mubr.bf16.vlgmr.msra.gmra.mrb[192].mxu0 %v5212_v48  ;;  %2941 = vmatmul.mubr.bf16.vlgmr.msra.gmra.mrb[192].mxu1 %v5212_v48 }
 0x3b5   : > { %2597 = vmatprep.mubr.bf16.mxu0 %v4771_v34  ;;  %2950 = vmatprep.mubr.bf16.mxu1 %v4771_v34 }
 0x3b7   : > { %v1943_v40 = vpop.f32.mrb[88].mxu0  ;;  %v2296_v23 = vpop.f32.mrb[88].mxu1 }
 0x3b8   : > { %v3272_v6 = vmax.f32 %v3271_v61, %v1943_v40  ;;  %v3410_v7 = vmax.f32 %v3409_v62, %v2296_v23  ;;  %v1945_v8 = vpop.f32.mrb[89].mxu0  ;;  %v2298_v10 = vpop.f32.mrb[89].mxu1 }
 0x3b9   : > { %v3341_v13 = vmax.f32 %v3340_v1, %v1945_v8  ;;  %v3479_v14 = vmax.f32 %v3478_v39, %v2298_v10  ;;  %v1947_v17 = vpop.f32.mrb[90].mxu0  ;;  %v2300_v18 = vpop.f32.mrb[90].mxu1 }
 0x3ba   : > { %v3273_v21 = vmax.f32 %v3272_v6, %v1947_v17  ;;  %v3411_v22 = vmax.f32 %v3410_v7, %v2300_v18  ;;  %v1949_v27 = vpop.f32.mrb[91].mxu0  ;;  %v2302_v28 = vpop.f32.mrb[91].mxu1 }
 0x3bb   : > { %v3342_v29 = vmax.f32 %v3341_v13, %v1949_v27  ;;  %v3480_v48 = vmax.f32 %v3479_v14, %v2302_v28 }
 0x3bc   : > { %2598 = vmatmul.mubr.bf16.gmra.mrb[196].mxu0 %v5210_v44  ;;  %2951 = vmatmul.mubr.bf16.gmra.mrb[196].mxu1 %v5210_v44 }
 0x3bd   : > { %2607 = vmatprep.mubr.bf16.mxu0 %v4771_v34  ;;  %2960 = vmatprep.mubr.bf16.mxu1 %v4771_v34 }
 0x3bf   : > { %v1953_v30 = vpop.f32.mrb[92].mxu0  ;;  %v2306_v33 = vpop.f32.mrb[92].mxu1 }
 0x3c0   : > { %v3274_v35 = vmax.f32 %v3273_v21, %v1953_v30  ;;  %v3412_v36 = vmax.f32 %v3411_v22, %v2306_v33  ;;  %v1955_v37 = vpop.f32.mrb[93].mxu0  ;;  %v2308_v57 = vpop.f32.mrb[93].mxu1 }
 0x3c1   : > { %v3343_v58 = vmax.f32 %v3342_v29, %v1955_v37  ;;  %v3481_v47 = vmax.f32 %v3480_v48, %v2308_v57  ;;  %v1957_v59 = vpop.f32.mrb[94].mxu0  ;;  %v2310_v60 = vpop.f32.mrb[94].mxu1 }
 0x3c2   : > { %v3275_v61 = vmax.f32 %v3274_v35, %v1957_v59  ;;  %v3413_v62 = vmax.f32 %v3412_v36, %v2310_v60  ;;  %v1959_v63 = vpop.f32.mrb[95].mxu0  ;;  %v2312_v0 = vpop.f32.mrb[95].mxu1 }
 0x3c3   : > { %v3344_v1 = vmax.f32 %v3343_v58, %v1959_v63  ;;  %v3482_v44 = vmax.f32 %v3481_v47, %v2312_v0 }
 0x3c4   : > { %2608 = vmatmul.mubr.bf16.gmra.mrb[200].mxu0 %v5230_v5  ;;  %2961 = vmatmul.mubr.bf16.gmra.mrb[200].mxu1 %v5230_v5 }
 0x3c5   : > { %2617 = vmatprep.mubr.bf16.mxu0 %v4771_v34  ;;  %2970 = vmatprep.mubr.bf16.mxu1 %v4771_v34 }
 0x3c7   : > { %v1963_v39 = vpop.f32.mrb[96].mxu0  ;;  %v2316_v40 = vpop.f32.mrb[96].mxu1 }
 0x3c8   : > { %v3276_v23 = vmax.f32 %v3275_v61, %v1963_v39  ;;  %v3414_v6 = vmax.f32 %v3413_v62, %v2316_v40  ;;  %v1965_v7 = vpop.f32.mrb[97].mxu0  ;;  %v2318_v8 = vpop.f32.mrb[97].mxu1 }
 0x3c9   : > { %v3345_v10 = vmax.f32 %v3344_v1, %v1965_v7  ;;  %v3483_v13 = vmax.f32 %v3482_v44, %v2318_v8  ;;  %v1967_v14 = vpop.f32.mrb[98].mxu0  ;;  %v2320_v17 = vpop.f32.mrb[98].mxu1 }
 0x3ca   : > { %v3277_v18 = vmax.f32 %v3276_v23, %v1967_v14  ;;  %v3415_v21 = vmax.f32 %v3414_v6, %v2320_v17  ;;  %v1969_v22 = vpop.f32.mrb[99].mxu0  ;;  %v2322_v27 = vpop.f32.mrb[99].mxu1 }
 0x3cb   : > { %v3346_v28 = vmax.f32 %v3345_v10, %v1969_v22  ;;  %v3484_v5 = vmax.f32 %v3483_v13, %v2322_v27 }
 0x3cc   : > { %2618 = vmatmul.mubr.bf16.gmra.mrb[204].mxu0 %v5228_v4  ;;  %2971 = vmatmul.mubr.bf16.gmra.mrb[204].mxu1 %v5228_v4 }
 0x3cd   : > { %2627 = vmatprep.mubr.bf16.mxu0 %v4771_v34  ;;  %2980 = vmatprep.mubr.bf16.mxu1 %v4771_v34 }
 0x3cf   : > { %v1973_v29 = vpop.f32.mrb[100].mxu0  ;;  %v2326_v48 = vpop.f32.mrb[100].mxu1 }
 0x3d0   : > { %v3278_v30 = vmax.f32 %v3277_v18, %v1973_v29  ;;  %v3416_v33 = vmax.f32 %v3415_v21, %v2326_v48  ;;  %v1975_v35 = vpop.f32.mrb[101].mxu0  ;;  %v2328_v36 = vpop.f32.mrb[101].mxu1 }
 0x3d1   : > { %v3347_v37 = vmax.f32 %v3346_v28, %v1975_v35  ;;  %v3485_v57 = vmax.f32 %v3484_v5, %v2328_v36  ;;  %v1977_v58 = vpop.f32.mrb[102].mxu0  ;;  %v2330_v47 = vpop.f32.mrb[102].mxu1 }
 0x3d2   : > { %v3279_v59 = vmax.f32 %v3278_v30, %v1977_v58  ;;  %v3417_v60 = vmax.f32 %v3416_v33, %v2330_v47  ;;  %v1979_v61 = vpop.f32.mrb[103].mxu0  ;;  %v2332_v62 = vpop.f32.mrb[103].mxu1 }
 0x3d3   : > { %v3348_v63 = vmax.f32 %v3347_v37, %v1979_v61  ;;  %v3486_v4 = vmax.f32 %v3485_v57, %v2332_v62 }
 0x3d4   : > { %2628 = vmatmul.mubr.bf16.gmra.mrb[208].mxu0 %v5242_v32  ;;  %2981 = vmatmul.mubr.bf16.gmra.mrb[208].mxu1 %v5242_v32 }
 0x3d5   : > { %2637 = vmatprep.mubr.bf16.mxu0 %v4771_v34  ;;  %2990 = vmatprep.mubr.bf16.mxu1 %v4771_v34 }
 0x3d7   : > { %v1983_v0 = vpop.f32.mrb[104].mxu0  ;;  %v2336_v1 = vpop.f32.mrb[104].mxu1 }
 0x3d8   : > { %v3280_v44 = vmax.f32 %v3279_v59, %v1983_v0  ;;  %v3418_v39 = vmax.f32 %v3417_v60, %v2336_v1  ;;  %v1985_v40 = vpop.f32.mrb[105].mxu0  ;;  %v2338_v23 = vpop.f32.mrb[105].mxu1 }
 0x3d9   : > { %v3349_v6 = vmax.f32 %v3348_v63, %v1985_v40  ;;  %v3487_v7 = vmax.f32 %v3486_v4, %v2338_v23  ;;  %v1987_v8 = vpop.f32.mrb[106].mxu0  ;;  %v2340_v10 = vpop.f32.mrb[106].mxu1 }
 0x3da   : > { %v3281_v13 = vmax.f32 %v3280_v44, %v1987_v8  ;;  %v3419_v14 = vmax.f32 %v3418_v39, %v2340_v10  ;;  %v1989_v17 = vpop.f32.mrb[107].mxu0  ;;  %v2342_v18 = vpop.f32.mrb[107].mxu1 }
 0x3db   : > { %v3350_v21 = vmax.f32 %v3349_v6, %v1989_v17  ;;  %v3488_v32 = vmax.f32 %v3487_v7, %v2342_v18 }
 0x3dc   : > { %2638 = vmatmul.mubr.bf16.gmra.mrb[212].mxu0 %v5240_v31  ;;  %2991 = vmatmul.mubr.bf16.gmra.mrb[212].mxu1 %v5240_v31 }
 0x3dd   : > { %2647 = vmatprep.mubr.bf16.mxu0 %v4771_v34  ;;  %3000 = vmatprep.mubr.bf16.mxu1 %v4771_v34 }
 0x3df   : > { %v1993_v22 = vpop.f32.mrb[108].mxu0  ;;  %v2346_v27 = vpop.f32.mrb[108].mxu1 }
 0x3e0   : > { %v3282_v28 = vmax.f32 %v3281_v13, %v1993_v22  ;;  %v3420_v5 = vmax.f32 %v3419_v14, %v2346_v27  ;;  %v1995_v29 = vpop.f32.mrb[109].mxu0  ;;  %v2348_v48 = vpop.f32.mrb[109].mxu1 }
 0x3e1   : > { %v3351_v30 = vmax.f32 %v3350_v21, %v1995_v29  ;;  %v3489_v33 = vmax.f32 %v3488_v32, %v2348_v48  ;;  %v1997_v35 = vpop.f32.mrb[110].mxu0  ;;  %v2350_v36 = vpop.f32.mrb[110].mxu1 }
 0x3e2   : > { %v3283_v37 = vmax.f32 %v3282_v28, %v1997_v35  ;;  %v3421_v57 = vmax.f32 %v3420_v5, %v2350_v36  ;;  %v1999_v58 = vpop.f32.mrb[111].mxu0  ;;  %v2352_v47 = vpop.f32.mrb[111].mxu1 }
 0x3e3   : > { %v3352_v59 = vmax.f32 %v3351_v30, %v1999_v58  ;;  %v3490_v31 = vmax.f32 %v3489_v33, %v2352_v47 }
 0x3e4   : > { %2648 = vmatmul.mubr.bf16.gmra.mrb[216].mxu0 %v5254_v46  ;;  %3001 = vmatmul.mubr.bf16.gmra.mrb[216].mxu1 %v5254_v46 }
 0x3e5   : > { %2657 = vmatprep.mubr.bf16.mxu0 %v4771_v34  ;;  %3010 = vmatprep.mubr.bf16.mxu1 %v4771_v34 }
 0x3e7   : > { %v2003_v60 = vpop.f32.mrb[112].mxu0  ;;  %v2356_v61 = vpop.f32.mrb[112].mxu1 }
 0x3e8   : > { %v3284_v62 = vmax.f32 %v3283_v37, %v2003_v60  ;;  %v3422_v63 = vmax.f32 %v3421_v57, %v2356_v61  ;;  %v2005_v4 = vpop.f32.mrb[113].mxu0  ;;  %v2358_v0 = vpop.f32.mrb[113].mxu1 }
 0x3e9   : > { %v3353_v1 = vmax.f32 %v3352_v59, %v2005_v4  ;;  %v3491_v44 = vmax.f32 %v3490_v31, %v2358_v0  ;;  %v2007_v39 = vpop.f32.mrb[114].mxu0  ;;  %v2360_v40 = vpop.f32.mrb[114].mxu1 }
 0x3ea   : > { %v3285_v23 = vmax.f32 %v3284_v62, %v2007_v39  ;;  %v3423_v6 = vmax.f32 %v3422_v63, %v2360_v40  ;;  %v2009_v7 = vpop.f32.mrb[115].mxu0  ;;  %v2362_v8 = vpop.f32.mrb[115].mxu1 }
 0x3eb   : > { %v3354_v10 = vmax.f32 %v3353_v1, %v2009_v7  ;;  %v3492_v46 = vmax.f32 %v3491_v44, %v2362_v8 }
 0x3ec   : > { %2658 = vmatmul.mubr.bf16.gmra.mrb[220].mxu0 %v5252_v43  ;;  %3011 = vmatmul.mubr.bf16.gmra.mrb[220].mxu1 %v5252_v43 }
 0x3ed   : > { %2667 = vmatprep.mubr.bf16.mxu0 %v4771_v34  ;;  %3020 = vmatprep.mubr.bf16.mxu1 %v4771_v34 }
 0x3ef   : > { %v2013_v13 = vpop.f32.mrb[116].mxu0  ;;  %v2366_v14 = vpop.f32.mrb[116].mxu1 }
 0x3f0   : > { %v3286_v17 = vmax.f32 %v3285_v23, %v2013_v13  ;;  %v3424_v18 = vmax.f32 %v3423_v6, %v2366_v14  ;;  %v2015_v21 = vpop.f32.mrb[117].mxu0  ;;  %v2368_v32 = vpop.f32.mrb[117].mxu1 }
 0x3f1   : > { %v3355_v22 = vmax.f32 %v3354_v10, %v2015_v21  ;;  %v3493_v27 = vmax.f32 %v3492_v46, %v2368_v32  ;;  %v2017_v28 = vpop.f32.mrb[118].mxu0  ;;  %v2370_v5 = vpop.f32.mrb[118].mxu1 }
 0x3f2   : > { %v3287_v29 = vmax.f32 %v3286_v17, %v2017_v28  ;;  %v3425_v48 = vmax.f32 %v3424_v18, %v2370_v5  ;;  %v2019_v30 = vpop.f32.mrb[119].mxu0  ;;  %v2372_v33 = vpop.f32.mrb[119].mxu1 }
 0x3f3   : > { %v3356_v35 = vmax.f32 %v3355_v22, %v2019_v30  ;;  %v3494_v43 = vmax.f32 %v3493_v27, %v2372_v33 }
 0x3f4   : > { %2668 = vmatmul.mubr.bf16.gmra.mrb[224].mxu0 %v5266_v12  ;;  %3021 = vmatmul.mubr.bf16.gmra.mrb[224].mxu1 %v5266_v12 }
 0x3f5   : > { %2677 = vmatprep.mubr.bf16.mxu0 %v4771_v34  ;;  %3030 = vmatprep.mubr.bf16.mxu1 %v4771_v34 }
 0x3f7   : > { %v2023_v36 = vpop.f32.mrb[120].mxu0  ;;  %v2376_v37 = vpop.f32.mrb[120].mxu1 }
 0x3f8   : > { %v3288_v57 = vmax.f32 %v3287_v29, %v2023_v36  ;;  %v3426_v58 = vmax.f32 %v3425_v48, %v2376_v37  ;;  %v2025_v47 = vpop.f32.mrb[121].mxu0  ;;  %v2378_v59 = vpop.f32.mrb[121].mxu1 }
 0x3f9   : > { %v3357_v31 = vmax.f32 %v3356_v35, %v2025_v47  ;;  %v3495_v60 = vmax.f32 %v3494_v43, %v2378_v59  ;;  %v2027_v61 = vpop.f32.mrb[122].mxu0  ;;  %v2380_v62 = vpop.f32.mrb[122].mxu1 }
 0x3fa   : > { %v3289_v63 = vmax.f32 %v3288_v57, %v2027_v61  ;;  %v3427_v4 = vmax.f32 %v3426_v58, %v2380_v62  ;;  %v2029_v0 = vpop.f32.mrb[123].mxu0  ;;  %v2382_v1 = vpop.f32.mrb[123].mxu1 }
 0x3fb   : > { %v3358_v44 = vmax.f32 %v3357_v31, %v2029_v0  ;;  %v3496_v12 = vmax.f32 %v3495_v60, %v2382_v1 }
 0x3fc   : > { %2678 = vmatmul.mubr.bf16.gmra.mrb[228].mxu0 %v5264_v11  ;;  %3031 = vmatmul.mubr.bf16.gmra.mrb[228].mxu1 %v5264_v11 }
 0x3fd   : > { %2687 = vmatprep.mubr.bf16.mxu0 %v4771_v34  ;;  %3040 = vmatprep.mubr.bf16.mxu1 %v4771_v34 }
 0x3ff   : > { %v2033_v39 = vpop.f32.mrb[124].mxu0  ;;  %v2386_v40 = vpop.f32.mrb[124].mxu1 }
 0x400   : > { %v3290_v23 = vmax.f32 %v3289_v63, %v2033_v39  ;;  %v3428_v6 = vmax.f32 %v3427_v4, %v2386_v40  ;;  %v2035_v7 = vpop.f32.mrb[125].mxu0  ;;  %v2388_v8 = vpop.f32.mrb[125].mxu1 }
 0x401   : > { %v3359_v10 = vmax.f32 %v3358_v44, %v2035_v7  ;;  %v3497_v46 = vmax.f32 %v3496_v12, %v2388_v8  ;;  %v2037_v13 = vpop.f32.mrb[126].mxu0  ;;  %v2390_v14 = vpop.f32.mrb[126].mxu1 }
 0x402   : > { %v3291_v17 = vmax.f32 %v3290_v23, %v2037_v13  ;;  %v3429_v18 = vmax.f32 %v3428_v6, %v2390_v14  ;;  %v2039_v21 = vpop.f32.mrb[127].mxu0  ;;  %v2392_v32 = vpop.f32.mrb[127].mxu1 }
 0x403   : > { %v3360_v22 = vmax.f32 %v3359_v10, %v2039_v21  ;;  %v3498_v11 = vmax.f32 %v3497_v46, %v2392_v32 }
 0x404   : > { %2688 = vmatmul.mubr.bf16.gmra.mrb[232].mxu0 %v5278_v9  ;;  %3041 = vmatmul.mubr.bf16.gmra.mrb[232].mxu1 %v5278_v9 }
 0x405   : > { %2697 = vmatprep.mubr.bf16.mxu0 %v4771_v34  ;;  %3050 = vmatprep.mubr.bf16.mxu1 %v4771_v34 }
 0x407   : > { %v2043_v27 = vpop.f32.mrb[128].mxu0  ;;  %v2396_v28 = vpop.f32.mrb[128].mxu1 }
 0x408   : > { %v3292_v5 = vmax.f32 %v3291_v17, %v2043_v27  ;;  %v3430_v29 = vmax.f32 %v3429_v18, %v2396_v28  ;;  %v2045_v48 = vpop.f32.mrb[129].mxu0  ;;  %v2398_v30 = vpop.f32.mrb[129].mxu1 }
 0x409   : > { %v3361_v33 = vmax.f32 %v3360_v22, %v2045_v48  ;;  %v3499_v35 = vmax.f32 %v3498_v11, %v2398_v30  ;;  %v2047_v43 = vpop.f32.mrb[130].mxu0  ;;  %v2400_v36 = vpop.f32.mrb[130].mxu1 }
 0x40a   : > { %v3293_v37 = vmax.f32 %v3292_v5, %v2047_v43  ;;  %v3431_v57 = vmax.f32 %v3430_v29, %v2400_v36  ;;  %v2049_v58 = vpop.f32.mrb[131].mxu0  ;;  %v2402_v47 = vpop.f32.mrb[131].mxu1 }
 0x40b   : > { %v3362_v59 = vmax.f32 %v3361_v33, %v2049_v58  ;;  %v3500_v9 = vmax.f32 %v3499_v35, %v2402_v47 }
 0x40c   : > { %2698 = vmatmul.mubr.bf16.gmra.mrb[236].mxu0 %v5276_v26  ;;  %3051 = vmatmul.mubr.bf16.gmra.mrb[236].mxu1 %v5276_v26 }
 0x40d   : > { %2707 = vmatprep.mubr.bf16.mxu0 %v4771_v34  ;;  %3060 = vmatprep.mubr.bf16.mxu1 %v4771_v34 }
 0x40f   : > { %v2053_v31 = vpop.f32.mrb[132].mxu0  ;;  %v2406_v60 = vpop.f32.mrb[132].mxu1 }
 0x410   : > { %v3294_v61 = vmax.f32 %v3293_v37, %v2053_v31  ;;  %v3432_v62 = vmax.f32 %v3431_v57, %v2406_v60  ;;  %v2055_v63 = vpop.f32.mrb[133].mxu0  ;;  %v2408_v4 = vpop.f32.mrb[133].mxu1 }
 0x411   : > { %v3363_v0 = vmax.f32 %v3362_v59, %v2055_v63  ;;  %v3501_v1 = vmax.f32 %v3500_v9, %v2408_v4  ;;  %v2057_v44 = vpop.f32.mrb[134].mxu0  ;;  %v2410_v12 = vpop.f32.mrb[134].mxu1 }
 0x412   : > { %v3295_v39 = vmax.f32 %v3294_v61, %v2057_v44  ;;  %v3433_v40 = vmax.f32 %v3432_v62, %v2410_v12  ;;  %v2059_v23 = vpop.f32.mrb[135].mxu0  ;;  %v2412_v6 = vpop.f32.mrb[135].mxu1 }
 0x413   : > { %v3364_v7 = vmax.f32 %v3363_v0, %v2059_v23  ;;  %v3502_v26 = vmax.f32 %v3501_v1, %v2412_v6 }
 0x414   : > { %2708 = vmatmul.mubr.bf16.gmra.mrb[240].mxu0 %v5290_v54  ;;  %3061 = vmatmul.mubr.bf16.gmra.mrb[240].mxu1 %v5290_v54 }
 0x415   : > { %2717 = vmatprep.mubr.bf16.mxu0 %v4771_v34  ;;  %3070 = vmatprep.mubr.bf16.mxu1 %v4771_v34 }
 0x417   : > { %v2063_v8 = vpop.f32.mrb[136].mxu0  ;;  %v2416_v10 = vpop.f32.mrb[136].mxu1 }
 0x418   : > { %v3296_v46 = vmax.f32 %v3295_v39, %v2063_v8  ;;  %v3434_v13 = vmax.f32 %v3433_v40, %v2416_v10  ;;  %v2065_v14 = vpop.f32.mrb[137].mxu0  ;;  %v2418_v17 = vpop.f32.mrb[137].mxu1 }
 0x419   : > { %v3365_v18 = vmax.f32 %v3364_v7, %v2065_v14  ;;  %v3503_v21 = vmax.f32 %v3502_v26, %v2418_v17  ;;  %v2067_v32 = vpop.f32.mrb[138].mxu0  ;;  %v2420_v22 = vpop.f32.mrb[138].mxu1 }
 0x41a   : > { %v3297_v11 = vmax.f32 %v3296_v46, %v2067_v32  ;;  %v3435_v27 = vmax.f32 %v3434_v13, %v2420_v22  ;;  %v2069_v28 = vpop.f32.mrb[139].mxu0  ;;  %v2422_v5 = vpop.f32.mrb[139].mxu1 }
 0x41b   : > { %v3366_v29 = vmax.f32 %v3365_v18, %v2069_v28  ;;  %v3504_v54 = vmax.f32 %v3503_v21, %v2422_v5 }
 0x41c   : > { %2718 = vmatmul.mubr.bf16.gmra.mrb[244].mxu0 %v5288_v52  ;;  %3071 = vmatmul.mubr.bf16.gmra.mrb[244].mxu1 %v5288_v52 }
 0x41d   : > { %2727 = vmatprep.mubr.bf16.mxu0 %v4771_v34  ;;  %3080 = vmatprep.mubr.bf16.mxu1 %v4771_v34 }
 0x41f   : > { %v2073_v48 = vpop.f32.mrb[140].mxu0  ;;  %v2426_v30 = vpop.f32.mrb[140].mxu1 }
 0x420   : > { %v3298_v33 = vmax.f32 %v3297_v11, %v2073_v48  ;;  %v3436_v35 = vmax.f32 %v3435_v27, %v2426_v30  ;;  %v2075_v43 = vpop.f32.mrb[141].mxu0  ;;  %v2428_v36 = vpop.f32.mrb[141].mxu1 }
 0x421   : > { %v3367_v37 = vmax.f32 %v3366_v29, %v2075_v43  ;;  %v3505_v57 = vmax.f32 %v3504_v54, %v2428_v36  ;;  %v2077_v58 = vpop.f32.mrb[142].mxu0  ;;  %v2430_v47 = vpop.f32.mrb[142].mxu1 }
 0x422   : > { %v3299_v59 = vmax.f32 %v3298_v33, %v2077_v58  ;;  %v3437_v9 = vmax.f32 %v3436_v35, %v2430_v47  ;;  %v2079_v31 = vpop.f32.mrb[143].mxu0  ;;  %v2432_v60 = vpop.f32.mrb[143].mxu1 }
 0x423   : > { %v3368_v61 = vmax.f32 %v3367_v37, %v2079_v31  ;;  %v3506_v52 = vmax.f32 %v3505_v57, %v2432_v60 }
 0x424   : > { %2728 = vmatmul.mubr.bf16.gmra.mrb[248].mxu0 %v5302_v3  ;;  %3081 = vmatmul.mubr.bf16.gmra.mrb[248].mxu1 %v5302_v3 }
 0x425   : > { %2737 = vmatprep.mubr.bf16.mxu0 %v4771_v34  ;;  %3090 = vmatprep.mubr.bf16.mxu1 %v4771_v34 }
 0x427   : > { %v2083_v62 = vpop.f32.mrb[144].mxu0  ;;  %v2436_v63 = vpop.f32.mrb[144].mxu1 }
 0x428   : > { %v3300_v4 = vmax.f32 %v3299_v59, %v2083_v62  ;;  %v3438_v0 = vmax.f32 %v3437_v9, %v2436_v63  ;;  %v2085_v1 = vpop.f32.mrb[145].mxu0  ;;  %v2438_v44 = vpop.f32.mrb[145].mxu1 }
 0x429   : > { %v3369_v12 = vmax.f32 %v3368_v61, %v2085_v1  ;;  %v3507_v39 = vmax.f32 %v3506_v52, %v2438_v44  ;;  %v2087_v40 = vpop.f32.mrb[146].mxu0  ;;  %v2440_v23 = vpop.f32.mrb[146].mxu1 }
 0x42a   : > { %v3301_v6 = vmax.f32 %v3300_v4, %v2087_v40  ;;  %v3439_v7 = vmax.f32 %v3438_v0, %v2440_v23  ;;  %v2089_v26 = vpop.f32.mrb[147].mxu0  ;;  %v2442_v8 = vpop.f32.mrb[147].mxu1 }
 0x42b   : > { %v3370_v10 = vmax.f32 %v3369_v12, %v2089_v26  ;;  %v3508_v3 = vmax.f32 %v3507_v39, %v2442_v8 }
 0x42c   : > { %2738 = vmatmul.mubr.bf16.gmra.mrb[252].mxu0 %v5300_v2  ;;  %3091 = vmatmul.mubr.bf16.gmra.mrb[252].mxu1 %v5300_v2 }
 0x42d   : > { %2747 = vmatprep.mubr.bf16.mxu0 %v4771_v34  ;;  %3100 = vmatprep.mubr.bf16.mxu1 %v4771_v34 }
 0x42f   : > { %v2093_v46 = vpop.f32.mrb[148].mxu0  ;;  %v2446_v13 = vpop.f32.mrb[148].mxu1 }
 0x430   : > { %v3302_v14 = vmax.f32 %v3301_v6, %v2093_v46  ;;  %v3440_v17 = vmax.f32 %v3439_v7, %v2446_v13  ;;  %v2095_v18 = vpop.f32.mrb[149].mxu0  ;;  %v2448_v21 = vpop.f32.mrb[149].mxu1 }
 0x431   : > { %v3371_v32 = vmax.f32 %v3370_v10, %v2095_v18  ;;  %v3509_v22 = vmax.f32 %v3508_v3, %v2448_v21  ;;  %v2097_v11 = vpop.f32.mrb[150].mxu0  ;;  %v2450_v27 = vpop.f32.mrb[150].mxu1 }
 0x432   : > { %v3303_v28 = vmax.f32 %v3302_v14, %v2097_v11  ;;  %v3441_v5 = vmax.f32 %v3440_v17, %v2450_v27  ;;  %v2099_v29 = vpop.f32.mrb[151].mxu0  ;;  %v2452_v54 = vpop.f32.mrb[151].mxu1 }
 0x433   : > { %v3372_v48 = vmax.f32 %v3371_v32, %v2099_v29  ;;  %v3510_v2 = vmax.f32 %v3509_v22, %v2452_v54 }
 0x434   : > { %2748 = vmatmul.mubr.bf16.gmra.mrb[0].mxu0 %v5314_v25  ;;  %3101 = vmatmul.mubr.bf16.gmra.mrb[0].mxu1 %v5314_v25 }
 0x435   : > { %2757 = vmatprep.mubr.bf16.mxu0 %v4771_v34  ;;  %3110 = vmatprep.mubr.bf16.mxu1 %v4771_v34 }
 0x437   : > { %v2103_v30 = vpop.f32.mrb[152].mxu0  ;;  %v2456_v33 = vpop.f32.mrb[152].mxu1 }
 0x438   : > { %v3304_v35 = vmax.f32 %v3303_v28, %v2103_v30  ;;  %v3442_v43 = vmax.f32 %v3441_v5, %v2456_v33  ;;  %v2105_v36 = vpop.f32.mrb[153].mxu0  ;;  %v2458_v37 = vpop.f32.mrb[153].mxu1 }
 0x439   : > { %v3373_v57 = vmax.f32 %v3372_v48, %v2105_v36  ;;  %v3511_v58 = vmax.f32 %v3510_v2, %v2458_v37  ;;  %v2107_v47 = vpop.f32.mrb[154].mxu0  ;;  %v2460_v59 = vpop.f32.mrb[154].mxu1 }
 0x43a   : > { %v3305_v9 = vmax.f32 %v3304_v35, %v2107_v47  ;;  %v3443_v31 = vmax.f32 %v3442_v43, %v2460_v59  ;;  %v2109_v60 = vpop.f32.mrb[155].mxu0  ;;  %v2462_v61 = vpop.f32.mrb[155].mxu1 }
 0x43b   : > { %v3374_v52 = vmax.f32 %v3373_v57, %v2109_v60  ;;  %v3512_v25 = vmax.f32 %v3511_v58, %v2462_v61 }
 0x43c   : > { %2758 = vmatmul.mubr.bf16.gmra.mrb[4].mxu0 %v5312_v24  ;;  %3111 = vmatmul.mubr.bf16.gmra.mrb[4].mxu1 %v5312_v24 }
 0x43d   : > { %2767 = vmatprep.mubr.bf16.mxu0 %v4771_v34  ;;  %3120 = vmatprep.mubr.bf16.mxu1 %v4771_v34 }
 0x43f   : > { %v2113_v62 = vpop.f32.mrb[156].mxu0  ;;  %v2466_v63 = vpop.f32.mrb[156].mxu1 }
 0x440   : > { %v3306_v4 = vmax.f32 %v3305_v9, %v2113_v62  ;;  %v3444_v0 = vmax.f32 %v3443_v31, %v2466_v63  ;;  %v2115_v1 = vpop.f32.mrb[157].mxu0  ;;  %v2468_v44 = vpop.f32.mrb[157].mxu1 }
 0x441   : > { %v3375_v12 = vmax.f32 %v3374_v52, %v2115_v1  ;;  %v3513_v39 = vmax.f32 %v3512_v25, %v2468_v44  ;;  %v2117_v40 = vpop.f32.mrb[158].mxu0  ;;  %v2470_v23 = vpop.f32.mrb[158].mxu1 }
 0x442   : > { %v3307_v6 = vmax.f32 %v3306_v4, %v2117_v40  ;;  %v3445_v7 = vmax.f32 %v3444_v0, %v2470_v23  ;;  %v2119_v26 = vpop.f32.mrb[159].mxu0  ;;  %v2472_v8 = vpop.f32.mrb[159].mxu1 }
 0x443   : > { %v3376_v10 = vmax.f32 %v3375_v12, %v2119_v26  ;;  %v3514_v24 = vmax.f32 %v3513_v39, %v2472_v8 }
 0x444   : > { %2768 = vmatmul.mubr.bf16.gmra.mrb[8].mxu0 %v5326_v56  ;;  %3121 = vmatmul.mubr.bf16.gmra.mrb[8].mxu1 %v5326_v56 }
 0x445   : > { %2777 = vmatprep.mubr.bf16.mxu0 %v4771_v34  ;;  %3130 = vmatprep.mubr.bf16.mxu1 %v4771_v34 }
 0x447   : > { %v2123_v3 = vpop.f32.mrb[160].mxu0  ;;  %v2476_v46 = vpop.f32.mrb[160].mxu1 }
 0x448   : > { %v3308_v13 = vmax.f32 %v3307_v6, %v2123_v3  ;;  %v3446_v14 = vmax.f32 %v3445_v7, %v2476_v46  ;;  %v2125_v17 = vpop.f32.mrb[161].mxu0  ;;  %v2478_v18 = vpop.f32.mrb[161].mxu1 }
 0x449   : > { %v3377_v21 = vmax.f32 %v3376_v10, %v2125_v17  ;;  %v3515_v32 = vmax.f32 %v3514_v24, %v2478_v18  ;;  %v2127_v22 = vpop.f32.mrb[162].mxu0  ;;  %v2480_v11 = vpop.f32.mrb[162].mxu1 }
 0x44a   : > { %v3309_v27 = vmax.f32 %v3308_v13, %v2127_v22  ;;  %v3447_v28 = vmax.f32 %v3446_v14, %v2480_v11  ;;  %v2129_v5 = vpop.f32.mrb[163].mxu0  ;;  %v2482_v29 = vpop.f32.mrb[163].mxu1 }
 0x44b   : > { %v3378_v54 = vmax.f32 %v3377_v21, %v2129_v5  ;;  %v3516_v56 = vmax.f32 %v3515_v32, %v2482_v29 }
 0x44c   : > { %2778 = vmatmul.mubr.bf16.gmra.mrb[12].mxu0 %v5324_v55  ;;  %3131 = vmatmul.mubr.bf16.gmra.mrb[12].mxu1 %v5324_v55 }
 0x44d   : > { %2787 = vmatprep.mubr.bf16.mxu0 %v4771_v34  ;;  %3140 = vmatprep.mubr.bf16.mxu1 %v4771_v34 }
 0x44f   : > { %v2133_v48 = vpop.f32.mrb[164].mxu0  ;;  %v2486_v2 = vpop.f32.mrb[164].mxu1 }
 0x450   : > { %v3310_v30 = vmax.f32 %v3309_v27, %v2133_v48  ;;  %v3448_v33 = vmax.f32 %v3447_v28, %v2486_v2  ;;  %v2135_v35 = vpop.f32.mrb[165].mxu0  ;;  %v2488_v43 = vpop.f32.mrb[165].mxu1 }
 0x451   : > { %v3379_v36 = vmax.f32 %v3378_v54, %v2135_v35  ;;  %v3517_v37 = vmax.f32 %v3516_v56, %v2488_v43  ;;  %v2137_v57 = vpop.f32.mrb[166].mxu0  ;;  %v2490_v58 = vpop.f32.mrb[166].mxu1 }
 0x452   : > { %v3311_v47 = vmax.f32 %v3310_v30, %v2137_v57  ;;  %v3449_v59 = vmax.f32 %v3448_v33, %v2490_v58  ;;  %v2139_v9 = vpop.f32.mrb[167].mxu0  ;;  %v2492_v31 = vpop.f32.mrb[167].mxu1 }
 0x453   : > { %v3380_v60 = vmax.f32 %v3379_v36, %v2139_v9  ;;  %v3518_v55 = vmax.f32 %v3517_v37, %v2492_v31 }
 0x454   : > { %2788 = vmatmul.mubr.bf16.gmra.mrb[16].mxu0 %v5338_v45  ;;  %3141 = vmatmul.mubr.bf16.gmra.mrb[16].mxu1 %v5338_v45 }
 0x455   : > { %2797 = vmatprep.mubr.bf16.mxu0 %v4771_v34  ;;  %3150 = vmatprep.mubr.bf16.mxu1 %v4771_v34 }
 0x457   : > { %v2143_v61 = vpop.f32.mrb[168].mxu0  ;;  %v2496_v52 = vpop.f32.mrb[168].mxu1 }
 0x458   : > { %v3312_v25 = vmax.f32 %v3311_v47, %v2143_v61  ;;  %v3450_v62 = vmax.f32 %v3449_v59, %v2496_v52  ;;  %v2145_v63 = vpop.f32.mrb[169].mxu0  ;;  %v2498_v4 = vpop.f32.mrb[169].mxu1 }
 0x459   : > { %v3381_v0 = vmax.f32 %v3380_v60, %v2145_v63  ;;  %v3519_v1 = vmax.f32 %v3518_v55, %v2498_v4  ;;  %v2147_v44 = vpop.f32.mrb[170].mxu0  ;;  %v2500_v12 = vpop.f32.mrb[170].mxu1 }
 0x45a   : > { %v3313_v39 = vmax.f32 %v3312_v25, %v2147_v44  ;;  %v3451_v40 = vmax.f32 %v3450_v62, %v2500_v12  ;;  %v2149_v23 = vpop.f32.mrb[171].mxu0  ;;  %v2502_v6 = vpop.f32.mrb[171].mxu1 }
 0x45b   : > { %v3382_v7 = vmax.f32 %v3381_v0, %v2149_v23  ;;  %v3520_v45 = vmax.f32 %v3519_v1, %v2502_v6 }
 0x45c   : > { %2798 = vmatmul.mubr.bf16.gmra.mrb[20].mxu0 %v5336_v41  ;;  %3151 = vmatmul.mubr.bf16.gmra.mrb[20].mxu1 %v5336_v41 }
 0x45d   : > { %2807 = vmatprep.mubr.bf16.mxu0 %v4771_v34  ;;  %3160 = vmatprep.mubr.bf16.mxu1 %v4771_v34 }
 0x45f   : > { %v2153_v26 = vpop.f32.mrb[172].mxu0  ;;  %v2506_v8 = vpop.f32.mrb[172].mxu1 }
 0x460   : > { %v3314_v10 = vmax.f32 %v3313_v39, %v2153_v26  ;;  %v3452_v24 = vmax.f32 %v3451_v40, %v2506_v8  ;;  %v2155_v3 = vpop.f32.mrb[173].mxu0  ;;  %v2508_v46 = vpop.f32.mrb[173].mxu1 }
 0x461   : > { %v3383_v13 = vmax.f32 %v3382_v7, %v2155_v3  ;;  %v3521_v14 = vmax.f32 %v3520_v45, %v2508_v46  ;;  %v2157_v17 = vpop.f32.mrb[174].mxu0  ;;  %v2510_v18 = vpop.f32.mrb[174].mxu1 }
 0x462   : > { %v3315_v21 = vmax.f32 %v3314_v10, %v2157_v17  ;;  %v3453_v32 = vmax.f32 %v3452_v24, %v2510_v18  ;;  %v2159_v22 = vpop.f32.mrb[175].mxu0  ;;  %v2512_v11 = vpop.f32.mrb[175].mxu1 }
 0x463   : > { %v3384_v27 = vmax.f32 %v3383_v13, %v2159_v22  ;;  %v3522_v41 = vmax.f32 %v3521_v14, %v2512_v11 }
 0x464   : > { %2808 = vmatmul.mubr.bf16.gmra.mrb[24].mxu0 %v5350_v20  ;;  %3161 = vmatmul.mubr.bf16.gmra.mrb[24].mxu1 %v5350_v20 }
 0x465   : > { %2817 = vmatprep.mubr.bf16.mxu0 %v4771_v34  ;;  %3170 = vmatprep.mubr.bf16.mxu1 %v4771_v34 }
 0x467   : > { %v2163_v28 = vpop.f32.mrb[176].mxu0  ;;  %v2516_v5 = vpop.f32.mrb[176].mxu1 }
 0x468   : > { %v3316_v29 = vmax.f32 %v3315_v21, %v2163_v28  ;;  %v3454_v54 = vmax.f32 %v3453_v32, %v2516_v5  ;;  %v2165_v56 = vpop.f32.mrb[177].mxu0  ;;  %v2518_v48 = vpop.f32.mrb[177].mxu1 }
 0x469   : > { %v3385_v2 = vmax.f32 %v3384_v27, %v2165_v56  ;;  %v3523_v30 = vmax.f32 %v3522_v41, %v2518_v48  ;;  %v2167_v33 = vpop.f32.mrb[178].mxu0  ;;  %v2520_v35 = vpop.f32.mrb[178].mxu1 }
 0x46a   : > { %v3317_v43 = vmax.f32 %v3316_v29, %v2167_v33  ;;  %v3455_v36 = vmax.f32 %v3454_v54, %v2520_v35  ;;  %v2169_v37 = vpop.f32.mrb[179].mxu0  ;;  %v2522_v57 = vpop.f32.mrb[179].mxu1 }
 0x46b   : > { %v3386_v58 = vmax.f32 %v3385_v2, %v2169_v37  ;;  %v3524_v20 = vmax.f32 %v3523_v30, %v2522_v57  ;;  %v3832_v37 = vlaneseq }
 0x46c   : > { %2818 = vmatmul.mubr.bf16.gmra.mrb[28].mxu0 %v5348_v19  ;;  %3171 = vmatmul.mubr.bf16.gmra.mrb[28].mxu1 %v5348_v19 }
 0x46d   : > { %2827 = vmatprep.mubr.bf16.mxu0 %v4771_v34  ;;  %3180 = vmatprep.mubr.bf16.mxu1 %v4771_v34 }
 0x46f   : > { %v2173_v47 = vpop.f32.mrb[180].mxu0  ;;  %v2526_v59 = vpop.f32.mrb[180].mxu1 }
 0x470   : > { %v3318_v9 = vmax.f32 %v3317_v43, %v2173_v47  ;;  %v3456_v31 = vmax.f32 %v3455_v36, %v2526_v59  ;;  %v2175_v60 = vpop.f32.mrb[181].mxu0  ;;  %v2528_v55 = vpop.f32.mrb[181].mxu1  ;;  %v4772_v43 = vmov 1966171168  }
 0x471   : > { %v3387_v61 = vmax.f32 %v3386_v58, %v2175_v60  ;;  %v3525_v52 = vmax.f32 %v3524_v20, %v2528_v55  ;;  %v2177_v25 = vpop.f32.mrb[182].mxu0  ;;  %v2530_v62 = vpop.f32.mrb[182].mxu1  ;;  %v3830_v36 = vunpack.c.l.s4 %v4772_v43 }
 0x472   : > { %v3319_v63 = vmax.f32 %v3318_v9, %v2177_v25  ;;  %v3457_v4 = vmax.f32 %v3456_v31, %v2530_v62  ;;  %v2179_v0 = vpop.f32.mrb[183].mxu0  ;;  %v2532_v1 = vpop.f32.mrb[183].mxu1  ;;  %v3833_v62 = vshrl.u32 %v3832_v37, 7 }
 0x473   : > { %v3388_v44 = vmax.f32 %v3387_v61, %v2179_v0  ;;  %v3526_v19 = vmax.f32 %v3525_v52, %v2532_v1  ;;  %v3831_v25 = vunpack.c.0.s8 %v3830_v36 }
 0x474   : > { %2828 = vmatmul.mubr.bf16.gmra.mrb[32].mxu0 %v5362_v51  ;;  %3181 = vmatmul.mubr.bf16.gmra.mrb[32].mxu1 %v5362_v51 }
 0x475   : > { %2837 = vmatprep.mubr.bf16.mxu0 %v4771_v34  ;;  %3190 = vmatprep.mubr.bf16.mxu1 %v4771_v34 }
 0x477   : > { %v2183_v12 = vpop.f32.mrb[184].mxu0  ;;  %v2536_v39 = vpop.f32.mrb[184].mxu1 }
 0x478   : > { %v3320_v40 = vmax.f32 %v3319_v63, %v2183_v12  ;;  %v3458_v23 = vmax.f32 %v3457_v4, %v2536_v39  ;;  %v2185_v6 = vpop.f32.mrb[185].mxu0  ;;  %v2538_v7 = vpop.f32.mrb[185].mxu1 }
 0x479   : > { %v3389_v45 = vmax.f32 %v3388_v44, %v2185_v6  ;;  %v3527_v26 = vmax.f32 %v3526_v19, %v2538_v7  ;;  %v2187_v8 = vpop.f32.mrb[186].mxu0  ;;  %v2540_v10 = vpop.f32.mrb[186].mxu1 }
 0x47a   : > { %v3321_v24 = vmax.f32 %v3320_v40, %v2187_v8  ;;  %v3459_v3 = vmax.f32 %v3458_v23, %v2540_v10  ;;  %v2189_v46 = vpop.f32.mrb[187].mxu0  ;;  %v2542_v13 = vpop.f32.mrb[187].mxu1 }
 0x47b   : > { %v3390_v14 = vmax.f32 %v3389_v45, %v2189_v46  ;;  %v3528_v51 = vmax.f32 %v3527_v26, %v2542_v13 }
 0x47c   : > { %2838 = vmatmul.mubr.bf16.gmra.mrb[36].mxu0 %v5360_v50  ;;  %3191 = vmatmul.mubr.bf16.gmra.mrb[36].mxu1 %v5360_v50 }
 0x47d   : > { %2847 = vmatprep.mubr.bf16.mxu0 %v4771_v34  ;;  %3200 = vmatprep.mubr.bf16.mxu1 %v4771_v34 }
 0x47f   : > { %v2193_v17 = vpop.f32.mrb[188].mxu0  ;;  %v2546_v18 = vpop.f32.mrb[188].mxu1 }
 0x480   : > { %v3322_v21 = vmax.f32 %v3321_v24, %v2193_v17  ;;  %v3460_v32 = vmax.f32 %v3459_v3, %v2546_v18  ;;  %v2195_v22 = vpop.f32.mrb[189].mxu0  ;;  %v2548_v11 = vpop.f32.mrb[189].mxu1 }
 0x481   : > { %v3391_v27 = vmax.f32 %v3390_v14, %v2195_v22  ;;  %v3529_v41 = vmax.f32 %v3528_v51, %v2548_v11  ;;  %v2197_v28 = vpop.f32.mrb[190].mxu0  ;;  %v2550_v5 = vpop.f32.mrb[190].mxu1  ;;  %v5580_v14 = vsub.s32 %v3831_v25, %v3833_v62 }
 0x482   : > { %v3323_v29 = vmax.f32 %v3322_v21, %v2197_v28  ;;  %v3461_v54 = vmax.f32 %v3460_v32, %v2550_v5  ;;  %v2199_v56 = vpop.f32.mrb[191].mxu0  ;;  %v2552_v48 = vpop.f32.mrb[191].mxu1 }
 0x483   : > { %v3392_v2 = vmax.f32 %v3391_v27, %v2199_v56  ;;  %v3530_v50 = vmax.f32 %v3529_v41, %v2552_v48 }
 0x484   : > { %v3324_v30 = vrot.slane %v3323_v29, 4  ;;  %v3462_v33 = vrot.slane %v3461_v54, 4  ;;  %2848 = vmatmul.mubr.bf16.gmra.mrb[40].mxu0 %v5374_v16  ;;  %3201 = vmatmul.mubr.bf16.gmra.mrb[40].mxu1 %v5374_v16 }
 0x485   : > { %v3393_v35 = vrot.slane %v3392_v2, 4  ;;  %v3531_v57 = vrot.slane %v3530_v50, 4  ;;  %2857 = vmatprep.mubr.bf16.mxu0 %v4771_v34  ;;  %3210 = vmatprep.mubr.bf16.mxu1 %v4771_v34 }
 0x486   : > { %v3325_v58 = vmax.f32 %v3323_v29, %v3324_v30  ;;  %v3463_v20 = vmax.f32 %v3461_v54, %v3462_v33 }
 0x487   : > { %v3394_v47 = vmax.f32 %v3392_v2, %v3393_v35  ;;  %v3532_v59 = vmax.f32 %v3530_v50, %v3531_v57  ;;  %v2589_v9 = vpop.f32.mrb[192].mxu0  ;;  %v2942_v31 = vpop.f32.mrb[192].mxu1 }
 0x488   : > { %v3326_v60 = vrot.slane %v3325_v58, 2  ;;  %v3464_v55 = vrot.slane %v3463_v20, 2  ;;  %v2591_v61 = vpop.f32.mrb[193].mxu0  ;;  %v2944_v52 = vpop.f32.mrb[193].mxu1 }
 0x489   : > { %v3395_v16 = vrot.slane %v3394_v47, 2  ;;  %v3533_v63 = vrot.slane %v3532_v59, 2  ;;  %v2593_v4 = vpop.f32.mrb[194].mxu0  ;;  %v2946_v0 = vpop.f32.mrb[194].mxu1 }
 0x48a   : > { %v3327_v1 = vmax.f32 %v3325_v58, %v3326_v60  ;;  %v3465_v44 = vmax.f32 %v3463_v20, %v3464_v55  ;;  %v3537_v19 = vmax.f32 %v2589_v9, %v2593_v4  ;;  %v3675_v12 = vmax.f32 %v2942_v31, %v2946_v0  ;;  %v2595_v39 = vpop.f32.mrb[195].mxu0  ;;  %v2948_v40 = vpop.f32.mrb[195].mxu1 }
 0x48b   : > { %v3396_v23 = vmax.f32 %v3394_v47, %v3395_v16  ;;  %v3534_v6 = vmax.f32 %v3532_v59, %v3533_v63  ;;  %v3606_v7 = vmax.f32 %v2591_v61, %v2595_v39  ;;  %v3744_v45 = vmax.f32 %v2944_v52, %v2948_v40 }
 0x48c   : > { %v3328_v26 = vrot.slane %v3327_v1, 1  ;;  %v3466_v8 = vrot.slane %v3465_v44, 1  ;;  %2858 = vmatmul.mubr.bf16.gmra.mrb[44].mxu0 %v5372_v15  ;;  %3211 = vmatmul.mubr.bf16.gmra.mrb[44].mxu1 %v5372_v15 }
 0x48d   : > { %v3397_v10 = vrot.slane %v3396_v23, 1  ;;  %v3535_v24 = vrot.slane %v3534_v6, 1  ;;  %2867 = vmatprep.mubr.bf16.mxu0 %v4771_v34  ;;  %3220 = vmatprep.mubr.bf16.mxu1 %v4771_v34 }
 0x48e   : > { %v3329_v3 = vmax.f32 %v3327_v1, %v3328_v26  ;;  %v3467_v46 = vmax.f32 %v3465_v44, %v3466_v8 }
 0x48f   : > { %v3398_v13 = vmax.f32 %v3396_v23, %v3397_v10  ;;  %v3536_v51 = vmax.f32 %v3534_v6, %v3535_v24  ;;  %v2599_v17 = vpop.f32.mrb[196].mxu0  ;;  %v2952_v18 = vpop.f32.mrb[196].mxu1 }
 0x490   : > { %v3538_v21 = vmax.f32 %v3537_v19, %v2599_v17  ;;  %v3676_v32 = vmax.f32 %v3675_v12, %v2952_v18  ;;  %v2601_v22 = vpop.f32.mrb[197].mxu0  ;;  %v2954_v11 = vpop.f32.mrb[197].mxu1 }
 0x491   : > { %v3825_v27 = vcombine.low %v3329_v3, %v3398_v13  ;;  %v3826_v15 = vcombine.low %v3467_v46, %v3536_v51  ;;  %v3607_v41 = vmax.f32 %v3606_v7, %v2601_v22  ;;  %v3745_v28 = vmax.f32 %v3744_v45, %v2954_v11  ;;  %v2603_v5 = vpop.f32.mrb[198].mxu0  ;;  %v2956_v29 = vpop.f32.mrb[198].mxu1 }
 0x492   : > { %v3539_v54 = vmax.f32 %v3538_v21, %v2603_v5  ;;  %v3677_v56 = vmax.f32 %v3676_v32, %v2956_v29  ;;  %v2605_v48 = vpop.f32.mrb[199].mxu0  ;;  %v2958_v2 = vpop.f32.mrb[199].mxu1 }
 0x493   : > { %v5583_v50 = vrot.slane %v3825_v27, %v5580_v14  ;;  %v5586_v30 = vrot.slane %v3826_v15, %v5580_v14  ;;  %v3608_v33 = vmax.f32 %v3607_v41, %v2605_v48  ;;  %v3746_v35 = vmax.f32 %v3745_v28, %v2958_v2 }
 0x494   : > { %2868 = vmatmul.mubr.bf16.gmra.mrb[48].mxu0 %v5386_v42  ;;  %3221 = vmatmul.mubr.bf16.gmra.mrb[48].mxu1 %v5386_v42 }
 0x495   : > { %v3857_v43 = vcombine.low %v5583_v50, %v5586_v30  ;;  %2877 = vmatprep.mubr.bf16.mxu0 %v4771_v34  ;;  %3230 = vmatprep.mubr.bf16.mxu1 %v4771_v34 }
 0x497   : > { %v2609_v36 = vpop.f32.mrb[200].mxu0  ;;  %v2962_v37 = vpop.f32.mrb[200].mxu1 }
 0x498   : > { %v3540_v57 = vmax.f32 %v3539_v54, %v2609_v36  ;;  %v3678_v58 = vmax.f32 %v3677_v56, %v2962_v37  ;;  %v2611_v20 = vpop.f32.mrb[201].mxu0  ;;  %v2964_v47 = vpop.f32.mrb[201].mxu1 }
 0x499   : > { %v3609_v59 = vmax.f32 %v3608_v33, %v2611_v20  ;;  %v3747_v9 = vmax.f32 %v3746_v35, %v2964_v47  ;;  %v2613_v31 = vpop.f32.mrb[202].mxu0  ;;  %v2966_v60 = vpop.f32.mrb[202].mxu1 }
 0x49a   : > { %v3541_v55 = vmax.f32 %v3540_v57, %v2613_v31  ;;  %v3679_v61 = vmax.f32 %v3678_v58, %v2966_v60  ;;  %v2615_v42 = vpop.f32.mrb[203].mxu0  ;;  %v2968_v52 = vpop.f32.mrb[203].mxu1 }
 0x49b   : > { %v3610_v16 = vmax.f32 %v3609_v59, %v2615_v42  ;;  %v3748_v25 = vmax.f32 %v3747_v9, %v2968_v52 }
 0x49c   : > { %2878 = vmatmul.mubr.bf16.gmra.mrb[52].mxu0 %v5384_v38  ;;  %3231 = vmatmul.mubr.bf16.gmra.mrb[52].mxu1 %v5384_v38 }
 0x49d   : > { %2887 = vmatprep.mubr.bf16.mxu0 %v4771_v34  ;;  %3240 = vmatprep.mubr.bf16.mxu1 %v4771_v34 }
 0x49f   : > { %v2619_v62 = vpop.f32.mrb[204].mxu0  ;;  %v2972_v63 = vpop.f32.mrb[204].mxu1 }
 0x4a0   : > { %v3542_v4 = vmax.f32 %v3541_v55, %v2619_v62  ;;  %v3680_v0 = vmax.f32 %v3679_v61, %v2972_v63  ;;  %v2621_v1 = vpop.f32.mrb[205].mxu0  ;;  %v2974_v44 = vpop.f32.mrb[205].mxu1 }
 0x4a1   : > { %v3611_v19 = vmax.f32 %v3610_v16, %v2621_v1  ;;  %v3749_v12 = vmax.f32 %v3748_v25, %v2974_v44  ;;  %v2623_v39 = vpop.f32.mrb[206].mxu0  ;;  %v2976_v40 = vpop.f32.mrb[206].mxu1 }
 0x4a2   : > { %v3543_v23 = vmax.f32 %v3542_v4, %v2623_v39  ;;  %v3681_v6 = vmax.f32 %v3680_v0, %v2976_v40  ;;  %v2625_v7 = vpop.f32.mrb[207].mxu0  ;;  %v2978_v45 = vpop.f32.mrb[207].mxu1 }
 0x4a3   : > { %v3612_v26 = vmax.f32 %v3611_v19, %v2625_v7  ;;  %v3750_v38 = vmax.f32 %v3749_v12, %v2978_v45 }
 0x4a4   : > { %2888 = vmatmul.mubr.bf16.gmra.mrb[56].mxu0 %v5398_v53  ;;  %3241 = vmatmul.mubr.bf16.gmra.mrb[56].mxu1 %v5398_v53 }
 0x4a5   : > { %2897 = vmatprep.mubr.bf16.mxu0 %v4771_v34  ;;  %3250 = vmatprep.mubr.bf16.mxu1 %v4771_v34 }
 0x4a7   : > { %v2629_v8 = vpop.f32.mrb[208].mxu0  ;;  %v2982_v10 = vpop.f32.mrb[208].mxu1 }
 0x4a8   : > { %v3544_v24 = vmax.f32 %v3543_v23, %v2629_v8  ;;  %v3682_v3 = vmax.f32 %v3681_v6, %v2982_v10  ;;  %v2631_v46 = vpop.f32.mrb[209].mxu0  ;;  %v2984_v13 = vpop.f32.mrb[209].mxu1 }
 0x4a9   : > { %v3613_v51 = vmax.f32 %v3612_v26, %v2631_v46  ;;  %v3751_v17 = vmax.f32 %v3750_v38, %v2984_v13  ;;  %v2633_v18 = vpop.f32.mrb[210].mxu0  ;;  %v2986_v21 = vpop.f32.mrb[210].mxu1 }
 0x4aa   : > { %v3545_v32 = vmax.f32 %v3544_v24, %v2633_v18  ;;  %v3683_v22 = vmax.f32 %v3682_v3, %v2986_v21  ;;  %v2635_v11 = vpop.f32.mrb[211].mxu0  ;;  %v2988_v27 = vpop.f32.mrb[211].mxu1 }
 0x4ab   : > { %v3614_v15 = vmax.f32 %v3613_v51, %v2635_v11  ;;  %v3752_v53 = vmax.f32 %v3751_v17, %v2988_v27 }
 0x4ac   : > { %2898 = vmatmul.mubr.bf16.gmra.mrb[60].mxu0 %v5396_v49  ;;  %3251 = vmatmul.mubr.bf16.gmra.mrb[60].mxu1 %v5396_v49 }
 0x4af   : > { %v2639_v34 = vpop.f32.mrb[212].mxu0  ;;  %v2992_v41 = vpop.f32.mrb[212].mxu1 }
 0x4b0   : > { %v3546_v28 = vmax.f32 %v3545_v32, %v2639_v34  ;;  %v3684_v5 = vmax.f32 %v3683_v22, %v2992_v41  ;;  %v2641_v29 = vpop.f32.mrb[213].mxu0  ;;  %v2994_v54 = vpop.f32.mrb[213].mxu1 }
 0x4b1   : > { %v3615_v56 = vmax.f32 %v3614_v15, %v2641_v29  ;;  %v3753_v48 = vmax.f32 %v3752_v53, %v2994_v54  ;;  %v2643_v2 = vpop.f32.mrb[214].mxu0  ;;  %v2996_v33 = vpop.f32.mrb[214].mxu1 }
 0x4b2   : > { %v3547_v35 = vmax.f32 %v3546_v28, %v2643_v2  ;;  %v3685_v36 = vmax.f32 %v3684_v5, %v2996_v33  ;;  %v2645_v37 = vpop.f32.mrb[215].mxu0  ;;  %v2998_v57 = vpop.f32.mrb[215].mxu1 }
 0x4b3   : > { %v3616_v58 = vmax.f32 %v3615_v56, %v2645_v37  ;;  %v3754_v20 = vmax.f32 %v3753_v48, %v2998_v57 }
 0x4b7   : > { %v2649_v47 = vpop.f32.mrb[216].mxu0  ;;  %v3002_v59 = vpop.f32.mrb[216].mxu1 }
 0x4b8   : > { %v3548_v9 = vmax.f32 %v3547_v35, %v2649_v47  ;;  %v3686_v49 = vmax.f32 %v3685_v36, %v3002_v59  ;;  %v2651_v31 = vpop.f32.mrb[217].mxu0  ;;  %v3004_v60 = vpop.f32.mrb[217].mxu1 }
 0x4b9   : > { %v3617_v55 = vmax.f32 %v3616_v58, %v2651_v31  ;;  %v3755_v61 = vmax.f32 %v3754_v20, %v3004_v60  ;;  %v2653_v42 = vpop.f32.mrb[218].mxu0  ;;  %v3006_v52 = vpop.f32.mrb[218].mxu1 }
 0x4ba   : > { %v3549_v16 = vmax.f32 %v3548_v9, %v2653_v42  ;;  %v3687_v25 = vmax.f32 %v3686_v49, %v3006_v52  ;;  %v2655_v62 = vpop.f32.mrb[219].mxu0  ;;  %v3008_v63 = vpop.f32.mrb[219].mxu1 }
 0x4bb   : > { %v3618_v4 = vmax.f32 %v3617_v55, %v2655_v62  ;;  %v3756_v0 = vmax.f32 %v3755_v61, %v3008_v63 }
 0x4bf   : > { %v2659_v1 = vpop.f32.mrb[220].mxu0  ;;  %v3012_v44 = vpop.f32.mrb[220].mxu1 }
 0x4c0   : > { %v3550_v19 = vmax.f32 %v3549_v16, %v2659_v1  ;;  %v3688_v12 = vmax.f32 %v3687_v25, %v3012_v44  ;;  %v2661_v39 = vpop.f32.mrb[221].mxu0  ;;  %v3014_v40 = vpop.f32.mrb[221].mxu1 }
 0x4c1   : > { %v3619_v23 = vmax.f32 %v3618_v4, %v2661_v39  ;;  %v3757_v6 = vmax.f32 %v3756_v0, %v3014_v40  ;;  %v2663_v7 = vpop.f32.mrb[222].mxu0  ;;  %v3016_v45 = vpop.f32.mrb[222].mxu1 }
 0x4c2   : > { %v3551_v26 = vmax.f32 %v3550_v19, %v2663_v7  ;;  %v3689_v38 = vmax.f32 %v3688_v12, %v3016_v45  ;;  %v2665_v8 = vpop.f32.mrb[223].mxu0  ;;  %v3018_v10 = vpop.f32.mrb[223].mxu1 }
 0x4c3   : > { %v3620_v24 = vmax.f32 %v3619_v23, %v2665_v8  ;;  %v3758_v3 = vmax.f32 %v3757_v6, %v3018_v10 }
 0x4c7   : > { %v2669_v46 = vpop.f32.mrb[224].mxu0  ;;  %v3022_v13 = vpop.f32.mrb[224].mxu1 }
 0x4c8   : > { %v3552_v51 = vmax.f32 %v3551_v26, %v2669_v46  ;;  %v3690_v17 = vmax.f32 %v3689_v38, %v3022_v13  ;;  %v2671_v18 = vpop.f32.mrb[225].mxu0  ;;  %v3024_v21 = vpop.f32.mrb[225].mxu1 }
 0x4c9   : > { %v3621_v32 = vmax.f32 %v3620_v24, %v2671_v18  ;;  %v3759_v22 = vmax.f32 %v3758_v3, %v3024_v21  ;;  %v2673_v11 = vpop.f32.mrb[226].mxu0  ;;  %v3026_v27 = vpop.f32.mrb[226].mxu1 }
 0x4ca   : > { %v3553_v15 = vmax.f32 %v3552_v51, %v2673_v11  ;;  %v3691_v53 = vmax.f32 %v3690_v17, %v3026_v27  ;;  %v2675_v34 = vpop.f32.mrb[227].mxu0  ;;  %v3028_v41 = vpop.f32.mrb[227].mxu1 }
 0x4cb   : > { %v3622_v28 = vmax.f32 %v3621_v32, %v2675_v34  ;;  %v3760_v5 = vmax.f32 %v3759_v22, %v3028_v41 }
 0x4cf   : > { %v2679_v29 = vpop.f32.mrb[228].mxu0  ;;  %v3032_v54 = vpop.f32.mrb[228].mxu1 }
 0x4d0   : > { %v3554_v56 = vmax.f32 %v3553_v15, %v2679_v29  ;;  %v3692_v48 = vmax.f32 %v3691_v53, %v3032_v54  ;;  %v2681_v2 = vpop.f32.mrb[229].mxu0  ;;  %v3034_v33 = vpop.f32.mrb[229].mxu1 }
 0x4d1   : > { %v3623_v35 = vmax.f32 %v3622_v28, %v2681_v2  ;;  %v3761_v36 = vmax.f32 %v3760_v5, %v3034_v33  ;;  %v2683_v37 = vpop.f32.mrb[230].mxu0  ;;  %v3036_v57 = vpop.f32.mrb[230].mxu1 }
 0x4d2   : > { %v3555_v58 = vmax.f32 %v3554_v56, %v2683_v37  ;;  %v3693_v20 = vmax.f32 %v3692_v48, %v3036_v57  ;;  %v2685_v47 = vpop.f32.mrb[231].mxu0  ;;  %v3038_v59 = vpop.f32.mrb[231].mxu1 }
 0x4d3   : > { %v3624_v9 = vmax.f32 %v3623_v35, %v2685_v47  ;;  %v3762_v49 = vmax.f32 %v3761_v36, %v3038_v59 }
 0x4d7   : > { %v2689_v31 = vpop.f32.mrb[232].mxu0  ;;  %v3042_v60 = vpop.f32.mrb[232].mxu1 }
 0x4d8   : > { %v3556_v55 = vmax.f32 %v3555_v58, %v2689_v31  ;;  %v3694_v61 = vmax.f32 %v3693_v20, %v3042_v60  ;;  %v2691_v42 = vpop.f32.mrb[233].mxu0  ;;  %v3044_v52 = vpop.f32.mrb[233].mxu1 }
 0x4d9   : > { %v3625_v16 = vmax.f32 %v3624_v9, %v2691_v42  ;;  %v3763_v25 = vmax.f32 %v3762_v49, %v3044_v52  ;;  %v2693_v62 = vpop.f32.mrb[234].mxu0  ;;  %v3046_v63 = vpop.f32.mrb[234].mxu1 }
 0x4da   : > { %v3557_v4 = vmax.f32 %v3556_v55, %v2693_v62  ;;  %v3695_v0 = vmax.f32 %v3694_v61, %v3046_v63  ;;  %v2695_v1 = vpop.f32.mrb[235].mxu0  ;;  %v3048_v44 = vpop.f32.mrb[235].mxu1 }
 0x4db   : > { %v3626_v19 = vmax.f32 %v3625_v16, %v2695_v1  ;;  %v3764_v12 = vmax.f32 %v3763_v25, %v3048_v44 }
 0x4df   : > { %v2699_v39 = vpop.f32.mrb[236].mxu0  ;;  %v3052_v40 = vpop.f32.mrb[236].mxu1 }
 0x4e0   : > { %v3558_v23 = vmax.f32 %v3557_v4, %v2699_v39  ;;  %v3696_v6 = vmax.f32 %v3695_v0, %v3052_v40  ;;  %v2701_v7 = vpop.f32.mrb[237].mxu0  ;;  %v3054_v45 = vpop.f32.mrb[237].mxu1 }
 0x4e1   : > { %v3627_v26 = vmax.f32 %v3626_v19, %v2701_v7  ;;  %v3765_v38 = vmax.f32 %v3764_v12, %v3054_v45  ;;  %v2703_v8 = vpop.f32.mrb[238].mxu0  ;;  %v3056_v10 = vpop.f32.mrb[238].mxu1 }
 0x4e2   : > { %v3559_v24 = vmax.f32 %v3558_v23, %v2703_v8  ;;  %v3697_v3 = vmax.f32 %v3696_v6, %v3056_v10  ;;  %v2705_v46 = vpop.f32.mrb[239].mxu0  ;;  %v3058_v13 = vpop.f32.mrb[239].mxu1 }
 0x4e3   : > { %v3628_v51 = vmax.f32 %v3627_v26, %v2705_v46  ;;  %v3766_v17 = vmax.f32 %v3765_v38, %v3058_v13 }
 0x4e7   : > { %v2709_v18 = vpop.f32.mrb[240].mxu0  ;;  %v3062_v21 = vpop.f32.mrb[240].mxu1 }
 0x4e8   : > { %v3560_v32 = vmax.f32 %v3559_v24, %v2709_v18  ;;  %v3698_v22 = vmax.f32 %v3697_v3, %v3062_v21  ;;  %v2711_v11 = vpop.f32.mrb[241].mxu0  ;;  %v3064_v27 = vpop.f32.mrb[241].mxu1 }
 0x4e9   : > { %v3629_v15 = vmax.f32 %v3628_v51, %v2711_v11  ;;  %v3767_v53 = vmax.f32 %v3766_v17, %v3064_v27  ;;  %v2713_v34 = vpop.f32.mrb[242].mxu0  ;;  %v3066_v41 = vpop.f32.mrb[242].mxu1 }
 0x4ea   : > { %v3561_v28 = vmax.f32 %v3560_v32, %v2713_v34  ;;  %v3699_v5 = vmax.f32 %v3698_v22, %v3066_v41  ;;  %v2715_v29 = vpop.f32.mrb[243].mxu0  ;;  %v3068_v54 = vpop.f32.mrb[243].mxu1 }
 0x4eb   : > { %v3630_v56 = vmax.f32 %v3629_v15, %v2715_v29  ;;  %v3768_v48 = vmax.f32 %v3767_v53, %v3068_v54 }
 0x4ef   : > { %v2719_v2 = vpop.f32.mrb[244].mxu0  ;;  %v3072_v33 = vpop.f32.mrb[244].mxu1 }
 0x4f0   : > { %v3562_v35 = vmax.f32 %v3561_v28, %v2719_v2  ;;  %v3700_v36 = vmax.f32 %v3699_v5, %v3072_v33  ;;  %v2721_v37 = vpop.f32.mrb[245].mxu0  ;;  %v3074_v57 = vpop.f32.mrb[245].mxu1 }
 0x4f1   : > { %v3631_v58 = vmax.f32 %v3630_v56, %v2721_v37  ;;  %v3769_v20 = vmax.f32 %v3768_v48, %v3074_v57  ;;  %v2723_v47 = vpop.f32.mrb[246].mxu0  ;;  %v3076_v59 = vpop.f32.mrb[246].mxu1 }
 0x4f2   : > { %v3563_v9 = vmax.f32 %v3562_v35, %v2723_v47  ;;  %v3701_v49 = vmax.f32 %v3700_v36, %v3076_v59  ;;  %v2725_v31 = vpop.f32.mrb[247].mxu0  ;;  %v3078_v60 = vpop.f32.mrb[247].mxu1 }
 0x4f3   : > { %v3632_v55 = vmax.f32 %v3631_v58, %v2725_v31  ;;  %v3770_v61 = vmax.f32 %v3769_v20, %v3078_v60 }
 0x4f7   : > { %v2729_v42 = vpop.f32.mrb[248].mxu0  ;;  %v3082_v52 = vpop.f32.mrb[248].mxu1 }
 0x4f8   : > { %v3564_v16 = vmax.f32 %v3563_v9, %v2729_v42  ;;  %v3702_v25 = vmax.f32 %v3701_v49, %v3082_v52  ;;  %v2731_v62 = vpop.f32.mrb[249].mxu0  ;;  %v3084_v63 = vpop.f32.mrb[249].mxu1 }
 0x4f9   : > { %v3633_v4 = vmax.f32 %v3632_v55, %v2731_v62  ;;  %v3771_v0 = vmax.f32 %v3770_v61, %v3084_v63  ;;  %v2733_v1 = vpop.f32.mrb[250].mxu0  ;;  %v3086_v44 = vpop.f32.mrb[250].mxu1 }
 0x4fa   : > { %v3565_v19 = vmax.f32 %v3564_v16, %v2733_v1  ;;  %v3703_v12 = vmax.f32 %v3702_v25, %v3086_v44  ;;  %v2735_v39 = vpop.f32.mrb[251].mxu0  ;;  %v3088_v40 = vpop.f32.mrb[251].mxu1 }
 0x4fb   : > { %v3634_v23 = vmax.f32 %v3633_v4, %v2735_v39  ;;  %v3772_v6 = vmax.f32 %v3771_v0, %v3088_v40 }
 0x4ff   : > { %v2739_v7 = vpop.f32.mrb[252].mxu0  ;;  %v3092_v45 = vpop.f32.mrb[252].mxu1 }
 0x500   : > { %v3566_v26 = vmax.f32 %v3565_v19, %v2739_v7  ;;  %v3704_v38 = vmax.f32 %v3703_v12, %v3092_v45  ;;  %v2741_v8 = vpop.f32.mrb[253].mxu0  ;;  %v3094_v10 = vpop.f32.mrb[253].mxu1 }
 0x501   : > { %v3635_v24 = vmax.f32 %v3634_v23, %v2741_v8  ;;  %v3773_v3 = vmax.f32 %v3772_v6, %v3094_v10  ;;  %v2743_v46 = vpop.f32.mrb[254].mxu0  ;;  %v3096_v13 = vpop.f32.mrb[254].mxu1 }
 0x502   : > { %v3567_v51 = vmax.f32 %v3566_v26, %v2743_v46  ;;  %v3705_v17 = vmax.f32 %v3704_v38, %v3096_v13  ;;  %v2745_v18 = vpop.f32.mrb[255].mxu0  ;;  %v3098_v21 = vpop.f32.mrb[255].mxu1 }
 0x503   : > { %v3636_v32 = vmax.f32 %v3635_v24, %v2745_v18  ;;  %v3774_v22 = vmax.f32 %v3773_v3, %v3098_v21 }
 0x507   : > { %v2749_v11 = vpop.f32.mrb[0].mxu0  ;;  %v3102_v27 = vpop.f32.mrb[0].mxu1 }
 0x508   : > { %v3568_v15 = vmax.f32 %v3567_v51, %v2749_v11  ;;  %v3706_v53 = vmax.f32 %v3705_v17, %v3102_v27  ;;  %v2751_v34 = vpop.f32.mrb[1].mxu0  ;;  %v3104_v41 = vpop.f32.mrb[1].mxu1 }
 0x509   : > { %v3637_v28 = vmax.f32 %v3636_v32, %v2751_v34  ;;  %v3775_v5 = vmax.f32 %v3774_v22, %v3104_v41  ;;  %v2753_v29 = vpop.f32.mrb[2].mxu0  ;;  %v3106_v54 = vpop.f32.mrb[2].mxu1 }
 0x50a   : > { %v3569_v56 = vmax.f32 %v3568_v15, %v2753_v29  ;;  %v3707_v48 = vmax.f32 %v3706_v53, %v3106_v54  ;;  %v2755_v2 = vpop.f32.mrb[3].mxu0  ;;  %v3108_v33 = vpop.f32.mrb[3].mxu1 }
 0x50b   : > { %v3638_v35 = vmax.f32 %v3637_v28, %v2755_v2  ;;  %v3776_v36 = vmax.f32 %v3775_v5, %v3108_v33 }
 0x50f   : > { %v2759_v37 = vpop.f32.mrb[4].mxu0  ;;  %v3112_v57 = vpop.f32.mrb[4].mxu1 }
 0x510   : > { %v3570_v58 = vmax.f32 %v3569_v56, %v2759_v37  ;;  %v3708_v20 = vmax.f32 %v3707_v48, %v3112_v57  ;;  %v2761_v47 = vpop.f32.mrb[5].mxu0  ;;  %v3114_v59 = vpop.f32.mrb[5].mxu1 }
 0x511   : > { %v3639_v9 = vmax.f32 %v3638_v35, %v2761_v47  ;;  %v3777_v49 = vmax.f32 %v3776_v36, %v3114_v59  ;;  %v2763_v31 = vpop.f32.mrb[6].mxu0  ;;  %v3116_v60 = vpop.f32.mrb[6].mxu1 }
 0x512   : > { %v3571_v55 = vmax.f32 %v3570_v58, %v2763_v31  ;;  %v3709_v61 = vmax.f32 %v3708_v20, %v3116_v60  ;;  %v2765_v42 = vpop.f32.mrb[7].mxu0  ;;  %v3118_v52 = vpop.f32.mrb[7].mxu1 }
 0x513   : > { %v3640_v16 = vmax.f32 %v3639_v9, %v2765_v42  ;;  %v3778_v25 = vmax.f32 %v3777_v49, %v3118_v52 }
 0x517   : > { %v2769_v62 = vpop.f32.mrb[8].mxu0  ;;  %v3122_v63 = vpop.f32.mrb[8].mxu1 }
 0x518   : > { %v3572_v4 = vmax.f32 %v3571_v55, %v2769_v62  ;;  %v3710_v0 = vmax.f32 %v3709_v61, %v3122_v63  ;;  %v2771_v1 = vpop.f32.mrb[9].mxu0  ;;  %v3124_v44 = vpop.f32.mrb[9].mxu1 }
 0x519   : > { %v3641_v19 = vmax.f32 %v3640_v16, %v2771_v1  ;;  %v3779_v12 = vmax.f32 %v3778_v25, %v3124_v44  ;;  %v2773_v39 = vpop.f32.mrb[10].mxu0  ;;  %v3126_v40 = vpop.f32.mrb[10].mxu1 }
 0x51a   : > { %v3573_v23 = vmax.f32 %v3572_v4, %v2773_v39  ;;  %v3711_v6 = vmax.f32 %v3710_v0, %v3126_v40  ;;  %v2775_v7 = vpop.f32.mrb[11].mxu0  ;;  %v3128_v45 = vpop.f32.mrb[11].mxu1 }
 0x51b   : > { %v3642_v26 = vmax.f32 %v3641_v19, %v2775_v7  ;;  %v3780_v38 = vmax.f32 %v3779_v12, %v3128_v45 }
 0x51f   : > { %v2779_v8 = vpop.f32.mrb[12].mxu0  ;;  %v3132_v10 = vpop.f32.mrb[12].mxu1 }
 0x520   : > { %v3574_v24 = vmax.f32 %v3573_v23, %v2779_v8  ;;  %v3712_v3 = vmax.f32 %v3711_v6, %v3132_v10  ;;  %v2781_v46 = vpop.f32.mrb[13].mxu0  ;;  %v3134_v13 = vpop.f32.mrb[13].mxu1 }
 0x521   : > { %v3643_v51 = vmax.f32 %v3642_v26, %v2781_v46  ;;  %v3781_v17 = vmax.f32 %v3780_v38, %v3134_v13  ;;  %v2783_v18 = vpop.f32.mrb[14].mxu0  ;;  %v3136_v21 = vpop.f32.mrb[14].mxu1 }
 0x522   : > { %v3575_v32 = vmax.f32 %v3574_v24, %v2783_v18  ;;  %v3713_v22 = vmax.f32 %v3712_v3, %v3136_v21  ;;  %v2785_v11 = vpop.f32.mrb[15].mxu0  ;;  %v3138_v27 = vpop.f32.mrb[15].mxu1 }
 0x523   : > { %v3644_v15 = vmax.f32 %v3643_v51, %v2785_v11  ;;  %v3782_v53 = vmax.f32 %v3781_v17, %v3138_v27 }
 0x527   : > { %v2789_v34 = vpop.f32.mrb[16].mxu0  ;;  %v3142_v41 = vpop.f32.mrb[16].mxu1 }
 0x528   : > { %v3576_v28 = vmax.f32 %v3575_v32, %v2789_v34  ;;  %v3714_v5 = vmax.f32 %v3713_v22, %v3142_v41  ;;  %v2791_v29 = vpop.f32.mrb[17].mxu0  ;;  %v3144_v54 = vpop.f32.mrb[17].mxu1 }
 0x529   : > { %v3645_v56 = vmax.f32 %v3644_v15, %v2791_v29  ;;  %v3783_v48 = vmax.f32 %v3782_v53, %v3144_v54  ;;  %v2793_v2 = vpop.f32.mrb[18].mxu0  ;;  %v3146_v33 = vpop.f32.mrb[18].mxu1 }
 0x52a   : > { %v3577_v35 = vmax.f32 %v3576_v28, %v2793_v2  ;;  %v3715_v36 = vmax.f32 %v3714_v5, %v3146_v33  ;;  %v2795_v37 = vpop.f32.mrb[19].mxu0  ;;  %v3148_v57 = vpop.f32.mrb[19].mxu1 }
 0x52b   : > { %v3646_v58 = vmax.f32 %v3645_v56, %v2795_v37  ;;  %v3784_v20 = vmax.f32 %v3783_v48, %v3148_v57 }
 0x52f   : > { %v2799_v47 = vpop.f32.mrb[20].mxu0  ;;  %v3152_v59 = vpop.f32.mrb[20].mxu1 }
 0x530   : > { %v3578_v9 = vmax.f32 %v3577_v35, %v2799_v47  ;;  %v3716_v49 = vmax.f32 %v3715_v36, %v3152_v59  ;;  %v2801_v31 = vpop.f32.mrb[21].mxu0  ;;  %v3154_v60 = vpop.f32.mrb[21].mxu1 }
 0x531   : > { %v3647_v55 = vmax.f32 %v3646_v58, %v2801_v31  ;;  %v3785_v61 = vmax.f32 %v3784_v20, %v3154_v60  ;;  %v2803_v42 = vpop.f32.mrb[22].mxu0  ;;  %v3156_v52 = vpop.f32.mrb[22].mxu1 }
 0x532   : > { %v3579_v16 = vmax.f32 %v3578_v9, %v2803_v42  ;;  %v3717_v25 = vmax.f32 %v3716_v49, %v3156_v52  ;;  %v2805_v62 = vpop.f32.mrb[23].mxu0  ;;  %v3158_v63 = vpop.f32.mrb[23].mxu1 }
 0x533   : > { %v3648_v4 = vmax.f32 %v3647_v55, %v2805_v62  ;;  %v3786_v0 = vmax.f32 %v3785_v61, %v3158_v63 }
 0x537   : > { %v2809_v1 = vpop.f32.mrb[24].mxu0  ;;  %v3162_v44 = vpop.f32.mrb[24].mxu1 }
 0x538   : > { %v3580_v19 = vmax.f32 %v3579_v16, %v2809_v1  ;;  %v3718_v12 = vmax.f32 %v3717_v25, %v3162_v44  ;;  %v2811_v39 = vpop.f32.mrb[25].mxu0  ;;  %v3164_v40 = vpop.f32.mrb[25].mxu1 }
 0x539   : > { %v3649_v23 = vmax.f32 %v3648_v4, %v2811_v39  ;;  %v3787_v6 = vmax.f32 %v3786_v0, %v3164_v40  ;;  %v2813_v7 = vpop.f32.mrb[26].mxu0  ;;  %v3166_v45 = vpop.f32.mrb[26].mxu1 }
 0x53a   : > { %v3581_v26 = vmax.f32 %v3580_v19, %v2813_v7  ;;  %v3719_v38 = vmax.f32 %v3718_v12, %v3166_v45  ;;  %v2815_v8 = vpop.f32.mrb[27].mxu0  ;;  %v3168_v10 = vpop.f32.mrb[27].mxu1 }
 0x53b   : > { %v3650_v24 = vmax.f32 %v3649_v23, %v2815_v8  ;;  %v3788_v3 = vmax.f32 %v3787_v6, %v3168_v10 }
 0x53f   : > { %v2819_v46 = vpop.f32.mrb[28].mxu0  ;;  %v3172_v13 = vpop.f32.mrb[28].mxu1 }
 0x540   : > { %v3582_v51 = vmax.f32 %v3581_v26, %v2819_v46  ;;  %v3720_v17 = vmax.f32 %v3719_v38, %v3172_v13  ;;  %v2821_v18 = vpop.f32.mrb[29].mxu0  ;;  %v3174_v21 = vpop.f32.mrb[29].mxu1 }
 0x541   : > { %v3651_v32 = vmax.f32 %v3650_v24, %v2821_v18  ;;  %v3789_v22 = vmax.f32 %v3788_v3, %v3174_v21  ;;  %v2823_v11 = vpop.f32.mrb[30].mxu0  ;;  %v3176_v27 = vpop.f32.mrb[30].mxu1 }
 0x542   : > { %v3583_v15 = vmax.f32 %v3582_v51, %v2823_v11  ;;  %v3721_v53 = vmax.f32 %v3720_v17, %v3176_v27  ;;  %v2825_v34 = vpop.f32.mrb[31].mxu0  ;;  %v3178_v41 = vpop.f32.mrb[31].mxu1 }
 0x543   : > { %v3652_v28 = vmax.f32 %v3651_v32, %v2825_v34  ;;  %v3790_v5 = vmax.f32 %v3789_v22, %v3178_v41 }
 0x547   : > { %v2829_v29 = vpop.f32.mrb[32].mxu0  ;;  %v3182_v54 = vpop.f32.mrb[32].mxu1 }
 0x548   : > { %v3584_v56 = vmax.f32 %v3583_v15, %v2829_v29  ;;  %v3722_v48 = vmax.f32 %v3721_v53, %v3182_v54  ;;  %v2831_v2 = vpop.f32.mrb[33].mxu0  ;;  %v3184_v33 = vpop.f32.mrb[33].mxu1 }
 0x549   : > { %v3653_v35 = vmax.f32 %v3652_v28, %v2831_v2  ;;  %v3791_v36 = vmax.f32 %v3790_v5, %v3184_v33  ;;  %v2833_v37 = vpop.f32.mrb[34].mxu0  ;;  %v3186_v57 = vpop.f32.mrb[34].mxu1 }
 0x54a   : > { %v3585_v58 = vmax.f32 %v3584_v56, %v2833_v37  ;;  %v3723_v20 = vmax.f32 %v3722_v48, %v3186_v57  ;;  %v2835_v47 = vpop.f32.mrb[35].mxu0  ;;  %v3188_v59 = vpop.f32.mrb[35].mxu1 }
 0x54b   : > { %v3654_v9 = vmax.f32 %v3653_v35, %v2835_v47  ;;  %v3792_v49 = vmax.f32 %v3791_v36, %v3188_v59 }
 0x54f   : > { %v2839_v31 = vpop.f32.mrb[36].mxu0  ;;  %v3192_v60 = vpop.f32.mrb[36].mxu1 }
 0x550   : > { %v3586_v55 = vmax.f32 %v3585_v58, %v2839_v31  ;;  %v3724_v61 = vmax.f32 %v3723_v20, %v3192_v60  ;;  %v2841_v42 = vpop.f32.mrb[37].mxu0  ;;  %v3194_v52 = vpop.f32.mrb[37].mxu1 }
 0x551   : > { %v3655_v16 = vmax.f32 %v3654_v9, %v2841_v42  ;;  %v3793_v25 = vmax.f32 %v3792_v49, %v3194_v52  ;;  %v2843_v62 = vpop.f32.mrb[38].mxu0  ;;  %v3196_v63 = vpop.f32.mrb[38].mxu1 }
 0x552   : > { %v3587_v4 = vmax.f32 %v3586_v55, %v2843_v62  ;;  %v3725_v0 = vmax.f32 %v3724_v61, %v3196_v63  ;;  %v2845_v1 = vpop.f32.mrb[39].mxu0  ;;  %v3198_v44 = vpop.f32.mrb[39].mxu1 }
 0x553   : > { %v3656_v19 = vmax.f32 %v3655_v16, %v2845_v1  ;;  %v3794_v12 = vmax.f32 %v3793_v25, %v3198_v44 }
 0x557   : > { %v2849_v39 = vpop.f32.mrb[40].mxu0  ;;  %v3202_v40 = vpop.f32.mrb[40].mxu1 }
 0x558   : > { %v3588_v23 = vmax.f32 %v3587_v4, %v2849_v39  ;;  %v3726_v6 = vmax.f32 %v3725_v0, %v3202_v40  ;;  %v2851_v7 = vpop.f32.mrb[41].mxu0  ;;  %v3204_v45 = vpop.f32.mrb[41].mxu1 }
 0x559   : > { %v3657_v26 = vmax.f32 %v3656_v19, %v2851_v7  ;;  %v3795_v38 = vmax.f32 %v3794_v12, %v3204_v45  ;;  %v2853_v8 = vpop.f32.mrb[42].mxu0  ;;  %v3206_v10 = vpop.f32.mrb[42].mxu1 }
 0x55a   : > { %v3589_v24 = vmax.f32 %v3588_v23, %v2853_v8  ;;  %v3727_v3 = vmax.f32 %v3726_v6, %v3206_v10  ;;  %v2855_v46 = vpop.f32.mrb[43].mxu0  ;;  %v3208_v13 = vpop.f32.mrb[43].mxu1 }
 0x55b   : > { %v3658_v51 = vmax.f32 %v3657_v26, %v2855_v46  ;;  %v3796_v17 = vmax.f32 %v3795_v38, %v3208_v13 }
 0x55f   : > { %v2859_v18 = vpop.f32.mrb[44].mxu0  ;;  %v3212_v21 = vpop.f32.mrb[44].mxu1 }
 0x560   : > { %v3590_v32 = vmax.f32 %v3589_v24, %v2859_v18  ;;  %v3728_v22 = vmax.f32 %v3727_v3, %v3212_v21  ;;  %v2861_v11 = vpop.f32.mrb[45].mxu0  ;;  %v3214_v27 = vpop.f32.mrb[45].mxu1 }
 0x561   : > { %v3659_v15 = vmax.f32 %v3658_v51, %v2861_v11  ;;  %v3797_v53 = vmax.f32 %v3796_v17, %v3214_v27  ;;  %v2863_v34 = vpop.f32.mrb[46].mxu0  ;;  %v3216_v41 = vpop.f32.mrb[46].mxu1 }
 0x562   : > { %v3591_v28 = vmax.f32 %v3590_v32, %v2863_v34  ;;  %v3729_v5 = vmax.f32 %v3728_v22, %v3216_v41  ;;  %v2865_v29 = vpop.f32.mrb[47].mxu0  ;;  %v3218_v54 = vpop.f32.mrb[47].mxu1 }
 0x563   : > { %v3660_v56 = vmax.f32 %v3659_v15, %v2865_v29  ;;  %v3798_v48 = vmax.f32 %v3797_v53, %v3218_v54 }
 0x567   : > { %v2869_v2 = vpop.f32.mrb[48].mxu0  ;;  %v3222_v33 = vpop.f32.mrb[48].mxu1 }
 0x568   : > { %v3592_v35 = vmax.f32 %v3591_v28, %v2869_v2  ;;  %v3730_v36 = vmax.f32 %v3729_v5, %v3222_v33  ;;  %v2871_v37 = vpop.f32.mrb[49].mxu0  ;;  %v3224_v57 = vpop.f32.mrb[49].mxu1 }
 0x569   : > { %v3661_v58 = vmax.f32 %v3660_v56, %v2871_v37  ;;  %v3799_v20 = vmax.f32 %v3798_v48, %v3224_v57  ;;  %v2873_v47 = vpop.f32.mrb[50].mxu0  ;;  %v3226_v59 = vpop.f32.mrb[50].mxu1 }
 0x56a   : > { %v3593_v9 = vmax.f32 %v3592_v35, %v2873_v47  ;;  %v3731_v49 = vmax.f32 %v3730_v36, %v3226_v59  ;;  %v2875_v31 = vpop.f32.mrb[51].mxu0  ;;  %v3228_v60 = vpop.f32.mrb[51].mxu1 }
 0x56b   : > { %v3662_v55 = vmax.f32 %v3661_v58, %v2875_v31  ;;  %v3800_v61 = vmax.f32 %v3799_v20, %v3228_v60 }
 0x56f   : > { %v2879_v42 = vpop.f32.mrb[52].mxu0  ;;  %v3232_v52 = vpop.f32.mrb[52].mxu1 }
 0x570   : > { %v3594_v16 = vmax.f32 %v3593_v9, %v2879_v42  ;;  %v3732_v25 = vmax.f32 %v3731_v49, %v3232_v52  ;;  %v2881_v62 = vpop.f32.mrb[53].mxu0  ;;  %v3234_v63 = vpop.f32.mrb[53].mxu1 }
 0x571   : > { %v3663_v4 = vmax.f32 %v3662_v55, %v2881_v62  ;;  %v3801_v0 = vmax.f32 %v3800_v61, %v3234_v63  ;;  %v2883_v1 = vpop.f32.mrb[54].mxu0  ;;  %v3236_v44 = vpop.f32.mrb[54].mxu1 }
 0x572   : > { %v3595_v19 = vmax.f32 %v3594_v16, %v2883_v1  ;;  %v3733_v12 = vmax.f32 %v3732_v25, %v3236_v44  ;;  %v2885_v39 = vpop.f32.mrb[55].mxu0  ;;  %v3238_v40 = vpop.f32.mrb[55].mxu1 }
 0x573   : > { %v3664_v23 = vmax.f32 %v3663_v4, %v2885_v39  ;;  %v3802_v6 = vmax.f32 %v3801_v0, %v3238_v40 }
 0x577   : > { %v2889_v7 = vpop.f32.mrb[56].mxu0  ;;  %v3242_v45 = vpop.f32.mrb[56].mxu1 }
 0x578   : > { %v3596_v26 = vmax.f32 %v3595_v19, %v2889_v7  ;;  %v3734_v38 = vmax.f32 %v3733_v12, %v3242_v45  ;;  %v2891_v8 = vpop.f32.mrb[57].mxu0  ;;  %v3244_v10 = vpop.f32.mrb[57].mxu1  ;;  %v3865_v45 = vrot.slane %v3857_v43, %v5580_v14 }
 0x579   : > { %v3665_v24 = vmax.f32 %v3664_v23, %v2891_v8  ;;  %v3803_v3 = vmax.f32 %v3802_v6, %v3244_v10  ;;  %v2893_v46 = vpop.f32.mrb[58].mxu0  ;;  %v3246_v13 = vpop.f32.mrb[58].mxu1 }
 0x57a   : > { %v3597_v51 = vmax.f32 %v3596_v26, %v2893_v46  ;;  %v3735_v17 = vmax.f32 %v3734_v38, %v3246_v13  ;;  %v2895_v18 = vpop.f32.mrb[59].mxu0  ;;  %v3248_v21 = vpop.f32.mrb[59].mxu1  ;;  %v3945_v38 = vld [vmem:[%s5700_s16] sm:$0xff] }
 0x57b   : > { %v3666_v32 = vmax.f32 %v3665_v24, %v2895_v18  ;;  %v3804_v22 = vmax.f32 %v3803_v3, %v3248_v21 }
 0x57f   : > { %v2899_v11 = vpop.f32.mrb[60].mxu0  ;;  %v3252_v27 = vpop.f32.mrb[60].mxu1 }
 0x580   : > { %v3598_v15 = vmax.f32 %v3597_v51, %v2899_v11  ;;  %v3736_v53 = vmax.f32 %v3735_v17, %v3252_v27  ;;  %v2901_v34 = vpop.f32.mrb[61].mxu0  ;;  %v3254_v41 = vpop.f32.mrb[61].mxu1 }
 0x581   : > { %v3667_v28 = vmax.f32 %v3666_v32, %v2901_v34  ;;  %v3805_v5 = vmax.f32 %v3804_v22, %v3254_v41  ;;  %v2903_v29 = vpop.f32.mrb[62].mxu0  ;;  %v3256_v54 = vpop.f32.mrb[62].mxu1 }
 0x582   : > { %v3599_v56 = vmax.f32 %v3598_v15, %v2903_v29  ;;  %v3737_v48 = vmax.f32 %v3736_v53, %v3256_v54  ;;  %v2905_v2 = vpop.f32.mrb[63].mxu0  ;;  %v3258_v33 = vpop.f32.mrb[63].mxu1 }
 0x583   : > { %v3668_v35 = vmax.f32 %v3667_v28, %v2905_v2  ;;  %v3806_v36 = vmax.f32 %v3805_v5, %v3258_v33 }
 0x584   : > { %v3600_v37 = vrot.slane %v3599_v56, 4  ;;  %v3738_v57 = vrot.slane %v3737_v48, 4 }
 0x585   : > { %v3669_v58 = vrot.slane %v3668_v35, 4  ;;  %v3807_v20 = vrot.slane %v3806_v36, 4 }
 0x586   : > { %v3601_v47 = vmax.f32 %v3599_v56, %v3600_v37  ;;  %v3739_v59 = vmax.f32 %v3737_v48, %v3738_v57 }
 0x587   : > { %v3670_v9 = vmax.f32 %v3668_v35, %v3669_v58  ;;  %v3808_v49 = vmax.f32 %v3806_v36, %v3807_v20 }
 0x588   : > { %v3602_v31 = vrot.slane %v3601_v47, 2  ;;  %v3740_v60 = vrot.slane %v3739_v59, 2 }
 0x589   : > { %v3671_v55 = vrot.slane %v3670_v9, 2  ;;  %v3809_v61 = vrot.slane %v3808_v49, 2 }
 0x58a   : > { %v3603_v42 = vmax.f32 %v3601_v47, %v3602_v31  ;;  %v3741_v52 = vmax.f32 %v3739_v59, %v3740_v60 }
 0x58b   : > { %v3672_v16 = vmax.f32 %v3670_v9, %v3671_v55  ;;  %v3810_v25 = vmax.f32 %v3808_v49, %v3809_v61 }
 0x58c   : > { %v3604_v62 = vrot.slane %v3603_v42, 1  ;;  %v3742_v63 = vrot.slane %v3741_v52, 1 }
 0x58d   : > { %v3673_v4 = vrot.slane %v3672_v16, 1  ;;  %v3811_v0 = vrot.slane %v3810_v25, 1 }
 0x58e   : > { %v3605_v1 = vmax.f32 %v3603_v42, %v3604_v62  ;;  %v3743_v44 = vmax.f32 %v3741_v52, %v3742_v63 }
 0x58f   : > { %v3674_v19 = vmax.f32 %v3672_v16, %v3673_v4  ;;  %v3812_v12 = vmax.f32 %v3810_v25, %v3811_v0 }
 0x591   : > { %v3827_v39 = vcombine.low %v3605_v1, %v3674_v19  ;;  %v3828_v40 = vcombine.low %v3743_v44, %v3812_v12 }
 0x593   : > { %v3849_v23 = vrot.slane %v3827_v39, %v5580_v14  ;;  %v3856_v6 = vrot.slane %v3828_v40, %v5580_v14 }
 0x595   : > { %v3858_v7 = vcombine.low %v3849_v23, %v3856_v6 }
 0x597   : > { %v3872_v26 = vrot.slane %v3858_v7, %v5580_v14 }
 0x599   : > { %v3873_v8 = vcombine.low %v3865_v45, %v3872_v26 }
 0x59b   : > { %v3946_v10 = vadd.f32 %v3945_v38, %v3873_v8 }
 0x59d   : > { %v3947_v24 = vmax.f32 %v3946_v10, 0.0 }
 0x59f   : > { %3948 = vst [vmem:[%s356_s19] sm:$0xff] %v3947_v24 }
 0x5a0   : > { %4682 = shalt.err (!%p4679_p0)
}
 0x5a1   : > { %s4683_s6 = scalar_lea.hbm %s5619_s20, 128  ;;  %s4687_s18 = scalar_lea.hbm %s5701_s12, 256 }
 0x5a2   : > { %p4684_p4 = scmp.ne.s32.totalorder %s5619_s20, %s4683_s6  ;;  %p4688_p12 = scmp.lt.u32.totalorder %s5619_s20, %s5701_s12 }
 0x5a3   : > { %p4689_p1 = scmp.lt.u32.totalorder %s4687_s18, %s4683_s6  ;;  %p4691_p11 = scmp.lt.u32.totalorder %s4683_s6, %s5619_s20 }
 0x5a4   : > { %p4685_p2 = pnand %p4684_p4, %p4965_p10 }
 0x5a5   : > { %p4690_p13 = por %p4689_p1, %p4688_p12 }
 0x5a6   : > { %p4686_p8 = pneg %p4685_p2 }
 0x5a7   : > { %p4692_p6 = por %p4691_p11, %p4690_p13 }
 0x5a9   : > { %p4693_p3 = pnand %p4692_p6, %p4686_p8 }
 0x5ab   : > { %4696 = shalt.err (!%p4693_p3)
}
 0x5ac   : > { %4457 = dma.vmem_to_hbm [thread:$0]  (%p4965_p10), %s5621_s21, 128, %s5619_s20, %s3950_s30  }
 0x5ad PF: > { %s5702_s17 = sld [smem:[#allocation16_spill]]  ;;  %s5703_s19 = sld [smem:[#allocation17_spill]] }
 0x5ae   : > { %p5705_p7 = scmp.ge.s32.totalorder %s4759_s29, 2 }
 0x5b3   : > { %s3976_s22 = sand.u32 1, %s5702_s17   ;;  %p5704_p5 = scmp.ne.s32.totalorder %s5703_s19, 0 }
 0x5b4   : > { %s3977_s23 = scalar_lea.sflag [#allocation5], %s3976_s22 }
 0x5b5   : > { %p4474_p9 = pnand %p5705_p7, %p5704_p5 }
 0x5b7   : > { %4734 = dma.done.wait (!%p4474_p9), %s3977_s23, 128  }
 0x5b8   : > { %4736 = vsyncadd (!%p4474_p9), %s3977_s23, 4294967168  ;;  %s25_s29 = sadd.s32 1, %s4759_s29   ;;  %s5706_s24 = smov %s4743_s25 }
 0x5b9   : > { %p22_p0 = scmp.ge.s32.totalorder %s25_s29, 4   ;;  %s5707_s25 = smov %s4747_s26 }
 0x5ba   : > { %s5708_s26 = smov %s4977_s8  ;;  %s5709_s27 = smov %s4755_s28 }
 0x5bb   : > { %s5710_s28 = smov %s5712_s7  ;;  %24 = sbr.rel (!%p22_p0) target bundleno = 11 (0xb), region = 117 }
 0x5c2   :  { %3982 = vsyncpa [#allocation4], 1 }
 0x5c3   :  { %3984 = vsyncpa [#allocation4 + $0x1], 1 }
 0x5c4   :  { %3985 = vsyncpa [#allocation7], 1 }
 0x5c5   :  { %3986 = vsyncpa [#allocation10], 1 }
 0x5c6   :  { %3987 = vsyncpa [#allocation5], 1 }
 0x5c7   :  { %3989 = vsyncpa [#allocation5 + $0x1], 1 }

</bundles_post_ra>
